<compile_context>
chip_gen: v7x
topology: tpu7x:2x2x1
jax: 0.10.0
libtpu: 0.0.40
codegen_flags: <defaults>
</compile_context>

<pallas_src>
import numpy as np
import jax
import jax.numpy as jnp
from jax.experimental import pallas as pl
from jax.experimental.pallas import tpu as pltpu


def _round_up(n, m):
    return ((n + m - 1) // m) * m


def _pad_lead(w):
    # top/bottom zero rows of the flat padded activation (>= w+1, 8-aligned)
    return _round_up(w + 1, 8)


# ----------------------------------------------------------------------------
# in-kernel helpers
# ----------------------------------------------------------------------------
def _dsc_layer(a, pad_ref, xmask_ref, conv_refs, w):
    """Depthwise-separable conv on a row-major flat activation.

    a:         (N, Cin) f32, N = h*w, flat index n = y*w + x
    pad_ref:   VMEM scratch (2*PL + N, Cin), PL = _pad_lead(w)
    xmask_ref: (2, N, 1) f32 -- [0]: left-tap valid (x>0), [1]: right-tap valid (x<w-1)
    conv_refs: dw_w (9,Cin) f32, dw_b (1,Cin) f32, pw_w (Cin,Cout) bf16, pw_b (1,Cout) f32
    """
    dw_w_ref, dw_b_ref, pw_w_ref, pw_b_ref = conv_refs
    n, cin = a.shape
    pad_lead = _pad_lead(w)

    # zero only the y-padding border rows; interior written exactly once.
    border = jnp.zeros((pad_lead, cin), jnp.float32)
    pad_ref[pl.ds(0, pad_lead), :] = border
    pad_ref[pl.ds(pad_lead + n, pad_lead), :] = border
    pad_ref[pl.ds(pad_lead, n), :] = a

    dw_w = dw_w_ref[...]                      # (9, Cin) hoisted out of the tap loop
    mask_l = xmask_ref[0]                     # (N, 1)
    mask_r = xmask_ref[1]                     # (N, 1)

    # depthwise 3x3: 9 shifted reads of the flat padded activation (VPU MACs)
    acc = jnp.zeros((n, cin), jnp.float32)
    for dy in range(3):
        for dx in range(3):
            off = (dy - 1) * w + (dx - 1)
            t = pad_ref[pl.ds(pad_lead + off, n), :]
            if dx == 0:
                t = t * mask_l                # kills row-wrap of the x-1 tap
            elif dx == 2:
                t = t * mask_r                # kills row-wrap of the x+1 tap
            acc = acc + t * dw_w[3 * dy + dx]
    acc = acc + dw_b_ref[...]

    # pointwise 1x1 conv (inference BN folded) as ONE flattened matmul (bf16 MXU).
    y = jnp.dot(acc.astype(jnp.bfloat16), pw_w_ref[...],
                preferred_element_type=jnp.float32) + pw_b_ref[...]
    return jnp.maximum(y, 0.0)                # ReLU -> (N, Cout)


def _maxpool2x2(a, sel_ref, w):
    """2x2 stride-2 max pool on a row-major flat activation.

    Vertical pair max on the VPU (aligned value slices), then one pair of 0/1
    selection matmuls compacts the horizontally adjacent columns (f32 exact).
    """
    n, _ = a.shape
    vm = jnp.maximum(a[: n - w, :], a[w:, :])                  # (N-w, C), VPU
    pe = jnp.dot(sel_ref[0], vm, preferred_element_type=jnp.float32)
    po = jnp.dot(sel_ref[1], vm, preferred_element_type=jnp.float32)
    return jnp.maximum(pe, po)                                 # (N//4, C)


def _make_kernel(h, w):
    hw = h * w

    def kernel(*refs):
        x_ref = refs[0]
        conv = [refs[1 + 4 * l: 1 + 4 * (l + 1)] for l in range(5)]
        xm = refs[21:24]
        sel = refs[24:26]
        m1_ref, b1_ref, m2_ref, b2_ref, havg_ref = refs[26:31]
        temp_ref, thr_ref = refs[31:33]
        out_ref = refs[33]
        pads = refs[34:39]

        x_cm = x_ref[...]                                      # (c, h*w) NCHW-flat

        # channel-major -> row-major (h*w, c) with an exact identity matmul (MXU);
        # avoids any in-kernel relayout/reshape and any wrapper transpose pass.
        eye = (jax.lax.broadcasted_iota(jnp.int32, (hw, hw), 0)
               == jax.lax.broadcasted_iota(jnp.int32, (hw, hw), 1)
               ).astype(jnp.float32)
        a = jax.lax.dot_general(eye, x_cm, (((1,), (1,)), ((), ())),
                                preferred_element_type=jnp.float32)   # (h*w, c)

        # ---- conv block ----
        a = _dsc_layer(a, pads[0], xm[0], conv[0], w)          # (hw,    128)
        a = _maxpool2x2(a, sel[0], w)                          # (hw/4,  128)
        a = _dsc_layer(a, pads[1], xm[1], conv[1], w // 2)     # (hw/4,   96)
        a = _dsc_layer(a, pads[2], xm[1], conv[2], w // 2)     # (hw/4,   64)
        a = _maxpool2x2(a, sel[1], w // 2)                     # (hw/16,  64)
        a = _dsc_layer(a, pads[3], xm[2], conv[3], w // 4)     # (hw/16,  48)
        a = _dsc_layer(a, pads[4], xm[2], conv[4], w // 4)     # (hw/16,  64)

        # ---- AdaptiveAvgPool2d((1,1)) -> (1, 64) ----
        v = jnp.sum(a, axis=0, keepdims=True) * (1.0 / a.shape[0])

        # ---- all attention heads fused into two matmuls ----
        h1 = jnp.dot(v.astype(jnp.bfloat16), m1_ref[...],
                     preferred_element_type=jnp.float32) + b1_ref[...]
        h1 = jnp.maximum(h1, 0.0)                              # (1, nh*cr*T1)
        attn = jnp.dot(h1.astype(jnp.bfloat16), m2_ref[...],
                       preferred_element_type=jnp.float32) + b2_ref[...]  # (1, nh*c)

        # temperature scaling, sparse sigmoid gating (threshold on the scaled
        # pre-sigmoid logits, exactly as in the PyTorch reference), head mean.
        temp = temp_ref[0]
        thr = thr_ref[0]
        scaled = attn / temp
        sig = 1.0 / (1.0 + jnp.exp(-scaled))
        gate = jnp.where(scaled >= thr, sig, jnp.zeros_like(sig))          # (1, nh*c)
        wvec = jax.lax.dot_general(havg_ref[...], gate, (((1,), (1,)), ((), ())),
                                   preferred_element_type=jnp.float32)     # (c, 1)

        out_ref[...] = x_cm * wvec                             # lane-dense NCHW store

    return kernel


# ----------------------------------------------------------------------------
# parameter construction (deterministic, synthetic)
# ----------------------------------------------------------------------------
def init_params(key, c, num_heads=4, r=2):
    eps = 1e-5
    layer_dims = [(c, 128), (128, 96), (96, 64), (64, 48), (48, 64)]
    keys = jax.random.split(key, 64)
    ki = iter(range(64))

    conv_params = []
    for cin, cout in layer_dims:
        dw_w = 0.3 * jax.random.normal(keys[next(ki)], (9, cin), jnp.float32)
        dw_b = 0.1 * jax.random.normal(keys[next(ki)], (1, cin), jnp.float32)
        pw_w = jax.random.normal(keys[next(ki)], (cin, cout), jnp.float32) * jnp.sqrt(2.0 / cin)
        pw_b = 0.05 * jax.random.normal(keys[next(ki)], (1, cout), jnp.float32)
        gamma = 1.0 + 0.1 * jax.random.normal(keys[next(ki)], (cout,), jnp.float32)
        beta = 0.05 * jax.random.normal(keys[next(ki)], (cout,), jnp.float32)
        rmean = 0.05 * jax.random.normal(keys[next(ki)], (cout,), jnp.float32)
        rvar = 1.0 + 0.1 * jax.random.uniform(keys[next(ki)], (cout,), jnp.float32)
        # fold inference-mode BatchNorm into the 1x1 conv; bf16 MXU operand.
        s = gamma / jnp.sqrt(rvar + eps)
        pw_w_f = (pw_w * s[None, :]).astype(jnp.bfloat16)
        pw_b_f = (pw_b - rmean[None, :]) * s[None, :] + beta[None, :]
        conv_params += [dw_w, dw_b, pw_w_f, pw_b_f]

    # attention heads: Conv1d(1, c//r, 32) -> ReLU -> Conv1d(c//r, c, 32) -> AvgPool1d(1)
    # fused across heads: concatenated Toeplitz M1, block-diagonal Toeplitz M2.
    cr = c // r
    K, L = 32, 64
    assert layer_dims[-1][1] == L, "Toeplitz packing assumes a 64-channel conv-block output"
    T1 = L - K + 1                     # 33 (valid conv)
    T2 = T1 - K + 1                    # 2  (valid conv)
    assert cr >= 1 and T1 > 0 and T2 > 0
    R1 = cr * T1

    M1 = np.zeros((L, num_heads * R1), np.float32)
    B1 = np.zeros((1, num_heads * R1), np.float32)
    M2 = np.zeros((num_heads * R1, num_heads * c), np.float32)
    B2 = np.zeros((1, num_heads * c), np.float32)
    for hh in range(num_heads):
        w1 = np.asarray(0.2 * jax.random.normal(keys[next(ki)], (cr, K), jnp.float32))
        b1 = np.asarray(0.05 * jax.random.normal(keys[next(ki)], (cr,), jnp.float32))
        w2 = np.asarray(0.2 * jax.random.normal(keys[next(ki)], (c, cr, K), jnp.float32))
        b2 = np.asarray(0.05 * jax.random.normal(keys[next(ki)], (c,), jnp.float32))
        for o in range(cr):
            for t in range(T1):
                M1[t:t + K, hh * R1 + o * T1 + t] = w1[o]
        B1[0, hh * R1:(hh + 1) * R1] = np.repeat(b1, T1)
        for o in range(c):
            for i in range(cr):
                for tp in range(T2):               # AvgPool1d(1) folded via /T2
                    M2[hh * R1 + i * T1 + tp: hh * R1 + i * T1 + tp + K,
                       hh * c + o] += w2[o, i, :] / T2
        B2[0, hh * c:(hh + 1) * c] = b2

    head_params = [jnp.asarray(M1, jnp.bfloat16), jnp.asarray(B1),
                   jnp.asarray(M2, jnp.bfloat16), jnp.asarray(B2)]

    temp = jnp.full((1,), 0.1, jnp.float32)
    thr = jnp.full((1,), 0.5, jnp.float32)
    return conv_params, head_params, temp, thr


# ----------------------------------------------------------------------------
# structural constants (built host-side with numpy, general H, W)
# ----------------------------------------------------------------------------
def _xmasks(h, w):
    n = h * w
    xs = np.arange(n) % w
    ml = (xs != 0).astype(np.float32).reshape(n, 1)
    mr = (xs != w - 1).astype(np.float32).reshape(n, 1)
    return jnp.asarray(np.stack([ml, mr], axis=0))             # (2, n, 1)


def _pool_selectors(h, w):
    n = h * w
    ho, wo = h // 2, w // 2
    se = np.zeros((ho * wo, n - w), np.float32)
    so = np.zeros((ho * wo, n - w), np.float32)
    for yo in range(ho):
        for xo in range(wo):
            m = yo * wo + xo
            src = 2 * yo * w + 2 * xo
            se[m, src] = 1.0
            so[m, src + 1] = 1.0
    return jnp.asarray(np.stack([se, so], axis=0))              # (2, n//4, n - w)


# ----------------------------------------------------------------------------
# wrapper
# ----------------------------------------------------------------------------
def band_attention_forward(x_nchw, conv_params, head_params, temp, thr, num_heads=4):
    b, c, H, W = x_nchw.shape
    assert H % 4 == 0 and W % 4 == 0 and H >= 4 and W >= 4, \
        "two 2x2 max-pools need H,W divisible by 4"
    HW = H * W

    # free reshape, no transpose pass: kernel consumes/produces NCHW-flat.
    x = x_nchw.reshape(b, c, HW).astype(jnp.float32)

    xm = [_xmasks(H, W), _xmasks(H // 2, W // 2), _xmasks(H // 4, W // 4)]
    sel = [_pool_selectors(H, W), _pool_selectors(H // 2, W // 2)]
    havg_np = np.zeros((c, num_heads * c), np.float32)
    for hh in range(num_heads):
        for ch in range(c):
            havg_np[ch, hh * c + ch] = 1.0 / num_heads
    havg = jnp.asarray(havg_np)

    vmem_inputs = list(conv_params) + xm + sel + list(head_params) + [havg]
    smem_inputs = [temp, thr]

    in_specs = [pl.BlockSpec((None, c, HW), lambda i: (i, 0, 0))]
    for wgt in vmem_inputs:
        in_specs.append(pl.BlockSpec(wgt.shape, lambda i, n=wgt.ndim: (0,) * n))
    in_specs += [pl.BlockSpec(memory_space=pltpu.MemorySpace.SMEM)] * len(smem_inputs)
    out_spec = pl.BlockSpec((None, c, HW), lambda i: (i, 0, 0))

    layer_cin = [c, 128, 96, 64, 48]
    layer_n = [HW, HW // 4, HW // 4, HW // 16, HW // 16]
    layer_w = [W, W // 2, W // 2, W // 4, W // 4]
    scratch_shapes = [
        pltpu.VMEM((2 * _pad_lead(wl) + nl, cl), jnp.float32)
        for cl, nl, wl in zip(layer_cin, layer_n, layer_w)
    ]

    out = pl.pallas_call(
        _make_kernel(H, W),
        out_shape=jax.ShapeDtypeStruct((b, c, HW), jnp.float32),
        grid_spec=pltpu.PrefetchScalarGridSpec(
            num_scalar_prefetch=0,
            grid=(b,),
            in_specs=in_specs,
            out_specs=out_spec,
            scratch_shapes=scratch_shapes),
        compiler_params=pltpu.CompilerParams(
            dimension_semantics=("parallel",),          # uses both v7x TensorCores
            vmem_limit_bytes=32 * 1024 * 1024),
    )(x, *vmem_inputs, *smem_inputs)

    return out.reshape(b, c, H, W)


# ----------------------------------------------------------------------------
# main
# ----------------------------------------------------------------------------
if __name__ == "__main__":
    key = jax.random.PRNGKey(0)
    kx, kp = jax.random.split(key)

    b, c, H, W = 2, 4, 16, 16                                   # small NCHW example
    x = jax.random.normal(kx, (b, c, H, W), jnp.float32)

    conv_params, head_params, temp, thr = init_params(kp, c, num_heads=4, r=2)

    out = band_attention_forward(x, conv_params, head_params, temp, thr, num_heads=4)
    out = jax.block_until_ready(out)

    assert out.shape == (b, c, H, W)
    assert bool(jnp.all(jnp.isfinite(out)))
    print("KERNEL_OK")
</pallas_src>

<mosaic_0001>
module attributes {stable_mosaic.version = 11 : i64} {
  func.func @kernel(%arg0: i32, %arg1: memref<1x4x256xf32, #tpu.memory_space<vmem>>, %arg2: memref<9x4xf32, #tpu.memory_space<vmem>>, %arg3: memref<1x4xf32, #tpu.memory_space<vmem>>, %arg4: memref<4x128xbf16, #tpu.memory_space<vmem>>, %arg5: memref<1x128xf32, #tpu.memory_space<vmem>>, %arg6: memref<9x128xf32, #tpu.memory_space<vmem>>, %arg7: memref<1x128xf32, #tpu.memory_space<vmem>>, %arg8: memref<128x96xbf16, #tpu.memory_space<vmem>>, %arg9: memref<1x96xf32, #tpu.memory_space<vmem>>, %arg10: memref<9x96xf32, #tpu.memory_space<vmem>>, %arg11: memref<1x96xf32, #tpu.memory_space<vmem>>, %arg12: memref<96x64xbf16, #tpu.memory_space<vmem>>, %arg13: memref<1x64xf32, #tpu.memory_space<vmem>>, %arg14: memref<9x64xf32, #tpu.memory_space<vmem>>, %arg15: memref<1x64xf32, #tpu.memory_space<vmem>>, %arg16: memref<64x48xbf16, #tpu.memory_space<vmem>>, %arg17: memref<1x48xf32, #tpu.memory_space<vmem>>, %arg18: memref<9x48xf32, #tpu.memory_space<vmem>>, %arg19: memref<1x48xf32, #tpu.memory_space<vmem>>, %arg20: memref<48x64xbf16, #tpu.memory_space<vmem>>, %arg21: memref<1x64xf32, #tpu.memory_space<vmem>>, %arg22: memref<2x256x1xf32, #tpu.memory_space<vmem>>, %arg23: memref<2x64x1xf32, #tpu.memory_space<vmem>>, %arg24: memref<2x16x1xf32, #tpu.memory_space<vmem>>, %arg25: memref<2x64x240xf32, #tpu.memory_space<vmem>>, %arg26: memref<2x16x56xf32, #tpu.memory_space<vmem>>, %arg27: memref<64x264xbf16, #tpu.memory_space<vmem>>, %arg28: memref<1x264xf32, #tpu.memory_space<vmem>>, %arg29: memref<264x16xbf16, #tpu.memory_space<vmem>>, %arg30: memref<1x16xf32, #tpu.memory_space<vmem>>, %arg31: memref<4x16xf32, #tpu.memory_space<vmem>>, %arg32: memref<1xf32, #tpu.memory_space<smem>>, %arg33: memref<1xf32, #tpu.memory_space<smem>>, %arg34: memref<1x4x256xf32, #tpu.memory_space<vmem>>, %arg35: memref<304x4xf32, #tpu.memory_space<vmem>>, %arg36: memref<96x128xf32, #tpu.memory_space<vmem>>, %arg37: memref<96x96xf32, #tpu.memory_space<vmem>>, %arg38: memref<32x64xf32, #tpu.memory_space<vmem>>, %arg39: memref<32x48xf32, #tpu.memory_space<vmem>>) attributes {dimension_semantics = [#tpu.dimension_semantics<parallel>], iteration_bounds = array<i64: 2>, scalar_prefetch = 0 : i64, scratch_operands = 5 : i64, tpu.core_type = #tpu.core_type<tc>, window_params = [{transform_indices = @transform_0, window_bounds = array<i64: 1, 4, 256>}, {pipeline_mode = #tpu.pipeline_mode<synchronous>, transform_indices = @transform_1, window_bounds = array<i64: 9, 4>}, {pipeline_mode = #tpu.pipeline_mode<synchronous>, transform_indices = @transform_2, window_bounds = array<i64: 1, 4>}, {pipeline_mode = #tpu.pipeline_mode<synchronous>, transform_indices = @transform_3, window_bounds = array<i64: 4, 128>}, {pipeline_mode = #tpu.pipeline_mode<synchronous>, transform_indices = @transform_4, window_bounds = array<i64: 1, 128>}, {pipeline_mode = #tpu.pipeline_mode<synchronous>, transform_indices = @transform_5, window_bounds = array<i64: 9, 128>}, {pipeline_mode = #tpu.pipeline_mode<synchronous>, transform_indices = @transform_6, window_bounds = array<i64: 1, 128>}, {pipeline_mode = #tpu.pipeline_mode<synchronous>, transform_indices = @transform_7, window_bounds = array<i64: 128, 96>}, {pipeline_mode = #tpu.pipeline_mode<synchronous>, transform_indices = @transform_8, window_bounds = array<i64: 1, 96>}, {pipeline_mode = #tpu.pipeline_mode<synchronous>, transform_indices = @transform_9, window_bounds = array<i64: 9, 96>}, {pipeline_mode = #tpu.pipeline_mode<synchronous>, transform_indices = @transform_10, window_bounds = array<i64: 1, 96>}, {pipeline_mode = #tpu.pipeline_mode<synchronous>, transform_indices = @transform_11, window_bounds = array<i64: 96, 64>}, {pipeline_mode = #tpu.pipeline_mode<synchronous>, transform_indices = @transform_12, window_bounds = array<i64: 1, 64>}, {pipeline_mode = #tpu.pipeline_mode<synchronous>, transform_indices = @transform_13, window_bounds = array<i64: 9, 64>}, {pipeline_mode = #tpu.pipeline_mode<synchronous>, transform_indices = @transform_14, window_bounds = array<i64: 1, 64>}, {pipeline_mode = #tpu.pipeline_mode<synchronous>, transform_indices = @transform_15, window_bounds = array<i64: 64, 48>}, {pipeline_mode = #tpu.pipeline_mode<synchronous>, transform_indices = @transform_16, window_bounds = array<i64: 1, 48>}, {pipeline_mode = #tpu.pipeline_mode<synchronous>, transform_indices = @transform_17, window_bounds = array<i64: 9, 48>}, {pipeline_mode = #tpu.pipeline_mode<synchronous>, transform_indices = @transform_18, window_bounds = array<i64: 1, 48>}, {pipeline_mode = #tpu.pipeline_mode<synchronous>, transform_indices = @transform_19, window_bounds = array<i64: 48, 64>}, {pipeline_mode = #tpu.pipeline_mode<synchronous>, transform_indices = @transform_20, window_bounds = array<i64: 1, 64>}, {pipeline_mode = #tpu.pipeline_mode<synchronous>, transform_indices = @transform_21, window_bounds = array<i64: 2, 256, 1>}, {pipeline_mode = #tpu.pipeline_mode<synchronous>, transform_indices = @transform_22, window_bounds = array<i64: 2, 64, 1>}, {pipeline_mode = #tpu.pipeline_mode<synchronous>, transform_indices = @transform_23, window_bounds = array<i64: 2, 16, 1>}, {pipeline_mode = #tpu.pipeline_mode<synchronous>, transform_indices = @transform_24, window_bounds = array<i64: 2, 64, 240>}, {pipeline_mode = #tpu.pipeline_mode<synchronous>, transform_indices = @transform_25, window_bounds = array<i64: 2, 16, 56>}, {pipeline_mode = #tpu.pipeline_mode<synchronous>, transform_indices = @transform_26, window_bounds = array<i64: 64, 264>}, {pipeline_mode = #tpu.pipeline_mode<synchronous>, transform_indices = @transform_27, window_bounds = array<i64: 1, 264>}, {pipeline_mode = #tpu.pipeline_mode<synchronous>, transform_indices = @transform_28, window_bounds = array<i64: 264, 16>}, {pipeline_mode = #tpu.pipeline_mode<synchronous>, transform_indices = @transform_29, window_bounds = array<i64: 1, 16>}, {pipeline_mode = #tpu.pipeline_mode<synchronous>, transform_indices = @transform_30, window_bounds = array<i64: 4, 16>}, {transform_indices = @transform_31, window_bounds = array<i64: 1>}, {transform_indices = @transform_32, window_bounds = array<i64: 1>}, {transform_indices = @transform_33, window_bounds = array<i64: 1, 4, 256>}]} {
    %c0 = arith.constant 0 : index
    %c0_0 = arith.constant 0 : index
    %c0_1 = arith.constant 0 : index
    %0 = vector.load %arg1[%c0, %c0_0, %c0_1] : memref<1x4x256xf32, #tpu.memory_space<vmem>>, vector<1x4x256xf32>
    %1 = vector.shape_cast %0 : vector<1x4x256xf32> to vector<4x256xf32>
    %2 = tpu.iota {dimensions = array<i32: 0>} : vector<256x256xi32>
    %3 = tpu.iota {dimensions = array<i32: 1>} : vector<256x256xi32>
    %4 = arith.cmpi eq, %2, %3 : vector<256x256xi32>
    %5 = arith.extui %4 : vector<256x256xi1> to vector<256x256xi32>
    %6 = arith.sitofp %5 : vector<256x256xi32> to vector<256x256xf32>
    %cst = arith.constant dense<0.000000e+00> : vector<256x4xf32>
    %7 = tpu.matmul %6, %1, %cst {dimension_numbers = #tpu.dot_dimension_numbers<[1], [1], [0], [0], [0, 0, 1, 0], [], []>} : vector<256x256xf32>, vector<4x256xf32>, vector<256x4xf32> -> vector<256x4xf32>
    %cst_2 = arith.constant 0.000000e+00 : f32
    %8 = vector.broadcast %cst_2 : f32 to vector<24x4xf32>
    %c0_3 = arith.constant 0 : index
    %c0_4 = arith.constant 0 : index
    %9 = vector.load %arg35[%c0_3, %c0_4] : memref<304x4xf32, #tpu.memory_space<vmem>>, vector<24x4xf32>
    tpu.vector_store %arg35[%c0_3, %c0_4], %8 {strides = array<i32>} : memref<304x4xf32, #tpu.memory_space<vmem>>, vector<24x4xf32>,
    %c280 = arith.constant 280 : index
    %c0_5 = arith.constant 0 : index
    %10 = vector.load %arg35[%c280, %c0_5] : memref<304x4xf32, #tpu.memory_space<vmem>>, vector<24x4xf32>
    tpu.vector_store %arg35[%c280, %c0_5], %8 {strides = array<i32>} : memref<304x4xf32, #tpu.memory_space<vmem>>, vector<24x4xf32>,
    %c24 = arith.constant 24 : index
    %c0_6 = arith.constant 0 : index
    %11 = vector.load %arg35[%c24, %c0_6] : memref<304x4xf32, #tpu.memory_space<vmem>>, vector<256x4xf32>
    tpu.vector_store %arg35[%c24, %c0_6], %7 {strides = array<i32>} : memref<304x4xf32, #tpu.memory_space<vmem>>, vector<256x4xf32>,
    %c0_7 = arith.constant 0 : index
    %c0_8 = arith.constant 0 : index
    %12 = vector.load %arg2[%c0_7, %c0_8] : memref<9x4xf32, #tpu.memory_space<vmem>>, vector<9x4xf32>
    %c0_9 = arith.constant 0 : index
    %c0_10 = arith.constant 0 : index
    %c0_11 = arith.constant 0 : index
    %13 = vector.load %arg22[%c0_9, %c0_10, %c0_11] : memref<2x256x1xf32, #tpu.memory_space<vmem>>, vector<1x256x1xf32>
    %14 = vector.shape_cast %13 : vector<1x256x1xf32> to vector<256x1xf32>
    %c1 = arith.constant 1 : index
    %c0_12 = arith.constant 0 : index
    %c0_13 = arith.constant 0 : index
    %15 = vector.load %arg22[%c1, %c0_12, %c0_13] : memref<2x256x1xf32, #tpu.memory_space<vmem>>, vector<1x256x1xf32>
    %16 = vector.shape_cast %15 : vector<1x256x1xf32> to vector<256x1xf32>
    %cst_14 = arith.constant 0.000000e+00 : f32
    %17 = vector.broadcast %cst_14 : f32 to vector<256x4xf32>
    %c7 = arith.constant 7 : index
    %c0_15 = arith.constant 0 : index
    %18 = vector.load %arg35[%c7, %c0_15] : memref<304x4xf32, #tpu.memory_space<vmem>>, vector<256x4xf32>
    %19 = vector.broadcast %14 : vector<256x1xf32> to vector<256x4xf32>
    %20 = arith.mulf %18, %19 : vector<256x4xf32>
    %21 = vector.extract_strided_slice %12 {offsets = [0, 0], sizes = [1, 4], strides = [1, 1]} : vector<9x4xf32> to vector<1x4xf32>
    %22 = vector.shape_cast %21 : vector<1x4xf32> to vector<4xf32>
    %23 = vector.shape_cast %22 : vector<4xf32> to vector<1x4xf32>
    %24 = vector.broadcast %23 : vector<1x4xf32> to vector<256x4xf32>
    %25 = arith.mulf %20, %24 : vector<256x4xf32>
    %26 = arith.addf %17, %25 : vector<256x4xf32>
    %c8 = arith.constant 8 : index
    %c0_16 = arith.constant 0 : index
    %27 = vector.load %arg35[%c8, %c0_16] : memref<304x4xf32, #tpu.memory_space<vmem>>, vector<256x4xf32>
    %28 = vector.extract_strided_slice %12 {offsets = [1, 0], sizes = [1, 4], strides = [1, 1]} : vector<9x4xf32> to vector<1x4xf32>
    %29 = vector.shape_cast %28 : vector<1x4xf32> to vector<4xf32>
    %30 = vector.shape_cast %29 : vector<4xf32> to vector<1x4xf32>
    %31 = vector.broadcast %30 : vector<1x4xf32> to vector<256x4xf32>
    %32 = arith.mulf %27, %31 : vector<256x4xf32>
    %33 = arith.addf %26, %32 : vector<256x4xf32>
    %c9 = arith.constant 9 : index
    %c0_17 = arith.constant 0 : index
    %34 = vector.load %arg35[%c9, %c0_17] : memref<304x4xf32, #tpu.memory_space<vmem>>, vector<256x4xf32>
    %35 = vector.broadcast %16 : vector<256x1xf32> to vector<256x4xf32>
    %36 = arith.mulf %34, %35 : vector<256x4xf32>
    %37 = vector.extract_strided_slice %12 {offsets = [2, 0], sizes = [1, 4], strides = [1, 1]} : vector<9x4xf32> to vector<1x4xf32>
    %38 = vector.shape_cast %37 : vector<1x4xf32> to vector<4xf32>
    %39 = vector.shape_cast %38 : vector<4xf32> to vector<1x4xf32>
    %40 = vector.broadcast %39 : vector<1x4xf32> to vector<256x4xf32>
    %41 = arith.mulf %36, %40 : vector<256x4xf32>
    %42 = arith.addf %33, %41 : vector<256x4xf32>
    %c23 = arith.constant 23 : index
    %c0_18 = arith.constant 0 : index
    %43 = vector.load %arg35[%c23, %c0_18] : memref<304x4xf32, #tpu.memory_space<vmem>>, vector<256x4xf32>
    %44 = vector.broadcast %14 : vector<256x1xf32> to vector<256x4xf32>
    %45 = arith.mulf %43, %44 : vector<256x4xf32>
    %46 = vector.extract_strided_slice %12 {offsets = [3, 0], sizes = [1, 4], strides = [1, 1]} : vector<9x4xf32> to vector<1x4xf32>
    %47 = vector.shape_cast %46 : vector<1x4xf32> to vector<4xf32>
    %48 = vector.shape_cast %47 : vector<4xf32> to vector<1x4xf32>
    %49 = vector.broadcast %48 : vector<1x4xf32> to vector<256x4xf32>
    %50 = arith.mulf %45, %49 : vector<256x4xf32>
    %51 = arith.addf %42, %50 : vector<256x4xf32>
    %c24_19 = arith.constant 24 : index
    %c0_20 = arith.constant 0 : index
    %52 = vector.load %arg35[%c24_19, %c0_20] : memref<304x4xf32, #tpu.memory_space<vmem>>, vector<256x4xf32>
    %53 = vector.extract_strided_slice %12 {offsets = [4, 0], sizes = [1, 4], strides = [1, 1]} : vector<9x4xf32> to vector<1x4xf32>
    %54 = vector.shape_cast %53 : vector<1x4xf32> to vector<4xf32>
    %55 = vector.shape_cast %54 : vector<4xf32> to vector<1x4xf32>
    %56 = vector.broadcast %55 : vector<1x4xf32> to vector<256x4xf32>
    %57 = arith.mulf %52, %56 : vector<256x4xf32>
    %58 = arith.addf %51, %57 : vector<256x4xf32>
    %c25 = arith.constant 25 : index
    %c0_21 = arith.constant 0 : index
    %59 = vector.load %arg35[%c25, %c0_21] : memref<304x4xf32, #tpu.memory_space<vmem>>, vector<256x4xf32>
    %60 = vector.broadcast %16 : vector<256x1xf32> to vector<256x4xf32>
    %61 = arith.mulf %59, %60 : vector<256x4xf32>
    %62 = vector.extract_strided_slice %12 {offsets = [5, 0], sizes = [1, 4], strides = [1, 1]} : vector<9x4xf32> to vector<1x4xf32>
    %63 = vector.shape_cast %62 : vector<1x4xf32> to vector<4xf32>
    %64 = vector.shape_cast %63 : vector<4xf32> to vector<1x4xf32>
    %65 = vector.broadcast %64 : vector<1x4xf32> to vector<256x4xf32>
    %66 = arith.mulf %61, %65 : vector<256x4xf32>
    %67 = arith.addf %58, %66 : vector<256x4xf32>
    %c39 = arith.constant 39 : index
    %c0_22 = arith.constant 0 : index
    %68 = vector.load %arg35[%c39, %c0_22] : memref<304x4xf32, #tpu.memory_space<vmem>>, vector<256x4xf32>
    %69 = vector.broadcast %14 : vector<256x1xf32> to vector<256x4xf32>
    %70 = arith.mulf %68, %69 : vector<256x4xf32>
    %71 = vector.extract_strided_slice %12 {offsets = [6, 0], sizes = [1, 4], strides = [1, 1]} : vector<9x4xf32> to vector<1x4xf32>
    %72 = vector.shape_cast %71 : vector<1x4xf32> to vector<4xf32>
    %73 = vector.shape_cast %72 : vector<4xf32> to vector<1x4xf32>
    %74 = vector.broadcast %73 : vector<1x4xf32> to vector<256x4xf32>
    %75 = arith.mulf %70, %74 : vector<256x4xf32>
    %76 = arith.addf %67, %75 : vector<256x4xf32>
    %c40 = arith.constant 40 : index
    %c0_23 = arith.constant 0 : index
    %77 = vector.load %arg35[%c40, %c0_23] : memref<304x4xf32, #tpu.memory_space<vmem>>, vector<256x4xf32>
    %78 = vector.extract_strided_slice %12 {offsets = [7, 0], sizes = [1, 4], strides = [1, 1]} : vector<9x4xf32> to vector<1x4xf32>
    %79 = vector.shape_cast %78 : vector<1x4xf32> to vector<4xf32>
    %80 = vector.shape_cast %79 : vector<4xf32> to vector<1x4xf32>
    %81 = vector.broadcast %80 : vector<1x4xf32> to vector<256x4xf32>
    %82 = arith.mulf %77, %81 : vector<256x4xf32>
    %83 = arith.addf %76, %82 : vector<256x4xf32>
    %c41 = arith.constant 41 : index
    %c0_24 = arith.constant 0 : index
    %84 = vector.load %arg35[%c41, %c0_24] : memref<304x4xf32, #tpu.memory_space<vmem>>, vector<256x4xf32>
    %85 = vector.broadcast %16 : vector<256x1xf32> to vector<256x4xf32>
    %86 = arith.mulf %84, %85 : vector<256x4xf32>
    %87 = vector.extract_strided_slice %12 {offsets = [8, 0], sizes = [1, 4], strides = [1, 1]} : vector<9x4xf32> to vector<1x4xf32>
    %88 = vector.shape_cast %87 : vector<1x4xf32> to vector<4xf32>
    %89 = vector.shape_cast %88 : vector<4xf32> to vector<1x4xf32>
    %90 = vector.broadcast %89 : vector<1x4xf32> to vector<256x4xf32>
    %91 = arith.mulf %86, %90 : vector<256x4xf32>
    %92 = arith.addf %83, %91 : vector<256x4xf32>
    %c0_25 = arith.constant 0 : index
    %c0_26 = arith.constant 0 : index
    %93 = vector.load %arg3[%c0_25, %c0_26] : memref<1x4xf32, #tpu.memory_space<vmem>>, vector<1x4xf32>
    %94 = vector.broadcast %93 : vector<1x4xf32> to vector<256x4xf32>
    %95 = arith.addf %92, %94 : vector<256x4xf32>
    %96 = arith.truncf %95 : vector<256x4xf32> to vector<256x4xbf16>
    %c0_27 = arith.constant 0 : index
    %c0_28 = arith.constant 0 : index
    %97 = vector.load %arg4[%c0_27, %c0_28] : memref<4x128xbf16, #tpu.memory_space<vmem>>, vector<4x128xbf16>
    %cst_29 = arith.constant dense<0.000000e+00> : vector<256x128xf32>
    %98 = tpu.matmul %96, %97, %cst_29 {dimension_numbers = #tpu.dot_dimension_numbers<[1], [0], [0], [1], [0, 0, 1, 1], [], []>} : vector<256x4xbf16>, vector<4x128xbf16>, vector<256x128xf32> -> vector<256x128xf32>
    %c0_30 = arith.constant 0 : index
    %c0_31 = arith.constant 0 : index
    %99 = vector.load %arg5[%c0_30, %c0_31] : memref<1x128xf32, #tpu.memory_space<vmem>>, vector<1x128xf32>
    %100 = vector.broadcast %99 : vector<1x128xf32> to vector<256x128xf32>
    %101 = arith.addf %98, %100 : vector<256x128xf32>
    %cst_32 = arith.constant 0.000000e+00 : f32
    %102 = vector.broadcast %cst_32 : f32 to vector<256x128xf32>
    %103 = arith.maximumf %101, %102 : vector<256x128xf32>
    %104 = vector.extract_strided_slice %103 {offsets = [0, 0], sizes = [240, 128], strides = [1, 1]} : vector<256x128xf32> to vector<240x128xf32>
    %105 = vector.extract_strided_slice %103 {offsets = [16, 0], sizes = [240, 128], strides = [1, 1]} : vector<256x128xf32> to vector<240x128xf32>
    %106 = arith.maximumf %104, %105 : vector<240x128xf32>
    %c0_33 = arith.constant 0 : index
    %c0_34 = arith.constant 0 : index
    %c0_35 = arith.constant 0 : index
    %107 = vector.load %arg25[%c0_33, %c0_34, %c0_35] : memref<2x64x240xf32, #tpu.memory_space<vmem>>, vector<1x64x240xf32>
    %108 = vector.shape_cast %107 : vector<1x64x240xf32> to vector<64x240xf32>
    %cst_36 = arith.constant dense<0.000000e+00> : vector<64x128xf32>
    %109 = tpu.matmul %108, %106, %cst_36 {dimension_numbers = #tpu.dot_dimension_numbers<[1], [0], [0], [1], [0, 0, 1, 1], [], []>} : vector<64x240xf32>, vector<240x128xf32>, vector<64x128xf32> -> vector<64x128xf32>
    %c1_37 = arith.constant 1 : index
    %c0_38 = arith.constant 0 : index
    %c0_39 = arith.constant 0 : index
    %110 = vector.load %arg25[%c1_37, %c0_38, %c0_39] : memref<2x64x240xf32, #tpu.memory_space<vmem>>, vector<1x64x240xf32>
    %111 = vector.shape_cast %110 : vector<1x64x240xf32> to vector<64x240xf32>
    %cst_40 = arith.constant dense<0.000000e+00> : vector<64x128xf32>
    %112 = tpu.matmul %111, %106, %cst_40 {dimension_numbers = #tpu.dot_dimension_numbers<[1], [0], [0], [1], [0, 0, 1, 1], [], []>} : vector<64x240xf32>, vector<240x128xf32>, vector<64x128xf32> -> vector<64x128xf32>
    %113 = arith.maximumf %109, %112 : vector<64x128xf32>
    %cst_41 = arith.constant 0.000000e+00 : f32
    %114 = vector.broadcast %cst_41 : f32 to vector<16x128xf32>
    %c0_42 = arith.constant 0 : index
    %c0_43 = arith.constant 0 : index
    %115 = vector.load %arg36[%c0_42, %c0_43] : memref<96x128xf32, #tpu.memory_space<vmem>>, vector<16x128xf32>
    tpu.vector_store %arg36[%c0_42, %c0_43], %114 {strides = array<i32>} : memref<96x128xf32, #tpu.memory_space<vmem>>, vector<16x128xf32>,
    %c80 = arith.constant 80 : index
    %c0_44 = arith.constant 0 : index
    %116 = vector.load %arg36[%c80, %c0_44] : memref<96x128xf32, #tpu.memory_space<vmem>>, vector<16x128xf32>
    tpu.vector_store %arg36[%c80, %c0_44], %114 {strides = array<i32>} : memref<96x128xf32, #tpu.memory_space<vmem>>, vector<16x128xf32>,
    %c16 = arith.constant 16 : index
    %c0_45 = arith.constant 0 : index
    %117 = vector.load %arg36[%c16, %c0_45] : memref<96x128xf32, #tpu.memory_space<vmem>>, vector<64x128xf32>
    tpu.vector_store %arg36[%c16, %c0_45], %113 {strides = array<i32>} : memref<96x128xf32, #tpu.memory_space<vmem>>, vector<64x128xf32>,
    %c0_46 = arith.constant 0 : index
    %c0_47 = arith.constant 0 : index
    %118 = vector.load %arg6[%c0_46, %c0_47] : memref<9x128xf32, #tpu.memory_space<vmem>>, vector<9x128xf32>
    %c0_48 = arith.constant 0 : index
    %c0_49 = arith.constant 0 : index
    %c0_50 = arith.constant 0 : index
    %119 = vector.load %arg23[%c0_48, %c0_49, %c0_50] : memref<2x64x1xf32, #tpu.memory_space<vmem>>, vector<1x64x1xf32>
    %120 = vector.shape_cast %119 : vector<1x64x1xf32> to vector<64x1xf32>
    %c1_51 = arith.constant 1 : index
    %c0_52 = arith.constant 0 : index
    %c0_53 = arith.constant 0 : index
    %121 = vector.load %arg23[%c1_51, %c0_52, %c0_53] : memref<2x64x1xf32, #tpu.memory_space<vmem>>, vector<1x64x1xf32>
    %122 = vector.shape_cast %121 : vector<1x64x1xf32> to vector<64x1xf32>
    %cst_54 = arith.constant 0.000000e+00 : f32
    %123 = vector.broadcast %cst_54 : f32 to vector<64x128xf32>
    %c7_55 = arith.constant 7 : index
    %c0_56 = arith.constant 0 : index
    %124 = vector.load %arg36[%c7_55, %c0_56] : memref<96x128xf32, #tpu.memory_space<vmem>>, vector<64x128xf32>
    %125 = vector.broadcast %120 : vector<64x1xf32> to vector<64x128xf32>
    %126 = arith.mulf %124, %125 : vector<64x128xf32>
    %127 = vector.extract_strided_slice %118 {offsets = [0, 0], sizes = [1, 128], strides = [1, 1]} : vector<9x128xf32> to vector<1x128xf32>
    %128 = vector.shape_cast %127 : vector<1x128xf32> to vector<128xf32>
    %129 = vector.shape_cast %128 : vector<128xf32> to vector<1x128xf32>
    %130 = vector.broadcast %129 : vector<1x128xf32> to vector<64x128xf32>
    %131 = arith.mulf %126, %130 : vector<64x128xf32>
    %132 = arith.addf %123, %131 : vector<64x128xf32>
    %c8_57 = arith.constant 8 : index
    %c0_58 = arith.constant 0 : index
    %133 = vector.load %arg36[%c8_57, %c0_58] : memref<96x128xf32, #tpu.memory_space<vmem>>, vector<64x128xf32>
    %134 = vector.extract_strided_slice %118 {offsets = [1, 0], sizes = [1, 128], strides = [1, 1]} : vector<9x128xf32> to vector<1x128xf32>
    %135 = vector.shape_cast %134 : vector<1x128xf32> to vector<128xf32>
    %136 = vector.shape_cast %135 : vector<128xf32> to vector<1x128xf32>
    %137 = vector.broadcast %136 : vector<1x128xf32> to vector<64x128xf32>
    %138 = arith.mulf %133, %137 : vector<64x128xf32>
    %139 = arith.addf %132, %138 : vector<64x128xf32>
    %c9_59 = arith.constant 9 : index
    %c0_60 = arith.constant 0 : index
    %140 = vector.load %arg36[%c9_59, %c0_60] : memref<96x128xf32, #tpu.memory_space<vmem>>, vector<64x128xf32>
    %141 = vector.broadcast %122 : vector<64x1xf32> to vector<64x128xf32>
    %142 = arith.mulf %140, %141 : vector<64x128xf32>
    %143 = vector.extract_strided_slice %118 {offsets = [2, 0], sizes = [1, 128], strides = [1, 1]} : vector<9x128xf32> to vector<1x128xf32>
    %144 = vector.shape_cast %143 : vector<1x128xf32> to vector<128xf32>
    %145 = vector.shape_cast %144 : vector<128xf32> to vector<1x128xf32>
    %146 = vector.broadcast %145 : vector<1x128xf32> to vector<64x128xf32>
    %147 = arith.mulf %142, %146 : vector<64x128xf32>
    %148 = arith.addf %139, %147 : vector<64x128xf32>
    %c15 = arith.constant 15 : index
    %c0_61 = arith.constant 0 : index
    %149 = vector.load %arg36[%c15, %c0_61] : memref<96x128xf32, #tpu.memory_space<vmem>>, vector<64x128xf32>
    %150 = vector.broadcast %120 : vector<64x1xf32> to vector<64x128xf32>
    %151 = arith.mulf %149, %150 : vector<64x128xf32>
    %152 = vector.extract_strided_slice %118 {offsets = [3, 0], sizes = [1, 128], strides = [1, 1]} : vector<9x128xf32> to vector<1x128xf32>
    %153 = vector.shape_cast %152 : vector<1x128xf32> to vector<128xf32>
    %154 = vector.shape_cast %153 : vector<128xf32> to vector<1x128xf32>
    %155 = vector.broadcast %154 : vector<1x128xf32> to vector<64x128xf32>
    %156 = arith.mulf %151, %155 : vector<64x128xf32>
    %157 = arith.addf %148, %156 : vector<64x128xf32>
    %c16_62 = arith.constant 16 : index
    %c0_63 = arith.constant 0 : index
    %158 = vector.load %arg36[%c16_62, %c0_63] : memref<96x128xf32, #tpu.memory_space<vmem>>, vector<64x128xf32>
    %159 = vector.extract_strided_slice %118 {offsets = [4, 0], sizes = [1, 128], strides = [1, 1]} : vector<9x128xf32> to vector<1x128xf32>
    %160 = vector.shape_cast %159 : vector<1x128xf32> to vector<128xf32>
    %161 = vector.shape_cast %160 : vector<128xf32> to vector<1x128xf32>
    %162 = vector.broadcast %161 : vector<1x128xf32> to vector<64x128xf32>
    %163 = arith.mulf %158, %162 : vector<64x128xf32>
    %164 = arith.addf %157, %163 : vector<64x128xf32>
    %c17 = arith.constant 17 : index
    %c0_64 = arith.constant 0 : index
    %165 = vector.load %arg36[%c17, %c0_64] : memref<96x128xf32, #tpu.memory_space<vmem>>, vector<64x128xf32>
    %166 = vector.broadcast %122 : vector<64x1xf32> to vector<64x128xf32>
    %167 = arith.mulf %165, %166 : vector<64x128xf32>
    %168 = vector.extract_strided_slice %118 {offsets = [5, 0], sizes = [1, 128], strides = [1, 1]} : vector<9x128xf32> to vector<1x128xf32>
    %169 = vector.shape_cast %168 : vector<1x128xf32> to vector<128xf32>
    %170 = vector.shape_cast %169 : vector<128xf32> to vector<1x128xf32>
    %171 = vector.broadcast %170 : vector<1x128xf32> to vector<64x128xf32>
    %172 = arith.mulf %167, %171 : vector<64x128xf32>
    %173 = arith.addf %164, %172 : vector<64x128xf32>
    %c23_65 = arith.constant 23 : index
    %c0_66 = arith.constant 0 : index
    %174 = vector.load %arg36[%c23_65, %c0_66] : memref<96x128xf32, #tpu.memory_space<vmem>>, vector<64x128xf32>
    %175 = vector.broadcast %120 : vector<64x1xf32> to vector<64x128xf32>
    %176 = arith.mulf %174, %175 : vector<64x128xf32>
    %177 = vector.extract_strided_slice %118 {offsets = [6, 0], sizes = [1, 128], strides = [1, 1]} : vector<9x128xf32> to vector<1x128xf32>
    %178 = vector.shape_cast %177 : vector<1x128xf32> to vector<128xf32>
    %179 = vector.shape_cast %178 : vector<128xf32> to vector<1x128xf32>
    %180 = vector.broadcast %179 : vector<1x128xf32> to vector<64x128xf32>
    %181 = arith.mulf %176, %180 : vector<64x128xf32>
    %182 = arith.addf %173, %181 : vector<64x128xf32>
    %c24_67 = arith.constant 24 : index
    %c0_68 = arith.constant 0 : index
    %183 = vector.load %arg36[%c24_67, %c0_68] : memref<96x128xf32, #tpu.memory_space<vmem>>, vector<64x128xf32>
    %184 = vector.extract_strided_slice %118 {offsets = [7, 0], sizes = [1, 128], strides = [1, 1]} : vector<9x128xf32> to vector<1x128xf32>
    %185 = vector.shape_cast %184 : vector<1x128xf32> to vector<128xf32>
    %186 = vector.shape_cast %185 : vector<128xf32> to vector<1x128xf32>
    %187 = vector.broadcast %186 : vector<1x128xf32> to vector<64x128xf32>
    %188 = arith.mulf %183, %187 : vector<64x128xf32>
    %189 = arith.addf %182, %188 : vector<64x128xf32>
    %c25_69 = arith.constant 25 : index
    %c0_70 = arith.constant 0 : index
    %190 = vector.load %arg36[%c25_69, %c0_70] : memref<96x128xf32, #tpu.memory_space<vmem>>, vector<64x128xf32>
    %191 = vector.broadcast %122 : vector<64x1xf32> to vector<64x128xf32>
    %192 = arith.mulf %190, %191 : vector<64x128xf32>
    %193 = vector.extract_strided_slice %118 {offsets = [8, 0], sizes = [1, 128], strides = [1, 1]} : vector<9x128xf32> to vector<1x128xf32>
    %194 = vector.shape_cast %193 : vector<1x128xf32> to vector<128xf32>
    %195 = vector.shape_cast %194 : vector<128xf32> to vector<1x128xf32>
    %196 = vector.broadcast %195 : vector<1x128xf32> to vector<64x128xf32>
    %197 = arith.mulf %192, %196 : vector<64x128xf32>
    %198 = arith.addf %189, %197 : vector<64x128xf32>
    %c0_71 = arith.constant 0 : index
    %c0_72 = arith.constant 0 : index
    %199 = vector.load %arg7[%c0_71, %c0_72] : memref<1x128xf32, #tpu.memory_space<vmem>>, vector<1x128xf32>
    %200 = vector.broadcast %199 : vector<1x128xf32> to vector<64x128xf32>
    %201 = arith.addf %198, %200 : vector<64x128xf32>
    %202 = arith.truncf %201 : vector<64x128xf32> to vector<64x128xbf16>
    %c0_73 = arith.constant 0 : index
    %c0_74 = arith.constant 0 : index
    %203 = vector.load %arg8[%c0_73, %c0_74] : memref<128x96xbf16, #tpu.memory_space<vmem>>, vector<128x96xbf16>
    %cst_75 = arith.constant dense<0.000000e+00> : vector<64x96xf32>
    %204 = tpu.matmul %202, %203, %cst_75 {dimension_numbers = #tpu.dot_dimension_numbers<[1], [0], [0], [1], [0, 0, 1, 1], [], []>} : vector<64x128xbf16>, vector<128x96xbf16>, vector<64x96xf32> -> vector<64x96xf32>
    %c0_76 = arith.constant 0 : index
    %c0_77 = arith.constant 0 : index
    %205 = vector.load %arg9[%c0_76, %c0_77] : memref<1x96xf32, #tpu.memory_space<vmem>>, vector<1x96xf32>
    %206 = vector.broadcast %205 : vector<1x96xf32> to vector<64x96xf32>
    %207 = arith.addf %204, %206 : vector<64x96xf32>
    %cst_78 = arith.constant 0.000000e+00 : f32
    %208 = vector.broadcast %cst_78 : f32 to vector<64x96xf32>
    %209 = arith.maximumf %207, %208 : vector<64x96xf32>
    %cst_79 = arith.constant 0.000000e+00 : f32
    %210 = vector.broadcast %cst_79 : f32 to vector<16x96xf32>
    %c0_80 = arith.constant 0 : index
    %c0_81 = arith.constant 0 : index
    %211 = vector.load %arg37[%c0_80, %c0_81] : memref<96x96xf32, #tpu.memory_space<vmem>>, vector<16x96xf32>
    tpu.vector_store %arg37[%c0_80, %c0_81], %210 {strides = array<i32>} : memref<96x96xf32, #tpu.memory_space<vmem>>, vector<16x96xf32>,
    %c80_82 = arith.constant 80 : index
    %c0_83 = arith.constant 0 : index
    %212 = vector.load %arg37[%c80_82, %c0_83] : memref<96x96xf32, #tpu.memory_space<vmem>>, vector<16x96xf32>
    tpu.vector_store %arg37[%c80_82, %c0_83], %210 {strides = array<i32>} : memref<96x96xf32, #tpu.memory_space<vmem>>, vector<16x96xf32>,
    %c16_84 = arith.constant 16 : index
    %c0_85 = arith.constant 0 : index
    %213 = vector.load %arg37[%c16_84, %c0_85] : memref<96x96xf32, #tpu.memory_space<vmem>>, vector<64x96xf32>
    tpu.vector_store %arg37[%c16_84, %c0_85], %209 {strides = array<i32>} : memref<96x96xf32, #tpu.memory_space<vmem>>, vector<64x96xf32>,
    %c0_86 = arith.constant 0 : index
    %c0_87 = arith.constant 0 : index
    %214 = vector.load %arg10[%c0_86, %c0_87] : memref<9x96xf32, #tpu.memory_space<vmem>>, vector<9x96xf32>
    %c0_88 = arith.constant 0 : index
    %c0_89 = arith.constant 0 : index
    %c0_90 = arith.constant 0 : index
    %215 = vector.load %arg23[%c0_88, %c0_89, %c0_90] : memref<2x64x1xf32, #tpu.memory_space<vmem>>, vector<1x64x1xf32>
    %216 = vector.shape_cast %215 : vector<1x64x1xf32> to vector<64x1xf32>
    %c1_91 = arith.constant 1 : index
    %c0_92 = arith.constant 0 : index
    %c0_93 = arith.constant 0 : index
    %217 = vector.load %arg23[%c1_91, %c0_92, %c0_93] : memref<2x64x1xf32, #tpu.memory_space<vmem>>, vector<1x64x1xf32>
    %218 = vector.shape_cast %217 : vector<1x64x1xf32> to vector<64x1xf32>
    %cst_94 = arith.constant 0.000000e+00 : f32
    %219 = vector.broadcast %cst_94 : f32 to vector<64x96xf32>
    %c7_95 = arith.constant 7 : index
    %c0_96 = arith.constant 0 : index
    %220 = vector.load %arg37[%c7_95, %c0_96] : memref<96x96xf32, #tpu.memory_space<vmem>>, vector<64x96xf32>
    %221 = vector.broadcast %216 : vector<64x1xf32> to vector<64x96xf32>
    %222 = arith.mulf %220, %221 : vector<64x96xf32>
    %223 = vector.extract_strided_slice %214 {offsets = [0, 0], sizes = [1, 96], strides = [1, 1]} : vector<9x96xf32> to vector<1x96xf32>
    %224 = vector.shape_cast %223 : vector<1x96xf32> to vector<96xf32>
    %225 = vector.shape_cast %224 : vector<96xf32> to vector<1x96xf32>
    %226 = vector.broadcast %225 : vector<1x96xf32> to vector<64x96xf32>
    %227 = arith.mulf %222, %226 : vector<64x96xf32>
    %228 = arith.addf %219, %227 : vector<64x96xf32>
    %c8_97 = arith.constant 8 : index
    %c0_98 = arith.constant 0 : index
    %229 = vector.load %arg37[%c8_97, %c0_98] : memref<96x96xf32, #tpu.memory_space<vmem>>, vector<64x96xf32>
    %230 = vector.extract_strided_slice %214 {offsets = [1, 0], sizes = [1, 96], strides = [1, 1]} : vector<9x96xf32> to vector<1x96xf32>
    %231 = vector.shape_cast %230 : vector<1x96xf32> to vector<96xf32>
    %232 = vector.shape_cast %231 : vector<96xf32> to vector<1x96xf32>
    %233 = vector.broadcast %232 : vector<1x96xf32> to vector<64x96xf32>
    %234 = arith.mulf %229, %233 : vector<64x96xf32>
    %235 = arith.addf %228, %234 : vector<64x96xf32>
    %c9_99 = arith.constant 9 : index
    %c0_100 = arith.constant 0 : index
    %236 = vector.load %arg37[%c9_99, %c0_100] : memref<96x96xf32, #tpu.memory_space<vmem>>, vector<64x96xf32>
    %237 = vector.broadcast %218 : vector<64x1xf32> to vector<64x96xf32>
    %238 = arith.mulf %236, %237 : vector<64x96xf32>
    %239 = vector.extract_strided_slice %214 {offsets = [2, 0], sizes = [1, 96], strides = [1, 1]} : vector<9x96xf32> to vector<1x96xf32>
    %240 = vector.shape_cast %239 : vector<1x96xf32> to vector<96xf32>
    %241 = vector.shape_cast %240 : vector<96xf32> to vector<1x96xf32>
    %242 = vector.broadcast %241 : vector<1x96xf32> to vector<64x96xf32>
    %243 = arith.mulf %238, %242 : vector<64x96xf32>
    %244 = arith.addf %235, %243 : vector<64x96xf32>
    %c15_101 = arith.constant 15 : index
    %c0_102 = arith.constant 0 : index
    %245 = vector.load %arg37[%c15_101, %c0_102] : memref<96x96xf32, #tpu.memory_space<vmem>>, vector<64x96xf32>
    %246 = vector.broadcast %216 : vector<64x1xf32> to vector<64x96xf32>
    %247 = arith.mulf %245, %246 : vector<64x96xf32>
    %248 = vector.extract_strided_slice %214 {offsets = [3, 0], sizes = [1, 96], strides = [1, 1]} : vector<9x96xf32> to vector<1x96xf32>
    %249 = vector.shape_cast %248 : vector<1x96xf32> to vector<96xf32>
    %250 = vector.shape_cast %249 : vector<96xf32> to vector<1x96xf32>
    %251 = vector.broadcast %250 : vector<1x96xf32> to vector<64x96xf32>
    %252 = arith.mulf %247, %251 : vector<64x96xf32>
    %253 = arith.addf %244, %252 : vector<64x96xf32>
    %c16_103 = arith.constant 16 : index
    %c0_104 = arith.constant 0 : index
    %254 = vector.load %arg37[%c16_103, %c0_104] : memref<96x96xf32, #tpu.memory_space<vmem>>, vector<64x96xf32>
    %255 = vector.extract_strided_slice %214 {offsets = [4, 0], sizes = [1, 96], strides = [1, 1]} : vector<9x96xf32> to vector<1x96xf32>
    %256 = vector.shape_cast %255 : vector<1x96xf32> to vector<96xf32>
    %257 = vector.shape_cast %256 : vector<96xf32> to vector<1x96xf32>
    %258 = vector.broadcast %257 : vector<1x96xf32> to vector<64x96xf32>
    %259 = arith.mulf %254, %258 : vector<64x96xf32>
    %260 = arith.addf %253, %259 : vector<64x96xf32>
    %c17_105 = arith.constant 17 : index
    %c0_106 = arith.constant 0 : index
    %261 = vector.load %arg37[%c17_105, %c0_106] : memref<96x96xf32, #tpu.memory_space<vmem>>, vector<64x96xf32>
    %262 = vector.broadcast %218 : vector<64x1xf32> to vector<64x96xf32>
    %263 = arith.mulf %261, %262 : vector<64x96xf32>
    %264 = vector.extract_strided_slice %214 {offsets = [5, 0], sizes = [1, 96], strides = [1, 1]} : vector<9x96xf32> to vector<1x96xf32>
    %265 = vector.shape_cast %264 : vector<1x96xf32> to vector<96xf32>
    %266 = vector.shape_cast %265 : vector<96xf32> to vector<1x96xf32>
    %267 = vector.broadcast %266 : vector<1x96xf32> to vector<64x96xf32>
    %268 = arith.mulf %263, %267 : vector<64x96xf32>
    %269 = arith.addf %260, %268 : vector<64x96xf32>
    %c23_107 = arith.constant 23 : index
    %c0_108 = arith.constant 0 : index
    %270 = vector.load %arg37[%c23_107, %c0_108] : memref<96x96xf32, #tpu.memory_space<vmem>>, vector<64x96xf32>
    %271 = vector.broadcast %216 : vector<64x1xf32> to vector<64x96xf32>
    %272 = arith.mulf %270, %271 : vector<64x96xf32>
    %273 = vector.extract_strided_slice %214 {offsets = [6, 0], sizes = [1, 96], strides = [1, 1]} : vector<9x96xf32> to vector<1x96xf32>
    %274 = vector.shape_cast %273 : vector<1x96xf32> to vector<96xf32>
    %275 = vector.shape_cast %274 : vector<96xf32> to vector<1x96xf32>
    %276 = vector.broadcast %275 : vector<1x96xf32> to vector<64x96xf32>
    %277 = arith.mulf %272, %276 : vector<64x96xf32>
    %278 = arith.addf %269, %277 : vector<64x96xf32>
    %c24_109 = arith.constant 24 : index
    %c0_110 = arith.constant 0 : index
    %279 = vector.load %arg37[%c24_109, %c0_110] : memref<96x96xf32, #tpu.memory_space<vmem>>, vector<64x96xf32>
    %280 = vector.extract_strided_slice %214 {offsets = [7, 0], sizes = [1, 96], strides = [1, 1]} : vector<9x96xf32> to vector<1x96xf32>
    %281 = vector.shape_cast %280 : vector<1x96xf32> to vector<96xf32>
    %282 = vector.shape_cast %281 : vector<96xf32> to vector<1x96xf32>
    %283 = vector.broadcast %282 : vector<1x96xf32> to vector<64x96xf32>
    %284 = arith.mulf %279, %283 : vector<64x96xf32>
    %285 = arith.addf %278, %284 : vector<64x96xf32>
    %c25_111 = arith.constant 25 : index
    %c0_112 = arith.constant 0 : index
    %286 = vector.load %arg37[%c25_111, %c0_112] : memref<96x96xf32, #tpu.memory_space<vmem>>, vector<64x96xf32>
    %287 = vector.broadcast %218 : vector<64x1xf32> to vector<64x96xf32>
    %288 = arith.mulf %286, %287 : vector<64x96xf32>
    %289 = vector.extract_strided_slice %214 {offsets = [8, 0], sizes = [1, 96], strides = [1, 1]} : vector<9x96xf32> to vector<1x96xf32>
    %290 = vector.shape_cast %289 : vector<1x96xf32> to vector<96xf32>
    %291 = vector.shape_cast %290 : vector<96xf32> to vector<1x96xf32>
    %292 = vector.broadcast %291 : vector<1x96xf32> to vector<64x96xf32>
    %293 = arith.mulf %288, %292 : vector<64x96xf32>
    %294 = arith.addf %285, %293 : vector<64x96xf32>
    %c0_113 = arith.constant 0 : index
    %c0_114 = arith.constant 0 : index
    %295 = vector.load %arg11[%c0_113, %c0_114] : memref<1x96xf32, #tpu.memory_space<vmem>>, vector<1x96xf32>
    %296 = vector.broadcast %295 : vector<1x96xf32> to vector<64x96xf32>
    %297 = arith.addf %294, %296 : vector<64x96xf32>
    %298 = arith.truncf %297 : vector<64x96xf32> to vector<64x96xbf16>
    %c0_115 = arith.constant 0 : index
    %c0_116 = arith.constant 0 : index
    %299 = vector.load %arg12[%c0_115, %c0_116] : memref<96x64xbf16, #tpu.memory_space<vmem>>, vector<96x64xbf16>
    %cst_117 = arith.constant dense<0.000000e+00> : vector<64x64xf32>
    %300 = tpu.matmul %298, %299, %cst_117 {dimension_numbers = #tpu.dot_dimension_numbers<[1], [0], [0], [1], [0, 0, 1, 1], [], []>} : vector<64x96xbf16>, vector<96x64xbf16>, vector<64x64xf32> -> vector<64x64xf32>
    %c0_118 = arith.constant 0 : index
    %c0_119 = arith.constant 0 : index
    %301 = vector.load %arg13[%c0_118, %c0_119] : memref<1x64xf32, #tpu.memory_space<vmem>>, vector<1x64xf32>
    %302 = vector.broadcast %301 : vector<1x64xf32> to vector<64x64xf32>
    %303 = arith.addf %300, %302 : vector<64x64xf32>
    %cst_120 = arith.constant 0.000000e+00 : f32
    %304 = vector.broadcast %cst_120 : f32 to vector<64x64xf32>
    %305 = arith.maximumf %303, %304 : vector<64x64xf32>
    %306 = vector.extract_strided_slice %305 {offsets = [0, 0], sizes = [56, 64], strides = [1, 1]} : vector<64x64xf32> to vector<56x64xf32>
    %307 = vector.extract_strided_slice %305 {offsets = [8, 0], sizes = [56, 64], strides = [1, 1]} : vector<64x64xf32> to vector<56x64xf32>
    %308 = arith.maximumf %306, %307 : vector<56x64xf32>
    %c0_121 = arith.constant 0 : index
    %c0_122 = arith.constant 0 : index
    %c0_123 = arith.constant 0 : index
    %309 = vector.load %arg26[%c0_121, %c0_122, %c0_123] : memref<2x16x56xf32, #tpu.memory_space<vmem>>, vector<1x16x56xf32>
    %310 = vector.shape_cast %309 : vector<1x16x56xf32> to vector<16x56xf32>
    %cst_124 = arith.constant dense<0.000000e+00> : vector<16x64xf32>
    %311 = tpu.matmul %310, %308, %cst_124 {dimension_numbers = #tpu.dot_dimension_numbers<[1], [0], [0], [1], [0, 0, 1, 1], [], []>} : vector<16x56xf32>, vector<56x64xf32>, vector<16x64xf32> -> vector<16x64xf32>
    %c1_125 = arith.constant 1 : index
    %c0_126 = arith.constant 0 : index
    %c0_127 = arith.constant 0 : index
    %312 = vector.load %arg26[%c1_125, %c0_126, %c0_127] : memref<2x16x56xf32, #tpu.memory_space<vmem>>, vector<1x16x56xf32>
    %313 = vector.shape_cast %312 : vector<1x16x56xf32> to vector<16x56xf32>
    %cst_128 = arith.constant dense<0.000000e+00> : vector<16x64xf32>
    %314 = tpu.matmul %313, %308, %cst_128 {dimension_numbers = #tpu.dot_dimension_numbers<[1], [0], [0], [1], [0, 0, 1, 1], [], []>} : vector<16x56xf32>, vector<56x64xf32>, vector<16x64xf32> -> vector<16x64xf32>
    %315 = arith.maximumf %311, %314 : vector<16x64xf32>
    %cst_129 = arith.constant 0.000000e+00 : f32
    %316 = vector.broadcast %cst_129 : f32 to vector<8x64xf32>
    %c0_130 = arith.constant 0 : index
    %c0_131 = arith.constant 0 : index
    %317 = vector.load %arg38[%c0_130, %c0_131] : memref<32x64xf32, #tpu.memory_space<vmem>>, vector<8x64xf32>
    tpu.vector_store %arg38[%c0_130, %c0_131], %316 {strides = array<i32>} : memref<32x64xf32, #tpu.memory_space<vmem>>, vector<8x64xf32>,
    %c24_132 = arith.constant 24 : index
    %c0_133 = arith.constant 0 : index
    %318 = vector.load %arg38[%c24_132, %c0_133] : memref<32x64xf32, #tpu.memory_space<vmem>>, vector<8x64xf32>
    tpu.vector_store %arg38[%c24_132, %c0_133], %316 {strides = array<i32>} : memref<32x64xf32, #tpu.memory_space<vmem>>, vector<8x64xf32>,
    %c8_134 = arith.constant 8 : index
    %c0_135 = arith.constant 0 : index
    %319 = vector.load %arg38[%c8_134, %c0_135] : memref<32x64xf32, #tpu.memory_space<vmem>>, vector<16x64xf32>
    tpu.vector_store %arg38[%c8_134, %c0_135], %315 {strides = array<i32>} : memref<32x64xf32, #tpu.memory_space<vmem>>, vector<16x64xf32>,
    %c0_136 = arith.constant 0 : index
    %c0_137 = arith.constant 0 : index
    %320 = vector.load %arg14[%c0_136, %c0_137] : memref<9x64xf32, #tpu.memory_space<vmem>>, vector<9x64xf32>
    %c0_138 = arith.constant 0 : index
    %c0_139 = arith.constant 0 : index
    %c0_140 = arith.constant 0 : index
    %321 = vector.load %arg24[%c0_138, %c0_139, %c0_140] : memref<2x16x1xf32, #tpu.memory_space<vmem>>, vector<1x16x1xf32>
    %322 = vector.shape_cast %321 : vector<1x16x1xf32> to vector<16x1xf32>
    %c1_141 = arith.constant 1 : index
    %c0_142 = arith.constant 0 : index
    %c0_143 = arith.constant 0 : index
    %323 = vector.load %arg24[%c1_141, %c0_142, %c0_143] : memref<2x16x1xf32, #tpu.memory_space<vmem>>, vector<1x16x1xf32>
    %324 = vector.shape_cast %323 : vector<1x16x1xf32> to vector<16x1xf32>
    %cst_144 = arith.constant 0.000000e+00 : f32
    %325 = vector.broadcast %cst_144 : f32 to vector<16x64xf32>
    %c3 = arith.constant 3 : index
    %c0_145 = arith.constant 0 : index
    %326 = vector.load %arg38[%c3, %c0_145] : memref<32x64xf32, #tpu.memory_space<vmem>>, vector<16x64xf32>
    %327 = vector.broadcast %322 : vector<16x1xf32> to vector<16x64xf32>
    %328 = arith.mulf %326, %327 : vector<16x64xf32>
    %329 = vector.extract_strided_slice %320 {offsets = [0, 0], sizes = [1, 64], strides = [1, 1]} : vector<9x64xf32> to vector<1x64xf32>
    %330 = vector.shape_cast %329 : vector<1x64xf32> to vector<64xf32>
    %331 = vector.shape_cast %330 : vector<64xf32> to vector<1x64xf32>
    %332 = vector.broadcast %331 : vector<1x64xf32> to vector<16x64xf32>
    %333 = arith.mulf %328, %332 : vector<16x64xf32>
    %334 = arith.addf %325, %333 : vector<16x64xf32>
    %c4 = arith.constant 4 : index
    %c0_146 = arith.constant 0 : index
    %335 = vector.load %arg38[%c4, %c0_146] : memref<32x64xf32, #tpu.memory_space<vmem>>, vector<16x64xf32>
    %336 = vector.extract_strided_slice %320 {offsets = [1, 0], sizes = [1, 64], strides = [1, 1]} : vector<9x64xf32> to vector<1x64xf32>
    %337 = vector.shape_cast %336 : vector<1x64xf32> to vector<64xf32>
    %338 = vector.shape_cast %337 : vector<64xf32> to vector<1x64xf32>
    %339 = vector.broadcast %338 : vector<1x64xf32> to vector<16x64xf32>
    %340 = arith.mulf %335, %339 : vector<16x64xf32>
    %341 = arith.addf %334, %340 : vector<16x64xf32>
    %c5 = arith.constant 5 : index
    %c0_147 = arith.constant 0 : index
    %342 = vector.load %arg38[%c5, %c0_147] : memref<32x64xf32, #tpu.memory_space<vmem>>, vector<16x64xf32>
    %343 = vector.broadcast %324 : vector<16x1xf32> to vector<16x64xf32>
    %344 = arith.mulf %342, %343 : vector<16x64xf32>
    %345 = vector.extract_strided_slice %320 {offsets = [2, 0], sizes = [1, 64], strides = [1, 1]} : vector<9x64xf32> to vector<1x64xf32>
    %346 = vector.shape_cast %345 : vector<1x64xf32> to vector<64xf32>
    %347 = vector.shape_cast %346 : vector<64xf32> to vector<1x64xf32>
    %348 = vector.broadcast %347 : vector<1x64xf32> to vector<16x64xf32>
    %349 = arith.mulf %344, %348 : vector<16x64xf32>
    %350 = arith.addf %341, %349 : vector<16x64xf32>
    %c7_148 = arith.constant 7 : index
    %c0_149 = arith.constant 0 : index
    %351 = vector.load %arg38[%c7_148, %c0_149] : memref<32x64xf32, #tpu.memory_space<vmem>>, vector<16x64xf32>
    %352 = vector.broadcast %322 : vector<16x1xf32> to vector<16x64xf32>
    %353 = arith.mulf %351, %352 : vector<16x64xf32>
    %354 = vector.extract_strided_slice %320 {offsets = [3, 0], sizes = [1, 64], strides = [1, 1]} : vector<9x64xf32> to vector<1x64xf32>
    %355 = vector.shape_cast %354 : vector<1x64xf32> to vector<64xf32>
    %356 = vector.shape_cast %355 : vector<64xf32> to vector<1x64xf32>
    %357 = vector.broadcast %356 : vector<1x64xf32> to vector<16x64xf32>
    %358 = arith.mulf %353, %357 : vector<16x64xf32>
    %359 = arith.addf %350, %358 : vector<16x64xf32>
    %c8_150 = arith.constant 8 : index
    %c0_151 = arith.constant 0 : index
    %360 = vector.load %arg38[%c8_150, %c0_151] : memref<32x64xf32, #tpu.memory_space<vmem>>, vector<16x64xf32>
    %361 = vector.extract_strided_slice %320 {offsets = [4, 0], sizes = [1, 64], strides = [1, 1]} : vector<9x64xf32> to vector<1x64xf32>
    %362 = vector.shape_cast %361 : vector<1x64xf32> to vector<64xf32>
    %363 = vector.shape_cast %362 : vector<64xf32> to vector<1x64xf32>
    %364 = vector.broadcast %363 : vector<1x64xf32> to vector<16x64xf32>
    %365 = arith.mulf %360, %364 : vector<16x64xf32>
    %366 = arith.addf %359, %365 : vector<16x64xf32>
    %c9_152 = arith.constant 9 : index
    %c0_153 = arith.constant 0 : index
    %367 = vector.load %arg38[%c9_152, %c0_153] : memref<32x64xf32, #tpu.memory_space<vmem>>, vector<16x64xf32>
    %368 = vector.broadcast %324 : vector<16x1xf32> to vector<16x64xf32>
    %369 = arith.mulf %367, %368 : vector<16x64xf32>
    %370 = vector.extract_strided_slice %320 {offsets = [5, 0], sizes = [1, 64], strides = [1, 1]} : vector<9x64xf32> to vector<1x64xf32>
    %371 = vector.shape_cast %370 : vector<1x64xf32> to vector<64xf32>
    %372 = vector.shape_cast %371 : vector<64xf32> to vector<1x64xf32>
    %373 = vector.broadcast %372 : vector<1x64xf32> to vector<16x64xf32>
    %374 = arith.mulf %369, %373 : vector<16x64xf32>
    %375 = arith.addf %366, %374 : vector<16x64xf32>
    %c11 = arith.constant 11 : index
    %c0_154 = arith.constant 0 : index
    %376 = vector.load %arg38[%c11, %c0_154] : memref<32x64xf32, #tpu.memory_space<vmem>>, vector<16x64xf32>
    %377 = vector.broadcast %322 : vector<16x1xf32> to vector<16x64xf32>
    %378 = arith.mulf %376, %377 : vector<16x64xf32>
    %379 = vector.extract_strided_slice %320 {offsets = [6, 0], sizes = [1, 64], strides = [1, 1]} : vector<9x64xf32> to vector<1x64xf32>
    %380 = vector.shape_cast %379 : vector<1x64xf32> to vector<64xf32>
    %381 = vector.shape_cast %380 : vector<64xf32> to vector<1x64xf32>
    %382 = vector.broadcast %381 : vector<1x64xf32> to vector<16x64xf32>
    %383 = arith.mulf %378, %382 : vector<16x64xf32>
    %384 = arith.addf %375, %383 : vector<16x64xf32>
    %c12 = arith.constant 12 : index
    %c0_155 = arith.constant 0 : index
    %385 = vector.load %arg38[%c12, %c0_155] : memref<32x64xf32, #tpu.memory_space<vmem>>, vector<16x64xf32>
    %386 = vector.extract_strided_slice %320 {offsets = [7, 0], sizes = [1, 64], strides = [1, 1]} : vector<9x64xf32> to vector<1x64xf32>
    %387 = vector.shape_cast %386 : vector<1x64xf32> to vector<64xf32>
    %388 = vector.shape_cast %387 : vector<64xf32> to vector<1x64xf32>
    %389 = vector.broadcast %388 : vector<1x64xf32> to vector<16x64xf32>
    %390 = arith.mulf %385, %389 : vector<16x64xf32>
    %391 = arith.addf %384, %390 : vector<16x64xf32>
    %c13 = arith.constant 13 : index
    %c0_156 = arith.constant 0 : index
    %392 = vector.load %arg38[%c13, %c0_156] : memref<32x64xf32, #tpu.memory_space<vmem>>, vector<16x64xf32>
    %393 = vector.broadcast %324 : vector<16x1xf32> to vector<16x64xf32>
    %394 = arith.mulf %392, %393 : vector<16x64xf32>
    %395 = vector.extract_strided_slice %320 {offsets = [8, 0], sizes = [1, 64], strides = [1, 1]} : vector<9x64xf32> to vector<1x64xf32>
    %396 = vector.shape_cast %395 : vector<1x64xf32> to vector<64xf32>
    %397 = vector.shape_cast %396 : vector<64xf32> to vector<1x64xf32>
    %398 = vector.broadcast %397 : vector<1x64xf32> to vector<16x64xf32>
    %399 = arith.mulf %394, %398 : vector<16x64xf32>
    %400 = arith.addf %391, %399 : vector<16x64xf32>
    %c0_157 = arith.constant 0 : index
    %c0_158 = arith.constant 0 : index
    %401 = vector.load %arg15[%c0_157, %c0_158] : memref<1x64xf32, #tpu.memory_space<vmem>>, vector<1x64xf32>
    %402 = vector.broadcast %401 : vector<1x64xf32> to vector<16x64xf32>
    %403 = arith.addf %400, %402 : vector<16x64xf32>
    %404 = arith.truncf %403 : vector<16x64xf32> to vector<16x64xbf16>
    %c0_159 = arith.constant 0 : index
    %c0_160 = arith.constant 0 : index
    %405 = vector.load %arg16[%c0_159, %c0_160] : memref<64x48xbf16, #tpu.memory_space<vmem>>, vector<64x48xbf16>
    %cst_161 = arith.constant dense<0.000000e+00> : vector<16x48xf32>
    %406 = tpu.matmul %404, %405, %cst_161 {dimension_numbers = #tpu.dot_dimension_numbers<[1], [0], [0], [1], [0, 0, 1, 1], [], []>} : vector<16x64xbf16>, vector<64x48xbf16>, vector<16x48xf32> -> vector<16x48xf32>
    %c0_162 = arith.constant 0 : index
    %c0_163 = arith.constant 0 : index
    %407 = vector.load %arg17[%c0_162, %c0_163] : memref<1x48xf32, #tpu.memory_space<vmem>>, vector<1x48xf32>
    %408 = vector.broadcast %407 : vector<1x48xf32> to vector<16x48xf32>
    %409 = arith.addf %406, %408 : vector<16x48xf32>
    %cst_164 = arith.constant 0.000000e+00 : f32
    %410 = vector.broadcast %cst_164 : f32 to vector<16x48xf32>
    %411 = arith.maximumf %409, %410 : vector<16x48xf32>
    %cst_165 = arith.constant 0.000000e+00 : f32
    %412 = vector.broadcast %cst_165 : f32 to vector<8x48xf32>
    %c0_166 = arith.constant 0 : index
    %c0_167 = arith.constant 0 : index
    %413 = vector.load %arg39[%c0_166, %c0_167] : memref<32x48xf32, #tpu.memory_space<vmem>>, vector<8x48xf32>
    tpu.vector_store %arg39[%c0_166, %c0_167], %412 {strides = array<i32>} : memref<32x48xf32, #tpu.memory_space<vmem>>, vector<8x48xf32>,
    %c24_168 = arith.constant 24 : index
    %c0_169 = arith.constant 0 : index
    %414 = vector.load %arg39[%c24_168, %c0_169] : memref<32x48xf32, #tpu.memory_space<vmem>>, vector<8x48xf32>
    tpu.vector_store %arg39[%c24_168, %c0_169], %412 {strides = array<i32>} : memref<32x48xf32, #tpu.memory_space<vmem>>, vector<8x48xf32>,
    %c8_170 = arith.constant 8 : index
    %c0_171 = arith.constant 0 : index
    %415 = vector.load %arg39[%c8_170, %c0_171] : memref<32x48xf32, #tpu.memory_space<vmem>>, vector<16x48xf32>
    tpu.vector_store %arg39[%c8_170, %c0_171], %411 {strides = array<i32>} : memref<32x48xf32, #tpu.memory_space<vmem>>, vector<16x48xf32>,
    %c0_172 = arith.constant 0 : index
    %c0_173 = arith.constant 0 : index
    %416 = vector.load %arg18[%c0_172, %c0_173] : memref<9x48xf32, #tpu.memory_space<vmem>>, vector<9x48xf32>
    %c0_174 = arith.constant 0 : index
    %c0_175 = arith.constant 0 : index
    %c0_176 = arith.constant 0 : index
    %417 = vector.load %arg24[%c0_174, %c0_175, %c0_176] : memref<2x16x1xf32, #tpu.memory_space<vmem>>, vector<1x16x1xf32>
    %418 = vector.shape_cast %417 : vector<1x16x1xf32> to vector<16x1xf32>
    %c1_177 = arith.constant 1 : index
    %c0_178 = arith.constant 0 : index
    %c0_179 = arith.constant 0 : index
    %419 = vector.load %arg24[%c1_177, %c0_178, %c0_179] : memref<2x16x1xf32, #tpu.memory_space<vmem>>, vector<1x16x1xf32>
    %420 = vector.shape_cast %419 : vector<1x16x1xf32> to vector<16x1xf32>
    %cst_180 = arith.constant 0.000000e+00 : f32
    %421 = vector.broadcast %cst_180 : f32 to vector<16x48xf32>
    %c3_181 = arith.constant 3 : index
    %c0_182 = arith.constant 0 : index
    %422 = vector.load %arg39[%c3_181, %c0_182] : memref<32x48xf32, #tpu.memory_space<vmem>>, vector<16x48xf32>
    %423 = vector.broadcast %418 : vector<16x1xf32> to vector<16x48xf32>
    %424 = arith.mulf %422, %423 : vector<16x48xf32>
    %425 = vector.extract_strided_slice %416 {offsets = [0, 0], sizes = [1, 48], strides = [1, 1]} : vector<9x48xf32> to vector<1x48xf32>
    %426 = vector.shape_cast %425 : vector<1x48xf32> to vector<48xf32>
    %427 = vector.shape_cast %426 : vector<48xf32> to vector<1x48xf32>
    %428 = vector.broadcast %427 : vector<1x48xf32> to vector<16x48xf32>
    %429 = arith.mulf %424, %428 : vector<16x48xf32>
    %430 = arith.addf %421, %429 : vector<16x48xf32>
    %c4_183 = arith.constant 4 : index
    %c0_184 = arith.constant 0 : index
    %431 = vector.load %arg39[%c4_183, %c0_184] : memref<32x48xf32, #tpu.memory_space<vmem>>, vector<16x48xf32>
    %432 = vector.extract_strided_slice %416 {offsets = [1, 0], sizes = [1, 48], strides = [1, 1]} : vector<9x48xf32> to vector<1x48xf32>
    %433 = vector.shape_cast %432 : vector<1x48xf32> to vector<48xf32>
    %434 = vector.shape_cast %433 : vector<48xf32> to vector<1x48xf32>
    %435 = vector.broadcast %434 : vector<1x48xf32> to vector<16x48xf32>
    %436 = arith.mulf %431, %435 : vector<16x48xf32>
    %437 = arith.addf %430, %436 : vector<16x48xf32>
    %c5_185 = arith.constant 5 : index
    %c0_186 = arith.constant 0 : index
    %438 = vector.load %arg39[%c5_185, %c0_186] : memref<32x48xf32, #tpu.memory_space<vmem>>, vector<16x48xf32>
    %439 = vector.broadcast %420 : vector<16x1xf32> to vector<16x48xf32>
    %440 = arith.mulf %438, %439 : vector<16x48xf32>
    %441 = vector.extract_strided_slice %416 {offsets = [2, 0], sizes = [1, 48], strides = [1, 1]} : vector<9x48xf32> to vector<1x48xf32>
    %442 = vector.shape_cast %441 : vector<1x48xf32> to vector<48xf32>
    %443 = vector.shape_cast %442 : vector<48xf32> to vector<1x48xf32>
    %444 = vector.broadcast %443 : vector<1x48xf32> to vector<16x48xf32>
    %445 = arith.mulf %440, %444 : vector<16x48xf32>
    %446 = arith.addf %437, %445 : vector<16x48xf32>
    %c7_187 = arith.constant 7 : index
    %c0_188 = arith.constant 0 : index
    %447 = vector.load %arg39[%c7_187, %c0_188] : memref<32x48xf32, #tpu.memory_space<vmem>>, vector<16x48xf32>
    %448 = vector.broadcast %418 : vector<16x1xf32> to vector<16x48xf32>
    %449 = arith.mulf %447, %448 : vector<16x48xf32>
    %450 = vector.extract_strided_slice %416 {offsets = [3, 0], sizes = [1, 48], strides = [1, 1]} : vector<9x48xf32> to vector<1x48xf32>
    %451 = vector.shape_cast %450 : vector<1x48xf32> to vector<48xf32>
    %452 = vector.shape_cast %451 : vector<48xf32> to vector<1x48xf32>
    %453 = vector.broadcast %452 : vector<1x48xf32> to vector<16x48xf32>
    %454 = arith.mulf %449, %453 : vector<16x48xf32>
    %455 = arith.addf %446, %454 : vector<16x48xf32>
    %c8_189 = arith.constant 8 : index
    %c0_190 = arith.constant 0 : index
    %456 = vector.load %arg39[%c8_189, %c0_190] : memref<32x48xf32, #tpu.memory_space<vmem>>, vector<16x48xf32>
    %457 = vector.extract_strided_slice %416 {offsets = [4, 0], sizes = [1, 48], strides = [1, 1]} : vector<9x48xf32> to vector<1x48xf32>
    %458 = vector.shape_cast %457 : vector<1x48xf32> to vector<48xf32>
    %459 = vector.shape_cast %458 : vector<48xf32> to vector<1x48xf32>
    %460 = vector.broadcast %459 : vector<1x48xf32> to vector<16x48xf32>
    %461 = arith.mulf %456, %460 : vector<16x48xf32>
    %462 = arith.addf %455, %461 : vector<16x48xf32>
    %c9_191 = arith.constant 9 : index
    %c0_192 = arith.constant 0 : index
    %463 = vector.load %arg39[%c9_191, %c0_192] : memref<32x48xf32, #tpu.memory_space<vmem>>, vector<16x48xf32>
    %464 = vector.broadcast %420 : vector<16x1xf32> to vector<16x48xf32>
    %465 = arith.mulf %463, %464 : vector<16x48xf32>
    %466 = vector.extract_strided_slice %416 {offsets = [5, 0], sizes = [1, 48], strides = [1, 1]} : vector<9x48xf32> to vector<1x48xf32>
    %467 = vector.shape_cast %466 : vector<1x48xf32> to vector<48xf32>
    %468 = vector.shape_cast %467 : vector<48xf32> to vector<1x48xf32>
    %469 = vector.broadcast %468 : vector<1x48xf32> to vector<16x48xf32>
    %470 = arith.mulf %465, %469 : vector<16x48xf32>
    %471 = arith.addf %462, %470 : vector<16x48xf32>
    %c11_193 = arith.constant 11 : index
    %c0_194 = arith.constant 0 : index
    %472 = vector.load %arg39[%c11_193, %c0_194] : memref<32x48xf32, #tpu.memory_space<vmem>>, vector<16x48xf32>
    %473 = vector.broadcast %418 : vector<16x1xf32> to vector<16x48xf32>
    %474 = arith.mulf %472, %473 : vector<16x48xf32>
    %475 = vector.extract_strided_slice %416 {offsets = [6, 0], sizes = [1, 48], strides = [1, 1]} : vector<9x48xf32> to vector<1x48xf32>
    %476 = vector.shape_cast %475 : vector<1x48xf32> to vector<48xf32>
    %477 = vector.shape_cast %476 : vector<48xf32> to vector<1x48xf32>
    %478 = vector.broadcast %477 : vector<1x48xf32> to vector<16x48xf32>
    %479 = arith.mulf %474, %478 : vector<16x48xf32>
    %480 = arith.addf %471, %479 : vector<16x48xf32>
    %c12_195 = arith.constant 12 : index
    %c0_196 = arith.constant 0 : index
    %481 = vector.load %arg39[%c12_195, %c0_196] : memref<32x48xf32, #tpu.memory_space<vmem>>, vector<16x48xf32>
    %482 = vector.extract_strided_slice %416 {offsets = [7, 0], sizes = [1, 48], strides = [1, 1]} : vector<9x48xf32> to vector<1x48xf32>
    %483 = vector.shape_cast %482 : vector<1x48xf32> to vector<48xf32>
    %484 = vector.shape_cast %483 : vector<48xf32> to vector<1x48xf32>
    %485 = vector.broadcast %484 : vector<1x48xf32> to vector<16x48xf32>
    %486 = arith.mulf %481, %485 : vector<16x48xf32>
    %487 = arith.addf %480, %486 : vector<16x48xf32>
    %c13_197 = arith.constant 13 : index
    %c0_198 = arith.constant 0 : index
    %488 = vector.load %arg39[%c13_197, %c0_198] : memref<32x48xf32, #tpu.memory_space<vmem>>, vector<16x48xf32>
    %489 = vector.broadcast %420 : vector<16x1xf32> to vector<16x48xf32>
    %490 = arith.mulf %488, %489 : vector<16x48xf32>
    %491 = vector.extract_strided_slice %416 {offsets = [8, 0], sizes = [1, 48], strides = [1, 1]} : vector<9x48xf32> to vector<1x48xf32>
    %492 = vector.shape_cast %491 : vector<1x48xf32> to vector<48xf32>
    %493 = vector.shape_cast %492 : vector<48xf32> to vector<1x48xf32>
    %494 = vector.broadcast %493 : vector<1x48xf32> to vector<16x48xf32>
    %495 = arith.mulf %490, %494 : vector<16x48xf32>
    %496 = arith.addf %487, %495 : vector<16x48xf32>
    %c0_199 = arith.constant 0 : index
    %c0_200 = arith.constant 0 : index
    %497 = vector.load %arg19[%c0_199, %c0_200] : memref<1x48xf32, #tpu.memory_space<vmem>>, vector<1x48xf32>
    %498 = vector.broadcast %497 : vector<1x48xf32> to vector<16x48xf32>
    %499 = arith.addf %496, %498 : vector<16x48xf32>
    %500 = arith.truncf %499 : vector<16x48xf32> to vector<16x48xbf16>
    %c0_201 = arith.constant 0 : index
    %c0_202 = arith.constant 0 : index
    %501 = vector.load %arg20[%c0_201, %c0_202] : memref<48x64xbf16, #tpu.memory_space<vmem>>, vector<48x64xbf16>
    %cst_203 = arith.constant dense<0.000000e+00> : vector<16x64xf32>
    %502 = tpu.matmul %500, %501, %cst_203 {dimension_numbers = #tpu.dot_dimension_numbers<[1], [0], [0], [1], [0, 0, 1, 1], [], []>} : vector<16x48xbf16>, vector<48x64xbf16>, vector<16x64xf32> -> vector<16x64xf32>
    %c0_204 = arith.constant 0 : index
    %c0_205 = arith.constant 0 : index
    %503 = vector.load %arg21[%c0_204, %c0_205] : memref<1x64xf32, #tpu.memory_space<vmem>>, vector<1x64xf32>
    %504 = vector.broadcast %503 : vector<1x64xf32> to vector<16x64xf32>
    %505 = arith.addf %502, %504 : vector<16x64xf32>
    %cst_206 = arith.constant 0.000000e+00 : f32
    %506 = vector.broadcast %cst_206 : f32 to vector<16x64xf32>
    %507 = arith.maximumf %505, %506 : vector<16x64xf32>
    %cst_207 = arith.constant dense<0.000000e+00> : vector<64xf32>
    %508 = vector.multi_reduction <add>, %507, %cst_207 [0] : vector<16x64xf32> to vector<64xf32>
    %509 = vector.shape_cast %508 : vector<64xf32> to vector<1x64xf32>
    %cst_208 = arith.constant 6.250000e-02 : f32
    %510 = vector.broadcast %cst_208 : f32 to vector<1x64xf32>
    %511 = arith.mulf %509, %510 : vector<1x64xf32>
    %512 = arith.truncf %511 : vector<1x64xf32> to vector<1x64xbf16>
    %c0_209 = arith.constant 0 : index
    %c0_210 = arith.constant 0 : index
    %513 = vector.load %arg27[%c0_209, %c0_210] : memref<64x264xbf16, #tpu.memory_space<vmem>>, vector<64x264xbf16>
    %cst_211 = arith.constant dense<0.000000e+00> : vector<1x264xf32>
    %514 = tpu.matmul %512, %513, %cst_211 {dimension_numbers = #tpu.dot_dimension_numbers<[1], [0], [0], [1], [0, 0, 1, 1], [], []>} : vector<1x64xbf16>, vector<64x264xbf16>, vector<1x264xf32> -> vector<1x264xf32>
    %c0_212 = arith.constant 0 : index
    %c0_213 = arith.constant 0 : index
    %515 = vector.load %arg28[%c0_212, %c0_213] : memref<1x264xf32, #tpu.memory_space<vmem>>, vector<1x264xf32>
    %516 = arith.addf %514, %515 : vector<1x264xf32>
    %cst_214 = arith.constant 0.000000e+00 : f32
    %517 = vector.broadcast %cst_214 : f32 to vector<1x264xf32>
    %518 = arith.maximumf %516, %517 : vector<1x264xf32>
    %519 = arith.truncf %518 : vector<1x264xf32> to vector<1x264xbf16>
    %c0_215 = arith.constant 0 : index
    %c0_216 = arith.constant 0 : index
    %520 = vector.load %arg29[%c0_215, %c0_216] : memref<264x16xbf16, #tpu.memory_space<vmem>>, vector<264x16xbf16>
    %cst_217 = arith.constant dense<0.000000e+00> : vector<1x16xf32>
    %521 = tpu.matmul %519, %520, %cst_217 {dimension_numbers = #tpu.dot_dimension_numbers<[1], [0], [0], [1], [0, 0, 1, 1], [], []>} : vector<1x264xbf16>, vector<264x16xbf16>, vector<1x16xf32> -> vector<1x16xf32>
    %c0_218 = arith.constant 0 : index
    %c0_219 = arith.constant 0 : index
    %522 = vector.load %arg30[%c0_218, %c0_219] : memref<1x16xf32, #tpu.memory_space<vmem>>, vector<1x16xf32>
    %523 = arith.addf %521, %522 : vector<1x16xf32>
    %c0_220 = arith.constant 0 : index
    %524 = memref.load %arg32[%c0_220] : memref<1xf32, #tpu.memory_space<smem>>
    %c0_221 = arith.constant 0 : index
    %525 = memref.load %arg33[%c0_221] : memref<1xf32, #tpu.memory_space<smem>>
    %526 = vector.broadcast %524 : f32 to vector<1x16xf32>
    %527 = arith.divf %523, %526 : vector<1x16xf32>
    %cst_222 = arith.constant 0.000000e+00 : f32
    %528 = vector.broadcast %cst_222 : f32 to vector<1x16xf32>
    %529 = arith.subf %528, %527 : vector<1x16xf32>
    %530 = math.exp %529 : vector<1x16xf32>
    %cst_223 = arith.constant 1.000000e+00 : f32
    %531 = vector.broadcast %cst_223 : f32 to vector<1x16xf32>
    %532 = arith.addf %531, %530 : vector<1x16xf32>
    %cst_224 = arith.constant 1.000000e+00 : f32
    %533 = vector.broadcast %cst_224 : f32 to vector<1x16xf32>
    %534 = arith.divf %533, %532 : vector<1x16xf32>
    %535 = vector.broadcast %525 : f32 to vector<1x16xf32>
    %536 = arith.cmpf oge, %527, %535 : vector<1x16xf32>
    %cst_225 = arith.constant 0.000000e+00 : f32
    %537 = vector.broadcast %cst_225 : f32 to vector<1x16xf32>
    %538 = arith.select %536, %534, %537 : vector<1x16xi1>, vector<1x16xf32>
    %c0_226 = arith.constant 0 : index
    %c0_227 = arith.constant 0 : index
    %539 = vector.load %arg31[%c0_226, %c0_227] : memref<4x16xf32, #tpu.memory_space<vmem>>, vector<4x16xf32>
    %cst_228 = arith.constant dense<0.000000e+00> : vector<4x1xf32>
    %540 = tpu.matmul %539, %538, %cst_228 {dimension_numbers = #tpu.dot_dimension_numbers<[1], [1], [0], [0], [0, 0, 1, 0], [], []>} : vector<4x16xf32>, vector<1x16xf32>, vector<4x1xf32> -> vector<4x1xf32>
    %541 = vector.broadcast %540 : vector<4x1xf32> to vector<4x256xf32>
    %542 = arith.mulf %1, %541 : vector<4x256xf32>
    %c0_229 = arith.constant 0 : index
    %c0_230 = arith.constant 0 : index
    %c0_231 = arith.constant 0 : index
    %543 = vector.load %arg34[%c0_229, %c0_230, %c0_231] : memref<1x4x256xf32, #tpu.memory_space<vmem>>, vector<1x4x256xf32>
    %544 = vector.shape_cast %543 : vector<1x4x256xf32> to vector<4x256xf32>
    %545 = vector.shape_cast %542 : vector<4x256xf32> to vector<1x4x256xf32>
    tpu.vector_store %arg34[%c0_229, %c0_230, %c0_231], %545 {strides = array<i32>} : memref<1x4x256xf32, #tpu.memory_space<vmem>>, vector<1x4x256xf32>,
    return
  }
  func.func @transform_0(%arg0: i32) -> (i32, i32, i32) {
    %c0_i32 = arith.constant 0 : i32
    %c0_i32_0 = arith.constant 0 : i32
    %c0_i32_1 = arith.constant 0 : i32
    return %arg0, %c0_i32, %c0_i32_0 : i32, i32, i32
  }
  func.func @transform_1(%arg0: i32) -> (i32, i32) {
    %c0_i32 = arith.constant 0 : i32
    %c0_i32_0 = arith.constant 0 : i32
    %c0_i32_1 = arith.constant 0 : i32
    return %c0_i32, %c0_i32_0 : i32, i32
  }
  func.func @transform_2(%arg0: i32) -> (i32, i32) {
    %c0_i32 = arith.constant 0 : i32
    %c0_i32_0 = arith.constant 0 : i32
    %c0_i32_1 = arith.constant 0 : i32
    return %c0_i32, %c0_i32_0 : i32, i32
  }
  func.func @transform_3(%arg0: i32) -> (i32, i32) {
    %c0_i32 = arith.constant 0 : i32
    %c0_i32_0 = arith.constant 0 : i32
    %c0_i32_1 = arith.constant 0 : i32
    return %c0_i32, %c0_i32_0 : i32, i32
  }
  func.func @transform_4(%arg0: i32) -> (i32, i32) {
    %c0_i32 = arith.constant 0 : i32
    %c0_i32_0 = arith.constant 0 : i32
    %c0_i32_1 = arith.constant 0 : i32
    return %c0_i32, %c0_i32_0 : i32, i32
  }
  func.func @transform_5(%arg0: i32) -> (i32, i32) {
    %c0_i32 = arith.constant 0 : i32
    %c0_i32_0 = arith.constant 0 : i32
    %c0_i32_1 = arith.constant 0 : i32
    return %c0_i32, %c0_i32_0 : i32, i32
  }
  func.func @transform_6(%arg0: i32) -> (i32, i32) {
    %c0_i32 = arith.constant 0 : i32
    %c0_i32_0 = arith.constant 0 : i32
    %c0_i32_1 = arith.constant 0 : i32
    return %c0_i32, %c0_i32_0 : i32, i32
  }
  func.func @transform_7(%arg0: i32) -> (i32, i32) {
    %c0_i32 = arith.constant 0 : i32
    %c0_i32_0 = arith.constant 0 : i32
    %c0_i32_1 = arith.constant 0 : i32
    return %c0_i32, %c0_i32_0 : i32, i32
  }
  func.func @transform_8(%arg0: i32) -> (i32, i32) {
    %c0_i32 = arith.constant 0 : i32
    %c0_i32_0 = arith.constant 0 : i32
    %c0_i32_1 = arith.constant 0 : i32
    return %c0_i32, %c0_i32_0 : i32, i32
  }
  func.func @transform_9(%arg0: i32) -> (i32, i32) {
    %c0_i32 = arith.constant 0 : i32
    %c0_i32_0 = arith.constant 0 : i32
    %c0_i32_1 = arith.constant 0 : i32
    return %c0_i32, %c0_i32_0 : i32, i32
  }
  func.func @transform_10(%arg0: i32) -> (i32, i32) {
    %c0_i32 = arith.constant 0 : i32
    %c0_i32_0 = arith.constant 0 : i32
    %c0_i32_1 = arith.constant 0 : i32
    return %c0_i32, %c0_i32_0 : i32, i32
  }
  func.func @transform_11(%arg0: i32) -> (i32, i32) {
    %c0_i32 = arith.constant 0 : i32
    %c0_i32_0 = arith.constant 0 : i32
    %c0_i32_1 = arith.constant 0 : i32
    return %c0_i32, %c0_i32_0 : i32, i32
  }
  func.func @transform_12(%arg0: i32) -> (i32, i32) {
    %c0_i32 = arith.constant 0 : i32
    %c0_i32_0 = arith.constant 0 : i32
    %c0_i32_1 = arith.constant 0 : i32
    return %c0_i32, %c0_i32_0 : i32, i32
  }
  func.func @transform_13(%arg0: i32) -> (i32, i32) {
    %c0_i32 = arith.constant 0 : i32
    %c0_i32_0 = arith.constant 0 : i32
    %c0_i32_1 = arith.constant 0 : i32
    return %c0_i32, %c0_i32_0 : i32, i32
  }
  func.func @transform_14(%arg0: i32) -> (i32, i32) {
    %c0_i32 = arith.constant 0 : i32
    %c0_i32_0 = arith.constant 0 : i32
    %c0_i32_1 = arith.constant 0 : i32
    return %c0_i32, %c0_i32_0 : i32, i32
  }
  func.func @transform_15(%arg0: i32) -> (i32, i32) {
    %c0_i32 = arith.constant 0 : i32
    %c0_i32_0 = arith.constant 0 : i32
    %c0_i32_1 = arith.constant 0 : i32
    return %c0_i32, %c0_i32_0 : i32, i32
  }
  func.func @transform_16(%arg0: i32) -> (i32, i32) {
    %c0_i32 = arith.constant 0 : i32
    %c0_i32_0 = arith.constant 0 : i32
    %c0_i32_1 = arith.constant 0 : i32
    return %c0_i32, %c0_i32_0 : i32, i32
  }
  func.func @transform_17(%arg0: i32) -> (i32, i32) {
    %c0_i32 = arith.constant 0 : i32
    %c0_i32_0 = arith.constant 0 : i32
    %c0_i32_1 = arith.constant 0 : i32
    return %c0_i32, %c0_i32_0 : i32, i32
  }
  func.func @transform_18(%arg0: i32) -> (i32, i32) {
    %c0_i32 = arith.constant 0 : i32
    %c0_i32_0 = arith.constant 0 : i32
    %c0_i32_1 = arith.constant 0 : i32
    return %c0_i32, %c0_i32_0 : i32, i32
  }
  func.func @transform_19(%arg0: i32) -> (i32, i32) {
    %c0_i32 = arith.constant 0 : i32
    %c0_i32_0 = arith.constant 0 : i32
    %c0_i32_1 = arith.constant 0 : i32
    return %c0_i32, %c0_i32_0 : i32, i32
  }
  func.func @transform_20(%arg0: i32) -> (i32, i32) {
    %c0_i32 = arith.constant 0 : i32
    %c0_i32_0 = arith.constant 0 : i32
    %c0_i32_1 = arith.constant 0 : i32
    return %c0_i32, %c0_i32_0 : i32, i32
  }
  func.func @transform_21(%arg0: i32) -> (i32, i32, i32) {
    %c0_i32 = arith.constant 0 : i32
    %c0_i32_0 = arith.constant 0 : i32
    %c0_i32_1 = arith.constant 0 : i32
    %c0_i32_2 = arith.constant 0 : i32
    return %c0_i32, %c0_i32_0, %c0_i32_1 : i32, i32, i32
  }
  func.func @transform_22(%arg0: i32) -> (i32, i32, i32) {
    %c0_i32 = arith.constant 0 : i32
    %c0_i32_0 = arith.constant 0 : i32
    %c0_i32_1 = arith.constant 0 : i32
    %c0_i32_2 = arith.constant 0 : i32
    return %c0_i32, %c0_i32_0, %c0_i32_1 : i32, i32, i32
  }
  func.func @transform_23(%arg0: i32) -> (i32, i32, i32) {
    %c0_i32 = arith.constant 0 : i32
    %c0_i32_0 = arith.constant 0 : i32
    %c0_i32_1 = arith.constant 0 : i32
    %c0_i32_2 = arith.constant 0 : i32
    return %c0_i32, %c0_i32_0, %c0_i32_1 : i32, i32, i32
  }
  func.func @transform_24(%arg0: i32) -> (i32, i32, i32) {
    %c0_i32 = arith.constant 0 : i32
    %c0_i32_0 = arith.constant 0 : i32
    %c0_i32_1 = arith.constant 0 : i32
    %c0_i32_2 = arith.constant 0 : i32
    return %c0_i32, %c0_i32_0, %c0_i32_1 : i32, i32, i32
  }
  func.func @transform_25(%arg0: i32) -> (i32, i32, i32) {
    %c0_i32 = arith.constant 0 : i32
    %c0_i32_0 = arith.constant 0 : i32
    %c0_i32_1 = arith.constant 0 : i32
    %c0_i32_2 = arith.constant 0 : i32
    return %c0_i32, %c0_i32_0, %c0_i32_1 : i32, i32, i32
  }
  func.func @transform_26(%arg0: i32) -> (i32, i32) {
    %c0_i32 = arith.constant 0 : i32
    %c0_i32_0 = arith.constant 0 : i32
    %c0_i32_1 = arith.constant 0 : i32
    return %c0_i32, %c0_i32_0 : i32, i32
  }
  func.func @transform_27(%arg0: i32) -> (i32, i32) {
    %c0_i32 = arith.constant 0 : i32
    %c0_i32_0 = arith.constant 0 : i32
    %c0_i32_1 = arith.constant 0 : i32
    return %c0_i32, %c0_i32_0 : i32, i32
  }
  func.func @transform_28(%arg0: i32) -> (i32, i32) {
    %c0_i32 = arith.constant 0 : i32
    %c0_i32_0 = arith.constant 0 : i32
    %c0_i32_1 = arith.constant 0 : i32
    return %c0_i32, %c0_i32_0 : i32, i32
  }
  func.func @transform_29(%arg0: i32) -> (i32, i32) {
    %c0_i32 = arith.constant 0 : i32
    %c0_i32_0 = arith.constant 0 : i32
    %c0_i32_1 = arith.constant 0 : i32
    return %c0_i32, %c0_i32_0 : i32, i32
  }
  func.func @transform_30(%arg0: i32) -> (i32, i32) {
    %c0_i32 = arith.constant 0 : i32
    %c0_i32_0 = arith.constant 0 : i32
    %c0_i32_1 = arith.constant 0 : i32
    return %c0_i32, %c0_i32_0 : i32, i32
  }
  func.func @transform_31(%arg0: i32) -> i32 {
    %c0_i32 = arith.constant 0 : i32
    %c0_i32_0 = arith.constant 0 : i32
    return %c0_i32 : i32
  }
  func.func @transform_32(%arg0: i32) -> i32 {
    %c0_i32 = arith.constant 0 : i32
    %c0_i32_0 = arith.constant 0 : i32
    return %c0_i32 : i32
  }
  func.func @transform_33(%arg0: i32) -> (i32, i32, i32) {
    %c0_i32 = arith.constant 0 : i32
    %c0_i32_0 = arith.constant 0 : i32
    %c0_i32_1 = arith.constant 0 : i32
    return %arg0, %c0_i32, %c0_i32_0 : i32, i32, i32
  }
}

</mosaic_0001>

<bundles_post_ra>
// kernel: tpu_custom_call.1
= control target key start
LH: loop header
LB: loop body
LE: loop exit
PB: predicated region body
PF: predicated region fallthrough
CT: control target
= control target key end

     0   :  { %s6658_s6 = smov 1   ;;  %s6659_s10 = smov 2   ;;  %s9115_s0 = inlined_call_operand.smem [shape: u32[34], index: -1, kind: input, shape index: {}] }
   0x1   :  { %s6706_s5 = sld [smem:[%s9115_s0]]   ;;  %s6660_s14 = smov 3  }
   0x2   :  { %s6711_s9 = sld [smem:[%s9115_s0 + %s6658_s6]]   ;;  %s6661_s18 = smov 4  }
   0x3   :  { %s6716_s13 = sld [smem:[%s9115_s0 + %s6659_s10]]   ;;  %s6662_s22 = smov 5  }
   0x4   :  { %s6721_s17 = sld [smem:[%s9115_s0 + %s6660_s14]]   ;;  %s6663_s26 = smov 6  }
   0x5   :  { %s6726_s21 = sld [smem:[%s9115_s0 + %s6661_s18]]   ;;  %s6664_s30 = smov 7  }
   0x6   :  { %s6731_s25 = sld [smem:[%s9115_s0 + %s6662_s22]]   ;;  %s6665_s4 = smov 8  }
   0x7   :  { %9135 = sst [smem:[#allocation12_spill]] %s6706_s5  ;;  %s6666_s10 = smov 9  }
   0x8   :  { %9136 = sst [smem:[#allocation13_spill]] %s6711_s9  ;;  %s6667_s15 = smov 10  }
   0x9   :  { %9137 = sst [smem:[#allocation14_spill]] %s6716_s13  ;;  %s6668_s20 = smov 11  }
   0xa   :  { %s6736_s29 = sld [smem:[%s9115_s0 + %s6663_s26]]   ;;  %s6669_s26 = smov 12  }
   0xb   :  { %s6741_s3 = sld [smem:[%s9115_s0 + %s6664_s30]]   ;;  %s6670_s1 = smov 13  }
   0xc   :  { %s6746_s8 = sld [smem:[%s9115_s0 + %s6665_s4]]   ;;  %s6671_s7 = smov 14  }
   0xd   :  { %s6751_s14 = sld [smem:[%s9115_s0 + %s6666_s10]]   ;;  %s6673_s22 = smov 16  }
   0xe   :  { %s6756_s19 = sld [smem:[%s9115_s0 + %s6667_s15]]   ;;  %s6672_s15 = smov 15  }
   0xf   :  { %s6761_s24 = sld [smem:[%s9115_s0 + %s6668_s20]]   ;;  %s6674_s28 = smov 17  }
  0x10   :  { %s6766_s30 = sld [smem:[%s9115_s0 + %s6669_s26]]   ;;  %s6689_s23 = smov 32  }
  0x11   :  { %9138 = sst [smem:[#allocation15_spill]] %s6741_s3 }
  0x12   :  { %9139 = sst [smem:[#allocation16_spill]] %s6746_s8  ;;  %s6690_s8 = smov 33  }
  0x13   :  { %9140 = sst [smem:[#allocation17_spill]] %s6751_s14 }
  0x14   :  { %9141 = sst [smem:[#allocation18_spill]] %s6756_s19 }
  0x15   :  { %s6771_s6 = sld [smem:[%s9115_s0 + %s6670_s1]]  }
  0x16   :  { %9142 = sst [smem:[#allocation19_spill]] %s6766_s30 }
  0x17   :  { %s6776_s12 = sld [smem:[%s9115_s0 + %s6671_s7]]   ;;  %s6675_s7 = smov 18  }
  0x18   :  { %s6781_s20 = sld [smem:[%s9115_s0 + %s6672_s15]]   ;;  %s6676_s15 = smov 19  }
  0x19   :  { %s6786_s27 = sld [smem:[%s9115_s0 + %s6673_s22]]   ;;  %s6677_s22 = smov 20  }
  0x1a   :  { %s6791_s4 = sld [smem:[%s9115_s0 + %s6674_s28]]   ;;  %s6678_s28 = smov 21  }
  0x1b   :  { %9143 = sst [smem:[#allocation20_spill]] %s6771_s6 }
  0x1c   :  { %s6801_s6 = sld [smem:[%s9115_s0 + %s6676_s15]]   ;;  %s6680_s15 = smov 23  }
  0x1d   :  { %9144 = sst [smem:[#allocation21_spill]] %s6776_s12 }
  0x1e   :  { %9145 = sst [smem:[#allocation22_spill]] %s6781_s20 }
  0x1f   :  { %9146 = sst [smem:[#allocation23_spill]] %s6786_s27 }
  0x20   :  { %9147 = sst [smem:[#allocation24_spill]] %s6791_s4 }
  0x21   :  { %s6796_s12 = sld [smem:[%s9115_s0 + %s6675_s7]]   ;;  %s6679_s7 = smov 22  }
  0x22   :  { %9149 = sst [smem:[#allocation26_spill]] %s6801_s6 }
  0x23   :  { %s6806_s27 = sld [smem:[%s9115_s0 + %s6677_s22]]   ;;  %s6681_s22 = smov 24  }
  0x24   :  { %s6811_s4 = sld [smem:[%s9115_s0 + %s6678_s28]]   ;;  %s6682_s28 = smov 25  }
  0x25   :  { %s6821_s6 = sld [smem:[%s9115_s0 + %s6680_s15]]   ;;  %s6684_s15 = smov 27  }
  0x26   :  { %s6831_s20 = sld [smem:[%s9115_s0 + %s6682_s28]]   ;;  %s6686_s28 = smov 29  }
  0x27   :  { %9148 = sst [smem:[#allocation25_spill]] %s6796_s12 }
  0x28   :  { %s6816_s12 = sld [smem:[%s9115_s0 + %s6679_s7]]   ;;  %s6683_s7 = smov 26  }
  0x29   :  { %9150 = sst [smem:[#allocation27_spill]] %s6806_s27 }
  0x2a   :  { %9151 = sst [smem:[#allocation28_spill]] %s6811_s4 }
  0x2b   :  { %9153 = sst [smem:[#allocation30_spill]] %s6821_s6 }
  0x2c   :  { %s6826_s27 = sld [smem:[%s9115_s0 + %s6681_s22]]   ;;  %s6685_s22 = smov 28  }
  0x2d   :  { %9154 = sst [smem:[#allocation31_spill]] %s6831_s20 }
  0x2e   :  { %9152 = sst [smem:[#allocation29_spill]] %s6816_s12 }
  0x2f   :  { %s6836_s30 = sld [smem:[%s9115_s0 + %s6683_s7]]   ;;  %s6687_s7 = smov 30  }
  0x30   :  { %s6841_s19 = sld [smem:[%s9115_s0 + %s6684_s15]]   ;;  %s6688_s15 = smov 31  }
  0x31   :  { %s6846_s14 = sld [smem:[%s9115_s0 + %s6685_s22]]  }
  0x32   :  { %s6851_s20 = sld [smem:[%s9115_s0 + %s6686_s28]]  }
  0x33   :  { %s6867_s2 = sld [smem:[%s9115_s0 + %s6690_s8]]  }
  0x35   :  { %9155 = sst [smem:[#allocation32_spill]] %s6836_s30 }
  0x36   :  { %9156 = sst [smem:[#allocation33_spill]] %s6841_s19 }
  0x37   :  { %9157 = sst [smem:[#allocation34_spill]] %s6846_s14 }
  0x38   :  { %s6856_s30 = sld [smem:[%s9115_s0 + %s6687_s7]]  }
  0x39   :  { %s5824_s19 = sld [smem:[%s9115_s0 + %s6688_s15]]  }
  0x3a   :  { %s5825_s14 = sld [smem:[%s9115_s0 + %s6689_s23]]  }
  0x3f   :  { %72 = sst [smem:[#allocation7]] %s5824_s19 }
  0x40   :  { %73 = sst [smem:[#allocation8]] %s5825_s14 }
  0x41   :  { %74 = vsyncpa [#allocation10], 0 }
  0x42   :  { %76 = vsyncpa [#allocation10 + $0x1], 0  ;;  %s6869_s7 = smov 0   ;;  %s6871_s10 = smov 0  }
  0x43   :  { %s6873_s11 = smov 0   ;;  %s6875_s15 = smov 0  }
  0x44 LB: > { %s9158_s13 = sld [smem:[#allocation14_spill]]  ;;  %s9159_s12 = sld [smem:[#allocation29_spill]]  ;;  %s6648_s10 = sphi %s6871_s10, %s9184_s10   ;;  %s6644_s7 = sphi %s6869_s7, %s9183_s7   ;;  %s6656_s15 = sphi %s6875_s15, %s9186_s15   ;;  %s6652_s11 = sphi %s6873_s11, %s9185_s11  }
  0x45   : > { %s9160_s9 = sld [smem:[#allocation13_spill]]  ;;  %s9161_s6 = sld [smem:[#allocation30_spill]] }
  0x46   : > { %s9162_s4 = sld [smem:[#allocation28_spill]]  ;;  %s9163_s3 = sld [smem:[#allocation15_spill]] }
  0x47   : > { %s6890_s0 = sadd.s32 4294967295, %s6656_s15   ;;  %s5828_s8 = sadd.s32 4294967294, %s6656_s15  }
  0x48   : > { %s6894_s14 = sadd.s32 1, %s6656_s15   ;;  %s787_s19 = sadd.s32 1, %s6652_s11 }
  0x49   : > { %s784_s16 = ssub.s32 %s6656_s15, %s6894_s14  ;;  %p797_p0 = scmp.ne.s32.totalorder %s6652_s11, %s6648_s10 }
  0x4a   : > { %p785_p1 = scmp.eq.s32.totalorder %s784_s16, 0  ;;  %p798_p2 = scmp.eq.s32.totalorder %s6890_s0, 1 }
  0x4b   : > { %p803_p3 = scmp.ne.s32.totalorder %s6648_s10, %s6644_s7  ;;  %p804_p4 = scmp.eq.s32.totalorder %s5828_s8, 1 }
  0x4c   : > { %s6905_s18 = scalar_select %p785_p1, %s6652_s11, %s787_s19  }
  0x4d   : > { %p6907_p5 = por %p798_p2, %p797_p0  ;;  %p6911_p6 = por %p804_p4, %p803_p3 }
  0x4e   : > { %p5831_p7 = scmp.ge.s32.totalorder %s6656_s15, 1  ;;  %p926_p8 = scmp.lt.s32.totalorder %s6656_s15, 3 }
  0x50   : > { %p927_p9 = pnand %p5831_p7, %p926_p8 }
  0x51   : > { %v1516_v0 = vld [vmem:[%s9162_s4 + $0x10] sm:$0xff] (!%p927_p9)  ;;  %v1514_v1 = vld [vmem:[%s9162_s4] sm:$0xff] (!%p927_p9)  ;;  %p1010_p10 = scmp.lt.s32.totalorder (!%p927_p9), %s6890_s0, 1  ;;  %v6691_v2 = vmov (!%p927_p9), 0   ;;  %v6692_v3 = vmov (!%p927_p9), 0.0   ;;  %s9166_s5 = sld [smem:[#allocation12_spill]] (!%p927_p9)  ;;  %v1017_v6 = vlaneseq (!%p927_p9) }
  0x52   : > { %930 = sbr.rel (%p927_p9) target bundleno = 2981 (0xba5), region = 152  ;;  %6527 = vset.pattern.permute.xlu1 (!%p927_p9), %v6691_v2  ;;  %6526 = vset.pattern.permute.xlu0 (!%p927_p9), %v6691_v2  ;;  %3539 = vst [vmem:[#allocation3] sm:$0xff] (!%p927_p9), %v6692_v3  ;;  %3540 = vst [vmem:[#allocation3 + $0x8] sm:$0xff] (!%p927_p9), %v6692_v3  ;;  %vm1473_vm0 = vcmask (!%p927_p9), 31744   ;;  %v1517_v4 = vld [vmem:[%s9162_s4 + $0x18] sm:$0xff] (!%p927_p9)  ;;  %v1515_v5 = vld [vmem:[%s9162_s4 + $0x8] sm:$0xff] (!%p927_p9) }
  0x53   : > { %3541 = vst [vmem:[#allocation3 + $0x50] sm:$0xff] (!%p927_p9), %v6692_v3  ;;  %3542 = vst [vmem:[#allocation3 + $0x58] sm:$0xff] (!%p927_p9), %v6692_v3  ;;  %1623 = vperm.xlu1 (!%p927_p9), %6527, %v1516_v0   ;;  %1613 = vperm.xlu0 (!%p927_p9), %6526, %v1514_v1   ;;  %v5900_v9 = vld [vmem:[%s9162_s4 + $0x108] sm:$0xff] (!%p927_p9)  ;;  %v5899_v10 = vld [vmem:[%s9162_s4 + $0x100] sm:$0xff] (!%p927_p9)  ;;  %v6948_v11 = vshrl.u32 (!%p927_p9), %v1017_v6, 7  ;;  %v6950_v12 = vand.u32 (!%p927_p9), 127, %v1017_v6 }
  0x54   : > { %1474 = vst.msk [vmem:[#allocation2] sm:$0xff] (!%p927_p9), %vm1473_vm0, %v6692_v3  ;;  %1475 = vst.msk [vmem:[#allocation2 + $0x8] sm:$0xff] (!%p927_p9), %vm1473_vm0, %v6692_v3  ;;  %1312 = vmatprep.mubr.f32.mxu0 (!%p927_p9), %v6692_v3  ;;  %v5902_v13 = vld [vmem:[%s9162_s4 + $0x118] sm:$0xff] (!%p927_p9)  ;;  %v5901_v15 = vld [vmem:[%s9162_s4 + $0x110] sm:$0xff] (!%p927_p9)  ;;  %v6693_v16 = vmov (!%p927_p9), 1.0   ;;  %s9167_s8 = sld [smem:[#allocation16_spill]] (!%p927_p9) }
  0x55   : > { %1476 = vst.msk [vmem:[#allocation2 + $0x10] sm:$0xff] (!%p927_p9), %vm1473_vm0, %v6692_v3  ;;  %1477 = vst.msk [vmem:[#allocation2 + $0x118] sm:$0xff] (!%p927_p9), %vm1473_vm0, %v6692_v3  ;;  %vm1053_vm1 = vcmp.eq.s32.totalorder (!%p927_p9), %v6948_v11, %v6950_v12  ;;  %v1019_v14 = vadd.s32 (!%p927_p9), 8, %v6948_v11  ;;  %v1519_v17 = vld [vmem:[%s9162_s4 + $0x28] sm:$0xff] (!%p927_p9)  ;;  %v1020_v18 = vadd.s32 (!%p927_p9), 16, %v6948_v11  ;;  %v1518_v19 = vld [vmem:[%s9162_s4 + $0x20] sm:$0xff] (!%p927_p9) }
  0x56   : > { %1478 = vst.msk [vmem:[#allocation2 + $0x120] sm:$0xff] (!%p927_p9), %vm1473_vm0, %v6692_v3  ;;  %1479 = vst.msk [vmem:[#allocation2 + $0x128] sm:$0xff] (!%p927_p9), %vm1473_vm0, %v6692_v3  ;;  %v1521_v20 = vld [vmem:[%s9162_s4 + $0x38] sm:$0xff] (!%p927_p9)  ;;  %v1021_v21 = vadd.s32 (!%p927_p9), 24, %v6948_v11  ;;  %v1520_v22 = vld [vmem:[%s9162_s4 + $0x30] sm:$0xff] (!%p927_p9)  ;;  %v1022_v24 = vadd.s32 (!%p927_p9), 32, %v6948_v11 }
  0x57   : > { %1628 = vperm.xlu1 (!%p927_p9), %6527, %v1517_v4   ;;  %1618 = vperm.xlu0 (!%p927_p9), %6526, %v1515_v5   ;;  %vm1055_vm2 = vcmp.eq.s32.totalorder (!%p927_p9), %v1019_v14, %v6950_v12  ;;  %vm1057_vm3 = vcmp.eq.s32.totalorder (!%p927_p9), %v1020_v18, %v6950_v12  ;;  %v5904_v23 = vld [vmem:[%s9162_s4 + $0x128] sm:$0xff] (!%p927_p9)  ;;  %v5903_v25 = vld [vmem:[%s9162_s4 + $0x120] sm:$0xff] (!%p927_p9)  ;;  %v5906_v26 = vld [vmem:[%s9162_s4 + $0x138] sm:$0xff] (!%p927_p9)  ;;  %v1023_v27 = vadd.s32 (!%p927_p9), 40, %v6948_v11  ;;  %v1024_v31 = vadd.s32 (!%p927_p9), 48, %v6948_v11  ;;  %s9168_s19 = sld [smem:[#allocation17_spill]] (!%p927_p9) }
  0x58   : > { %vm1059_vm4 = vcmp.eq.s32.totalorder (!%p927_p9), %v1021_v21, %v6950_v12  ;;  %vm1061_vm5 = vcmp.eq.s32.totalorder (!%p927_p9), %v1022_v24, %v6950_v12  ;;  %v5905_v28 = vld [vmem:[%s9162_s4 + $0x130] sm:$0xff] (!%p927_p9)  ;;  %v1523_v29 = vld [vmem:[%s9162_s4 + $0x48] sm:$0xff] (!%p927_p9)  ;;  %v1522_v30 = vld [vmem:[%s9162_s4 + $0x40] sm:$0xff] (!%p927_p9)  ;;  %v1025_v32 = vadd.s32 (!%p927_p9), 56, %v6948_v11  ;;  %v1026_v33 = vadd.s32 (!%p927_p9), 64, %v6948_v11  ;;  %s9169_s16 = sld [smem:[#allocation18_spill]] (!%p927_p9) }
  0x59   : > { %s1011_s26 = scalar_select %p1010_p10, %s6890_s0, 1  ;;  %vm1063_vm6 = vcmp.eq.s32.totalorder %v1023_v27, %v6950_v12  ;;  %v1525_v34 = vld [vmem:[%s9162_s4 + $0x58] sm:$0xff]  ;;  %v1524_v35 = vld [vmem:[%s9162_s4 + $0x50] sm:$0xff]  ;;  %vm1065_vm7 = vcmp.eq.s32.totalorder %v1024_v31, %v6950_v12  ;;  %v5908_v36 = vld [vmem:[%s9162_s4 + $0x148] sm:$0xff]  ;;  %v1027_v40 = vadd.s32 72, %v6948_v11  ;;  %v1028_v43 = vadd.s32 80, %v6948_v11 }
  0x5a   : > { %v5907_v37 = vld [vmem:[%s9162_s4 + $0x140] sm:$0xff]  ;;  %vm1067_vm8 = vcmp.eq.s32.totalorder %v1025_v32, %v6950_v12  ;;  %v5910_v38 = vld [vmem:[%s9162_s4 + $0x158] sm:$0xff]  ;;  %v5909_v39 = vld [vmem:[%s9162_s4 + $0x150] sm:$0xff]  ;;  %vm1069_vm9 = vcmp.eq.s32.totalorder %v1026_v33, %v6950_v12  ;;  %v1029_v44 = vadd.s32 88, %v6948_v11  ;;  %v1030_v45 = vadd.s32 96, %v6948_v11 }
  0x5b   : > { %s6084_s1 = sshll.u32 %s1011_s26, 3  ;;  %2010 = vperm.xlu1 %6527, %v5900_v9   ;;  %2005 = vperm.xlu0 %6526, %v5899_v10   ;;  %v1527_v41 = vld [vmem:[%s9162_s4 + $0x68] sm:$0xff]  ;;  %v1526_v42 = vld [vmem:[%s9162_s4 + $0x60] sm:$0xff]  ;;  %vm1071_vm10 = vcmp.eq.s32.totalorder %v1027_v40, %v6950_v12  ;;  %v1529_v46 = vld [vmem:[%s9162_s4 + $0x78] sm:$0xff]  ;;  %vm1073_vm11 = vcmp.eq.s32.totalorder %v1028_v43, %v6950_v12  ;;  %v1031_v51 = vadd.s32 104, %v6948_v11  ;;  %v1032_v54 = vadd.s32 112, %v6948_v11 }
  0x5c   : > { %s6943_s28 = scalar_lea.vmem %s9166_s5, %s6084_s1  ;;  %v1528_v47 = vld [vmem:[%s9162_s4 + $0x70] sm:$0xff]  ;;  %v5912_v48 = vld [vmem:[%s9162_s4 + $0x168] sm:$0xff]  ;;  %v5911_v49 = vld [vmem:[%s9162_s4 + $0x160] sm:$0xff]  ;;  %vm1075_vm12 = vcmp.eq.s32.totalorder %v1029_v44, %v6950_v12  ;;  %vm1077_vm13 = vcmp.eq.s32.totalorder %v1030_v45, %v6950_v12  ;;  %v1033_v57 = vadd.s32 120, %v6948_v11  ;;  %v1034_v59 = vadd.s32 128, %v6948_v11  ;;  %s9170_s26 = sld [smem:[#allocation31_spill]] }
  0x5d   : > { %v1016_v7 = vld [vmem:[%s6943_s28] sm:$0xff]  ;;  %v5914_v50 = vld [vmem:[%s9162_s4 + $0x178] sm:$0xff]  ;;  %v5913_v52 = vld [vmem:[%s9162_s4 + $0x170] sm:$0xff]  ;;  %vm1079_vm14 = vcmp.eq.s32.totalorder %v1031_v51, %v6950_v12  ;;  %vm1081_vm15 = vcmp.eq.s32.totalorder %v1032_v54, %v6950_v12  ;;  %v7043_v60 = vadd.s32 128, %v6950_v12  ;;  %v1035_v63 = vadd.s32 136, %v6948_v11  ;;  %s9171_s1 = sld [smem:[#allocation19_spill]] }
  0x5e   : > { %v1246_v8 = vcombine.high %v1016_v7, %v1016_v7  ;;  %v1531_v53 = vld [vmem:[%s9162_s4 + $0x88] sm:$0xff]  ;;  %v1530_v55 = vld [vmem:[%s9162_s4 + $0x80] sm:$0xff]  ;;  %v1533_v56 = vld [vmem:[%s9162_s4 + $0x98] sm:$0xff]  ;;  %v1036_v4 = vadd.s32 144, %v6948_v11  ;;  %v1038_v10 = vadd.s32 160, %v6948_v11  ;;  %v1039_v14 = vadd.s32 168, %v6948_v11 }
  0x5f   : > { %2020 = vperm.xlu1 %6527, %v5902_v13   ;;  %2015 = vperm.xlu0 %6526, %v5901_v15   ;;  %v1532_v58 = vld [vmem:[%s9162_s4 + $0x90] sm:$0xff]  ;;  %v5916_v61 = vld [vmem:[%s9162_s4 + $0x188] sm:$0xff]  ;;  %v5915_v62 = vld [vmem:[%s9162_s4 + $0x180] sm:$0xff]  ;;  %v1040_v18 = vadd.s32 176, %v6948_v11  ;;  %v1041_v21 = vadd.s32 184, %v6948_v11  ;;  %v1042_v24 = vadd.s32 192, %v6948_v11 }
  0x60   : > { %1248 = vmatprep.subr.mxu0 %v1246_v8  ;;  %v5918_v0 = vld [vmem:[%s9162_s4 + $0x198] sm:$0xff]  ;;  %v5917_v1 = vld [vmem:[%s9162_s4 + $0x190] sm:$0xff]  ;;  %v1535_v5 = vld [vmem:[%s9162_s4 + $0xa8] sm:$0xff]  ;;  %v1043_v27 = vadd.s32 200, %v6948_v11  ;;  %v1045_v33 = vadd.s32 216, %v6948_v11  ;;  %v1049_v45 = vadd.s32 248, %v6948_v11 }
  0x61   : > { %1249 = vmatpush1.xpose.msra.mxu0 %v1016_v7  ;;  %v1534_v6 = vld [vmem:[%s9162_s4 + $0xa0] sm:$0xff]  ;;  %v1037_v7 = vadd.s32 152, %v6948_v11  ;;  %v1537_v8 = vld [vmem:[%s9162_s4 + $0xb8] sm:$0xff]  ;;  %v1536_v9 = vld [vmem:[%s9162_s4 + $0xb0] sm:$0xff] }
  0x62   : > { %v5919_v13 = vld [vmem:[%s9162_s4 + $0x1a0] sm:$0xff]  ;;  %v5922_v15 = vld [vmem:[%s9162_s4 + $0x1b8] sm:$0xff]  ;;  %v1543_v31 = vld [vmem:[%s9162_s4 + $0xe8] sm:$0xff] }
  0x63   : > { %1638 = vperm.xlu1 %6527, %v1519_v17   ;;  %1633 = vperm.xlu0 %6526, %v1518_v19   ;;  %v5921_v17 = vld [vmem:[%s9162_s4 + $0x1b0] sm:$0xff]  ;;  %v1539_v19 = vld [vmem:[%s9162_s4 + $0xc8] sm:$0xff]  ;;  %v1542_v32 = vld [vmem:[%s9162_s4 + $0xe0] sm:$0xff] }
  0x64   : > { %5867 = vmatmul.mubr.msk.f32.vlgmr.msra.gmra.mrb[0].mxu0 %vm1053_vm1, %v6693_v16  ;;  %vm1083_vm1 = vcmp.eq.s32.totalorder %v1033_v57, %v6950_v12  ;;  %v5920_v12 = vld [vmem:[%s9162_s4 + $0x1a8] sm:$0xff]  ;;  %v5930_v40 = vld [vmem:[%s9162_s4 + $0x1f8] sm:$0xff]  ;;  %v3553_v44 = vld [vmem:[%s9159_s12] sm:$0xff] }
  0x65   : > { %1317 = vmatprep.mubr.f32.mxu0 %v6692_v3  ;;  %v3554_v43 = vld [vmem:[%s9159_s12 + $0x8] sm:$0xff]  ;;  %v3557_v54 = vld [vmem:[%s9159_s12 + $0x20] sm:$0xff] }
  0x66   : > { %v5987_v57 = vld [vmem:[%s9159_s12 + $0x68] sm:$0xff] }
  0x67   : > { %1648 = vperm.xlu1 %6527, %v1521_v20   ;;  %1643 = vperm.xlu0 %6526, %v1520_v22   ;;  %v1538_v20 = vld [vmem:[%s9162_s4 + $0xc0] sm:$0xff]  ;;  %v1541_v22 = vld [vmem:[%s9162_s4 + $0xd8] sm:$0xff] }
  0x68   : > { %5868 = vmatmul.mubr.msk.f32.gmra.mrb[2].mxu0 %vm1055_vm2, %v6693_v16  ;;  %vm1086_vm2 = vcmp.eq.s32.totalorder %v1034_v59, %v7043_v60  ;;  %v5989_v59 = vld [vmem:[%s9159_s12 + $0x78] sm:$0xff] }
  0x69   : > { %1322 = vmatprep.mubr.f32.mxu0 %v6692_v3 }
  0x6b   : > { %2030 = vperm.xlu1 %6527, %v5904_v23   ;;  %2025 = vperm.xlu0 %6526, %v5903_v25   ;;  %v1540_v23 = vld [vmem:[%s9162_s4 + $0xd0] sm:$0xff]  ;;  %v5924_v25 = vld [vmem:[%s9162_s4 + $0x1c8] sm:$0xff] }
  0x6c   : > { %5869 = vmatmul.mubr.msk.f32.gmra.mrb[4].mxu0 %vm1057_vm3, %v6693_v16  ;;  %vm1088_vm3 = vcmp.eq.s32.totalorder %v1035_v63, %v7043_v60 }
  0x6d   : > { %1327 = vmatprep.mubr.f32.mxu0 %v6692_v3 }
  0x6f   : > { %2040 = vperm.xlu1 %6527, %v5906_v26   ;;  %2035 = vperm.xlu0 %6526, %v5905_v28   ;;  %v5923_v26 = vld [vmem:[%s9162_s4 + $0x1c0] sm:$0xff]  ;;  %v5926_v28 = vld [vmem:[%s9162_s4 + $0x1d8] sm:$0xff] }
  0x70   : > { %5870 = vmatmul.mubr.msk.f32.gmra.mrb[6].mxu0 %vm1059_vm4, %v6693_v16  ;;  %vm1090_vm4 = vcmp.eq.s32.totalorder %v1036_v4, %v7043_v60 }
  0x71   : > { %1332 = vmatprep.mubr.f32.mxu0 %v6692_v3 }
  0x73   : > { %1658 = vperm.xlu1 %6527, %v1523_v29   ;;  %1653 = vperm.xlu0 %6526, %v1522_v30   ;;  %v5925_v29 = vld [vmem:[%s9162_s4 + $0x1d0] sm:$0xff]  ;;  %v1044_v30 = vadd.s32 208, %v6948_v11 }
  0x74   : > { %5871 = vmatmul.mubr.msk.f32.gmra.mrb[8].mxu0 %vm1061_vm5, %v6693_v16  ;;  %vm1092_vm5 = vcmp.eq.s32.totalorder %v1037_v7, %v7043_v60 }
  0x75   : > { %1337 = vmatprep.mubr.f32.mxu0 %v6692_v3 }
  0x77   : > { %1668 = vperm.xlu1 %6527, %v1525_v34   ;;  %1663 = vperm.xlu0 %6526, %v1524_v35   ;;  %v1545_v34 = vld [vmem:[%s9162_s4 + $0xf8] sm:$0xff]  ;;  %v1544_v35 = vld [vmem:[%s9162_s4 + $0xf0] sm:$0xff] }
  0x78   : > { %5872 = vmatmul.mubr.msk.f32.gmra.mrb[10].mxu0 %vm1063_vm6, %v6693_v16  ;;  %vm1094_vm6 = vcmp.eq.s32.totalorder %v1038_v10, %v7043_v60  ;;  %v7188_v10 = vld [vmem:[%s9160_s9] sm:$0xff] }
  0x79   : > { %1342 = vmatprep.mubr.f32.mxu0 %v6692_v3 }
  0x7b   : > { %2050 = vperm.xlu1 %6527, %v5908_v36   ;;  %2045 = vperm.xlu0 %6526, %v5907_v37   ;;  %v1046_v36 = vadd.s32 224, %v6948_v11  ;;  %v5928_v37 = vld [vmem:[%s9162_s4 + $0x1e8] sm:$0xff] }
  0x7c   : > { %5873 = vmatmul.mubr.msk.f32.gmra.mrb[12].mxu0 %vm1065_vm7, %v6693_v16  ;;  %vm1096_vm7 = vcmp.eq.s32.totalorder %v1039_v14, %v7043_v60 }
  0x7d   : > { %1347 = vmatprep.mubr.f32.mxu0 %v6692_v3 }
  0x7f   : > { %2060 = vperm.xlu1 %6527, %v5910_v38   ;;  %2055 = vperm.xlu0 %6526, %v5909_v39   ;;  %v5927_v38 = vld [vmem:[%s9162_s4 + $0x1e0] sm:$0xff]  ;;  %v1047_v39 = vadd.s32 232, %v6948_v11 }
  0x80   : > { %5874 = vmatmul.mubr.msk.f32.gmra.mrb[14].mxu0 %vm1067_vm8, %v6693_v16  ;;  %vm1098_vm8 = vcmp.eq.s32.totalorder %v1040_v18, %v7043_v60  ;;  %v1871_v18 = vld [vmem:[#allocation2 + $0x8] sm:$0xff] }
  0x81   : > { %1352 = vmatprep.mubr.f32.mxu0 %v6692_v3 }
  0x83   : > { %1678 = vperm.xlu1 %6527, %v1527_v41   ;;  %1673 = vperm.xlu0 %6526, %v1526_v42   ;;  %v5929_v41 = vld [vmem:[%s9162_s4 + $0x1f0] sm:$0xff]  ;;  %v1048_v42 = vadd.s32 240, %v6948_v11  ;;  %s9176_s4 = sld [smem:[#allocation23_spill]] }
  0x84   : > { %5875 = vmatmul.mubr.msk.f32.gmra.mrb[16].mxu0 %vm1069_vm9, %v6693_v16  ;;  %vm1100_vm9 = vcmp.eq.s32.totalorder %v1041_v21, %v7043_v60  ;;  %v1580_v21 = vld [vmem:[#allocation2 + $0xf] sm:$0xff] }
  0x85   : > { %1357 = vmatprep.mubr.f32.mxu0 %v6692_v3 }
  0x87   : > { %1688 = vperm.xlu1 %6527, %v1529_v46   ;;  %1683 = vperm.xlu0 %6526, %v1528_v47   ;;  %v3556_v46 = vld [vmem:[%s9159_s12 + $0x18] sm:$0xff]  ;;  %v3555_v47 = vld [vmem:[%s9159_s12 + $0x10] sm:$0xff] }
  0x88   : > { %5876 = vmatmul.mubr.msk.f32.gmra.mrb[18].mxu0 %vm1071_vm10, %v6693_v16  ;;  %vm1102_vm10 = vcmp.eq.s32.totalorder %v1042_v24, %v7043_v60 }
  0x89   : > { %1362 = vmatprep.mubr.f32.mxu0 %v6692_v3 }
  0x8b   : > { %2070 = vperm.xlu1 %6527, %v5912_v48   ;;  %2065 = vperm.xlu0 %6526, %v5911_v49   ;;  %v5983_v48 = vld [vmem:[%s9159_s12 + $0x48] sm:$0xff]  ;;  %v2956_v49 = vld [vmem:[%s6721_s17] sm:$0x3] }
  0x8c   : > { %5877 = vmatmul.mubr.msk.f32.gmra.mrb[20].mxu0 %vm1073_vm11, %v6693_v16  ;;  %vm1104_vm11 = vcmp.eq.s32.totalorder %v1043_v27, %v7043_v60  ;;  %v7211_v27 = vsub.s32 3, %v6948_v11 }
  0x8d   : > { %1367 = vmatprep.mubr.f32.mxu0 %v6692_v3 }
  0x8f   : > { %2080 = vperm.xlu1 %6527, %v5914_v50   ;;  %2075 = vperm.xlu0 %6526, %v5913_v52   ;;  %v5982_v50 = vld [vmem:[%s9159_s12 + $0x40] sm:$0xff]  ;;  %v5985_v52 = vld [vmem:[%s9159_s12 + $0x58] sm:$0xff] }
  0x90   : > { %5878 = vmatmul.mubr.msk.f32.gmra.mrb[22].mxu0 %vm1075_vm12, %v6693_v16  ;;  %vm1106_vm12 = vcmp.eq.s32.totalorder %v1044_v30, %v7043_v60  ;;  %v1872_v30 = vld [vmem:[#allocation2 + $0x10] sm:$0xff] }
  0x91   : > { %1372 = vmatprep.mubr.f32.mxu0 %v6692_v3 }
  0x93   : > { %1698 = vperm.xlu1 %6527, %v1531_v53   ;;  %1693 = vperm.xlu0 %6526, %v1530_v55   ;;  %v5984_v53 = vld [vmem:[%s9159_s12 + $0x50] sm:$0xff]  ;;  %v3560_v55 = vld [vmem:[%s9159_s12 + $0x38] sm:$0xff] }
  0x94   : > { %5879 = vmatmul.mubr.msk.f32.gmra.mrb[24].mxu0 %vm1077_vm13, %v6693_v16  ;;  %vm1108_vm13 = vcmp.eq.s32.totalorder %v1045_v33, %v7043_v60 }
  0x95   : > { %1377 = vmatprep.mubr.f32.mxu0 %v6692_v3 }
  0x97   : > { %1708 = vperm.xlu1 %6527, %v1533_v56   ;;  %1703 = vperm.xlu0 %6526, %v1532_v58   ;;  %v3559_v56 = vld [vmem:[%s9159_s12 + $0x30] sm:$0xff]  ;;  %v5986_v58 = vld [vmem:[%s9159_s12 + $0x60] sm:$0xff] }
  0x98   : > { %5880 = vmatmul.mubr.msk.f32.gmra.mrb[26].mxu0 %vm1079_vm14, %v6693_v16  ;;  %vm1110_vm14 = vcmp.eq.s32.totalorder %v1046_v36, %v7043_v60 }
  0x99   : > { %1382 = vmatprep.mubr.f32.mxu0 %v6692_v3 }
  0x9b   : > { %2090 = vperm.xlu1 %6527, %v5916_v61   ;;  %2085 = vperm.xlu0 %6526, %v5915_v62   ;;  %v4826_v61 = vld [vmem:[%s9161_s6 + $0x8] sm:$0xff]  ;;  %v4825_v62 = vld [vmem:[%s9161_s6] sm:$0xff] }
  0x9c   : > { %5881 = vmatmul.mubr.msk.f32.gmra.mrb[28].mxu0 %vm1081_vm15, %v6693_v16  ;;  %vm1112_vm15 = vcmp.eq.s32.totalorder %v1047_v39, %v7043_v60 }
  0x9d   : > { %1387 = vmatprep.mubr.f32.mxu0 %v6692_v3 }
  0x9f   : > { %2100 = vperm.xlu1 %6527, %v5918_v0   ;;  %2095 = vperm.xlu0 %6526, %v5917_v1   ;;  %v6029_v0 = vld [vmem:[%s9161_s6 + $0x18] sm:$0xff]  ;;  %v6028_v1 = vld [vmem:[%s9161_s6 + $0x10] sm:$0xff] }
  0xa0   : > { %5882 = vmatmul.mubr.msk.f32.gmra.mrb[30].mxu0 %vm1083_vm1, %v6693_v16  ;;  %vm1114_vm1 = vcmp.eq.s32.totalorder %v1048_v42, %v7043_v60 }
  0xa1   : > { %5883 = vmatprep.mubr.msk.f32.mxu0 %vm1086_vm2, %v6693_v16  ;;  %vm1116_vm2 = vcmp.eq.s32.totalorder %v1049_v45, %v7043_v60  ;;  %v5988_v60 = vld [vmem:[%s9159_s12 + $0x70] sm:$0xff] }
  0xa3   : > { %1718 = vperm.xlu1 %6527, %v1535_v5   ;;  %1713 = vperm.xlu0 %6526, %v1534_v6  }
  0xa4   : > { %1393 = vmatmul.mubr.f32.gmra.mrb[32].mxu0 %v6692_v3 }
  0xa5   : > { %5884 = vmatprep.mubr.msk.f32.mxu0 %vm1088_vm3, %v6693_v16  ;;  %vm3012_vm3 = vcmask 1041408  }
  0xa6   : > { %6447 = vmatprep.subr.msk.bf16.mxu1 %vm3012_vm3, %v2956_v49  ;;  %v3014_v51 = vsel %vm3012_vm3, %v2956_v49, 0 }
  0xa7   : > { %1728 = vperm.xlu1 %6527, %v1537_v8   ;;  %1723 = vperm.xlu0 %6526, %v1536_v9   ;;  %v7182_v8 = vsub.s32 0, %v6948_v11  ;;  %v7185_v9 = vsub.s32 1, %v6948_v11 }
  0xa8   : > { %1398 = vmatmul.mubr.f32.gmra.mrb[34].mxu0 %v6692_v3  ;;  %6182 = vmatpush3.bf16.msra.mxu1 %v3014_v51 }
  0xa9   : > { %5885 = vmatprep.mubr.msk.f32.mxu0 %vm1090_vm4, %v6693_v16  ;;  %vm4092_vm4 = vcmask 785408   ;;  %v7193_v14 = vrot.slane %v7188_v10, %v7182_v8 }
  0xaa   : > { %4093 = vst.msk [vmem:[#allocation4] sm:$0xff] %vm4092_vm4, %v6692_v3  ;;  %4094 = vst.msk [vmem:[#allocation4 + $0x8] sm:$0xff] %vm4092_vm4, %v6692_v3 }
  0xab   : > { %2110 = vperm.xlu1 %6527, %v5920_v12   ;;  %2105 = vperm.xlu0 %6526, %v5919_v13   ;;  %4095 = vst.msk [vmem:[#allocation4 + $0x50] sm:$0xff] %vm4092_vm4, %v6692_v3  ;;  %4096 = vst.msk [vmem:[#allocation4 + $0x58] sm:$0xff] %vm4092_vm4, %v6692_v3  ;;  %v1579_v12 = vld [vmem:[#allocation2 + $0x7] sm:$0xff] }
  0xac   : > { %1403 = vmatmul.mubr.f32.gmra.mrb[36].mxu0 %v6692_v3 }
  0xad   : > { %5886 = vmatprep.mubr.msk.f32.mxu0 %vm1092_vm5, %v6693_v16  ;;  %vm4650_vm5 = vcmask 457728  }
  0xaf   : > { %2120 = vperm.xlu1 %6527, %v5922_v15   ;;  %2115 = vperm.xlu0 %6526, %v5921_v17   ;;  %v7197_v15 = vrot.slane %v7188_v10, %v7185_v9  ;;  %v7200_v17 = vsub.s32 2, %v6948_v11 }
  0xb0   : > { %1408 = vmatmul.mubr.f32.gmra.mrb[38].mxu0 %v6692_v3 }
  0xb1   : > { %5887 = vmatprep.mubr.msk.f32.mxu0 %vm1094_vm6, %v6693_v16  ;;  %v1907_v24 = vmul.f32 %v7197_v15, %v1871_v18  ;;  %vm4818_vm6 = vcmask 523264  }
  0xb3   : > { %1738 = vperm.xlu1 %6527, %v1539_v19   ;;  %1733 = vperm.xlu0 %6526, %v1538_v20   ;;  %v1971_v19 = vld [vmem:[#allocation2 + $0x9] sm:$0xff] }
  0xb4   : > { %1413 = vmatmul.mubr.f32.gmra.mrb[40].mxu0 %v6692_v3 }
  0xb5   : > { %5888 = vmatprep.mubr.msk.f32.mxu0 %vm1096_vm7, %v6693_v16  ;;  %vm6695_vm7 = vmmov 0  }
  0xb7   : > { %1748 = vperm.xlu1 %6527, %v1541_v22   ;;  %1743 = vperm.xlu0 %6526, %v1540_v23  }
  0xb8   : > { %1418 = vmatmul.mubr.f32.gmra.mrb[42].mxu0 %v6692_v3 }
  0xb9   : > { %5889 = vmatprep.mubr.msk.f32.mxu0 %vm1098_vm8, %v6693_v16  ;;  %vm5047_vm8 = vcmask 392192  }
  0xbb   : > { %2130 = vperm.xlu1 %6527, %v5924_v25   ;;  %2125 = vperm.xlu0 %6526, %v5923_v26   ;;  %v7208_v26 = vrot.slane %v7188_v10, %v7200_v17 }
  0xbc   : > { %1423 = vmatmul.mubr.f32.gmra.mrb[44].mxu0 %v6692_v3 }
  0xbd   : > { %5890 = vmatprep.mubr.msk.f32.mxu0 %vm1100_vm9, %v6693_v16  ;;  %vm5602_vm9 = vcmask 1043456  }
  0xbf   : > { %2140 = vperm.xlu1 %6527, %v5926_v28   ;;  %2135 = vperm.xlu0 %6526, %v5925_v29  }
  0xc0   : > { %1428 = vmatmul.mubr.f32.gmra.mrb[46].mxu0 %v6692_v3 }
  0xc1   : > { %5891 = vmatprep.mubr.msk.f32.mxu0 %vm1102_vm10, %v6693_v16  ;;  %vm5598_vm10 = vcmask 64512  }
  0xc3   : > { %1758 = vperm.xlu1 %6527, %v1543_v31   ;;  %1753 = vperm.xlu0 %6526, %v1542_v32  }
  0xc4   : > { %1433 = vmatmul.mubr.f32.gmra.mrb[48].mxu0 %v6692_v3 }
  0xc5   : > { %5892 = vmatprep.mubr.msk.f32.mxu0 %vm1104_vm11, %v6693_v16 }
  0xc7   : > { %1768 = vperm.xlu1 %6527, %v1545_v34   ;;  %1763 = vperm.xlu0 %6526, %v1544_v35   ;;  %v7218_v34 = vrot.slane %v7188_v10, %v7211_v27  ;;  %v7221_v35 = vsub.s32 4, %v6948_v11 }
  0xc8   : > { %1438 = vmatmul.mubr.f32.gmra.mrb[50].mxu0 %v6692_v3 }
  0xc9   : > { %5893 = vmatprep.mubr.msk.f32.mxu0 %vm1106_vm12, %v6693_v16  ;;  %v7238_v49 = vrot.slane %v7188_v10, %v7221_v35  ;;  %vm5706_vm12 = vcmask 125952  }
  0xcb   : > { %2150 = vperm.xlu1 %6527, %v5928_v37   ;;  %2145 = vperm.xlu0 %6526, %v5927_v38   ;;  %v1908_v37 = vmul.f32 %v7197_v15, %v1872_v30 }
  0xcc   : > { %1443 = vmatmul.mubr.f32.gmra.mrb[52].mxu0 %v6692_v3 }
  0xcd   : > { %5894 = vmatprep.mubr.msk.f32.mxu0 %vm1108_vm13, %v6693_v16 }
  0xcf   : > { %2160 = vperm.xlu1 %6527, %v5930_v40   ;;  %2155 = vperm.xlu0 %6526, %v5929_v41  }
  0xd0   : > { %1448 = vmatmul.mubr.f32.gmra.mrb[54].mxu0 %v6692_v3 }
  0xd1   : > { %5895 = vmatprep.mubr.msk.f32.mxu0 %vm1110_vm14, %v6693_v16 }
  0xd2   : > { %v7167_v63 = vpop.permute.xlu1 %1623 }
  0xd3   : > { %3585 = vperm.xlu1 %6527, %v3554_v43   ;;  %3580 = vperm.xlu0 %6526, %v3553_v44  }
  0xd4   : > { %1453 = vmatmul.mubr.f32.gmra.mrb[56].mxu0 %v6692_v3 }
  0xd5   : > { %5896 = vmatprep.mubr.msk.f32.mxu0 %vm1112_vm15, %v6693_v16 }
  0xd6   : > { %v7173_v4 = vpop.permute.xlu1 %1628 }
  0xd7   : > { %3595 = vperm.xlu1 %6527, %v3556_v46   ;;  %3590 = vperm.xlu0 %6526, %v3555_v47  }
  0xd8   : > { %1458 = vmatmul.mubr.f32.gmra.mrb[58].mxu0 %v6692_v3 }
  0xd9   : > { %5897 = vmatprep.mubr.msk.f32.mxu0 %vm1114_vm1, %v6693_v16 }
  0xda   : > { %v7177_v6 = vpop.permute.xlu1 %2010 }
  0xdb   : > { %3689 = vperm.xlu1 %6527, %v5983_v48   ;;  %3684 = vperm.xlu0 %6526, %v5982_v50  }
  0xdc   : > { %1463 = vmatmul.mubr.f32.gmra.mrb[60].mxu0 %v6692_v3 }
  0xdd   : > { %5898 = vmatprep.mubr.msk.f32.mxu0 %vm1116_vm2, %v6693_v16  ;;  %v3558_v16 = vld [vmem:[%s9159_s12 + $0x28] sm:$0xff] }
  0xdf   : > { %3699 = vperm.xlu1 %6527, %v5985_v52   ;;  %3694 = vperm.xlu0 %6526, %v5984_v53  }
  0xe0   : > { %1468 = vmatmul.mubr.f32.gmra.mrb[62].mxu0 %v6692_v3  ;;  %v7169_v3 = vpop.permute.xlu0 %1613 }
  0xe1   : > { %v1771_v13 = vmul.f32 %v7169_v3, %v1579_v12 }
  0xe3   : > { %3605 = vperm.xlu1 %6527, %v3558_v16   ;;  %3600 = vperm.xlu0 %6526, %v3557_v54   ;;  %v1807_v23 = vmul.f32 %v7193_v14, %v1771_v13 }
  0xe4   : > { %v7175_v5 = vpop.permute.xlu0 %1618 }
  0xe5   : > { %v1772_v28 = vmul.f32 %v7175_v5, %v1580_v21  ;;  %v1939_v32 = vadd.f32 %v1907_v24, %v1807_v23 }
  0xe7   : > { %3615 = vperm.xlu1 %6527, %v3560_v55   ;;  %3610 = vperm.xlu0 %6526, %v3559_v56   ;;  %v1808_v36 = vmul.f32 %v7193_v14, %v1772_v28 }
  0xe8   : > { %v7179_v7 = vpop.permute.xlu0 %2005 }
  0xe9   : > { %v2163_v25 = vmul.f32 %v7179_v7, %v1971_v19 }
  0xeb   : > { %3709 = vperm.xlu1 %6527, %v5987_v57   ;;  %3704 = vperm.xlu0 %6526, %v5986_v58   ;;  %v2199_v33 = vmul.f32 %v7208_v26, %v2163_v25 }
  0xec   : > { %v7240_v51 = vpop.permute.xlu0 %2015 }
  0xed   : > { %v2231_v45 = vadd.f32 %v2199_v33, %v1939_v32 }
  0xef   : > { %3719 = vperm.xlu1 %6527, %v5989_v59   ;;  %3714 = vperm.xlu0 %6526, %v5988_v60  }
  0xf3   : > { %4138 = vperm.xlu1 %6527, %v3554_v43   ;;  %4133 = vperm.xlu0 %6526, %v3553_v44   ;;  %v7229_v44 = vsub.s32 5, %v6948_v11 }
  0xf7   : > { %4148 = vperm.xlu1 %6527, %v3556_v46   ;;  %4143 = vperm.xlu0 %6526, %v3555_v47   ;;  %v7232_v46 = vsub.s32 6, %v6948_v11 }
  0xfb   : > { %4242 = vperm.xlu1 %6527, %v5983_v48   ;;  %4237 = vperm.xlu0 %6526, %v5982_v50   ;;  %v1940_v50 = vadd.f32 %v1908_v37, %v1808_v36 }
  0xff   : > { %4252 = vperm.xlu1 %6527, %v5985_v52   ;;  %4247 = vperm.xlu0 %6526, %v5984_v53  }
 0x103   : > { %4158 = vperm.xlu1 %6527, %v3558_v16   ;;  %4153 = vperm.xlu0 %6526, %v3557_v54  }
 0x107   : > { %4168 = vperm.xlu1 %6527, %v3560_v55   ;;  %4163 = vperm.xlu0 %6526, %v3559_v56  }
 0x10b   : > { %4262 = vperm.xlu1 %6527, %v5987_v57   ;;  %4257 = vperm.xlu0 %6526, %v5986_v58  }
 0x10f   : > { %4272 = vperm.xlu1 %6527, %v5989_v59   ;;  %4267 = vperm.xlu0 %6526, %v5988_v60   ;;  %v7248_v60 = vrot.slane %v7188_v10, %v7229_v44 }
 0x113   : > { %4839 = vperm.xlu1 %6527, %v4826_v61   ;;  %4834 = vperm.xlu0 %6526, %v4825_v62  }
 0x117   : > { %4871 = vperm.xlu1 %6527, %v6029_v0   ;;  %4866 = vperm.xlu0 %6526, %v6028_v1  }
 0x11b   : > { %5067 = vperm.xlu1 %6527, %v4826_v61   ;;  %5062 = vperm.xlu0 %6526, %v4825_v62   ;;  %v7252_v61 = vrot.slane %v7188_v10, %v7232_v46 }
 0x11f   : > { %5099 = vperm.xlu1 %6527, %v6029_v0   ;;  %5094 = vperm.xlu0 %6526, %v6028_v1   ;;  %v7256_v1 = vsub.s32 7, %v6948_v11 }
 0x137   : > { %v1314_v20 = vpop.f32.mrb[0].mxu0 }
 0x138   : > { %1480 = vst.msk [vmem:[#allocation2 + $0x18] sm:$0xff] %vm1473_vm0, %v1314_v20  ;;  %v1316_v22 = vpop.f32.mrb[1].mxu0  ;;  %v7262_v20 = vpop.permute.xlu1 %2020 }
 0x13b   : > { %v1319_v29 = vpop.f32.mrb[2].mxu0 }
 0x13c   : > { %1481 = vst.msk [vmem:[#allocation2 + $0x20] sm:$0xff] %vm1473_vm0, %v1319_v29  ;;  %v1321_v31 = vpop.f32.mrb[3].mxu0 }
 0x13f   : > { %v1324_v38 = vpop.f32.mrb[4].mxu0  ;;  %v1581_v39 = vld [vmem:[#allocation2 + $0x17] sm:$0xff] }
 0x140   : > { %v1972_v40 = vld [vmem:[#allocation2 + $0x11] sm:$0xff]  ;;  %1482 = vst.msk [vmem:[#allocation2 + $0x28] sm:$0xff] %vm1473_vm0, %v1324_v38  ;;  %v1326_v41 = vpop.f32.mrb[5].mxu0  ;;  %v2295_v43 = vmul.f32 %v7169_v3, %v1581_v39  ;;  %v1773_v47 = vmul.f32 %v7167_v63, %v1581_v39 }
 0x141   : > { %v2164_v42 = vmul.f32 %v7177_v6, %v1972_v40  ;;  %v1873_v16 = vld [vmem:[#allocation2 + $0x18] sm:$0xff] }
 0x142   : > { %v2331_v48 = vmul.f32 %v7218_v34, %v2295_v43  ;;  %v1809_v12 = vmul.f32 %v7193_v14, %v1773_v47  ;;  %v1909_v13 = vmul.f32 %v7197_v15, %v1873_v16  ;;  %v2431_v18 = vmul.f32 %v7238_v49, %v1873_v16 }
 0x143   : > { %v1329_v52 = vpop.f32.mrb[6].mxu0  ;;  %v1582_v53 = vld [vmem:[#allocation2 + $0x1f] sm:$0xff]  ;;  %v2200_v55 = vmul.f32 %v7208_v26, %v2164_v42 }
 0x144   : > { %v1973_v54 = vld [vmem:[#allocation2 + $0x19] sm:$0xff]  ;;  %1483 = vst.msk [vmem:[#allocation2 + $0x30] sm:$0xff] %vm1473_vm0, %v1329_v52  ;;  %v1331_v56 = vpop.f32.mrb[7].mxu0  ;;  %v1774_v57 = vmul.f32 %v7173_v4, %v1582_v53  ;;  %v2296_v62 = vmul.f32 %v7175_v5, %v1582_v53  ;;  %v2363_v0 = vadd.f32 %v2331_v48, %v2231_v45  ;;  %v1941_v41 = vadd.f32 %v1909_v13, %v1809_v12  ;;  %v7302_v13 = vld [vmem:[%s9160_s9 + $0x8] ss:$0 sm:$0xff] }
 0x145   : > { %v1874_v58 = vld [vmem:[#allocation2 + $0x20] sm:$0xff]  ;;  %v2165_v59 = vmul.f32 %v7240_v51, %v1973_v54  ;;  %v2527_v19 = vmul.f32 %v7179_v7, %v1973_v54  ;;  %v2232_v25 = vadd.f32 %v2200_v55, %v1940_v50  ;;  %v7290_v55 = vrot.slane %v7188_v10, %v7256_v1  ;;  %v7292_v56 = vpop.permute.xlu0 %1633 }
 0x146   : > { %v1810_v22 = vmul.f32 %v7193_v14, %v1774_v57  ;;  %v1910_v23 = vmul.f32 %v7197_v15, %v1874_v58  ;;  %v2332_v29 = vmul.f32 %v7218_v34, %v2296_v62  ;;  %v2432_v36 = vmul.f32 %v7238_v49, %v1874_v58 }
 0x147   : > { %v1334_v21 = vpop.f32.mrb[8].mxu0  ;;  %v1974_v24 = vld [vmem:[#allocation2 + $0x21] sm:$0xff]  ;;  %v2201_v32 = vmul.f32 %v7208_v26, %v2165_v59  ;;  %v2463_v38 = vadd.f32 %v2431_v18, %v2363_v0  ;;  %v2563_v40 = vmul.f32 %v7248_v60, %v2527_v19 }
 0x148   : > { %v7266_v28 = vld [vmem:[#allocation2 + $0x27] sm:$0xff]  ;;  %1484 = vst.msk [vmem:[#allocation2 + $0x38] sm:$0xff] %vm1473_vm0, %v1334_v21  ;;  %v1336_v30 = vpop.f32.mrb[9].mxu0  ;;  %v2166_v31 = vmul.f32 %v7262_v20, %v1974_v24  ;;  %v2364_v37 = vadd.f32 %v2332_v29, %v2232_v25  ;;  %v2528_v39 = vmul.f32 %v7177_v6, %v1974_v24  ;;  %v1942_v50 = vadd.f32 %v1910_v23, %v1810_v22  ;;  %v7310_v23 = vpop.permute.xlu1 %1638 }
 0x149   : > { %v2297_v33 = vmul.f32 %v7266_v28, %v7167_v63  ;;  %v7279_v45 = vld [vmem:[#allocation2 + $0x28] sm:$0xff]  ;;  %v2629_v47 = vmul.f32 %v7266_v28, %v7169_v3  ;;  %v2233_v3 = vadd.f32 %v2201_v32, %v1941_v41  ;;  %v2595_v0 = vadd.f32 %v2563_v40, %v2463_v38 }
 0x14a   : > { %v2202_v42 = vmul.f32 %v7208_v26, %v2166_v31  ;;  %v2464_v53 = vadd.f32 %v2432_v36, %v2364_v37  ;;  %v2564_v54 = vmul.f32 %v7248_v60, %v2528_v39  ;;  %v2433_v62 = vmul.f32 %v7238_v49, %v7279_v45 }
 0x14b   : > { %v2333_v43 = vmul.f32 %v7218_v34, %v2297_v33  ;;  %v1339_v48 = vpop.f32.mrb[10].mxu0  ;;  %v7283_v52 = vld [vmem:[#allocation2 + $0x2f] sm:$0xff]  ;;  %v2665_v22 = vmul.f32 %v7252_v61, %v2629_v47  ;;  %v2735_v30 = vmul.f32 %v7290_v55, %v7279_v45 }
 0x14c   : > { %v7285_v16 = vld [vmem:[#allocation2 + $0x29] sm:$0xff]  ;;  %1485 = vst.msk [vmem:[#allocation2 + $0x40] sm:$0xff] %vm1473_vm0, %v1339_v48  ;;  %v1341_v57 = vpop.f32.mrb[11].mxu0  ;;  %v2298_v58 = vmul.f32 %v7283_v52, %v7173_v4  ;;  %v2234_v59 = vadd.f32 %v2202_v42, %v1942_v50  ;;  %v2630_v12 = vmul.f32 %v7283_v52, %v7175_v5  ;;  %v2596_v29 = vadd.f32 %v2564_v54, %v2464_v53 }
 0x14d   : > { %v2365_v18 = vadd.f32 %v2333_v43, %v2233_v3  ;;  %v7305_v19 = vld [vmem:[#allocation2 + $0x30] sm:$0xff]  ;;  %v2529_v21 = vmul.f32 %v7285_v16, %v7240_v51  ;;  %v2801_v31 = vmul.f32 %v7285_v16, %v7179_v7  ;;  %v2697_v37 = vadd.f32 %v2665_v22, %v2595_v0  ;;  %v7331_v43 = vpop.permute.xlu0 %1643 }
 0x14e   : > { %v2334_v10 = vmul.f32 %v7218_v34, %v2298_v58  ;;  %v2666_v5 = vmul.f32 %v7252_v61, %v2630_v12  ;;  %v2434_v40 = vmul.f32 %v7238_v49, %v7305_v19  ;;  %v2736_v7 = vmul.f32 %v7290_v55, %v7305_v19 }
 0x14f   : > { %v1344_v24 = vpop.f32.mrb[12].mxu0  ;;  %v7312_v25 = vld [vmem:[#allocation2 + $0x31] sm:$0xff]  ;;  %v2837_v42 = vmul.f32 %v7302_v13, %v2801_v31  ;;  %v2465_v47 = vadd.f32 %v2433_v62, %v2365_v18  ;;  %v2565_v48 = vmul.f32 %v7248_v60, %v2529_v21  ;;  %v2767_v50 = vadd.f32 %v2735_v30, %v2697_v37  ;;  %v7342_v62 = vld [vmem:[%s9158_s13] ss:$0 sm:$0xff]  ;;  %v7348_v21 = vpop.permute.xlu1 %1648 }
 0x150   : > { %1486 = vst.msk [vmem:[#allocation2 + $0x48] sm:$0xff] %vm1473_vm0, %v1344_v24  ;;  %v1346_v32 = vpop.f32.mrb[13].mxu0  ;;  %v2366_v33 = vadd.f32 %v2334_v10, %v2234_v59  ;;  %v2530_v36 = vmul.f32 %v7312_v25, %v7262_v20  ;;  %v2802_v38 = vmul.f32 %v7312_v25, %v7177_v6  ;;  %v7324_v39 = vld [vmem:[#allocation2 + $0x37] sm:$0xff]  ;;  %v2698_v41 = vadd.f32 %v2666_v5, %v2596_v29 }
 0x151   : > { %v2631_v3 = vmul.f32 %v7324_v39, %v7167_v63  ;;  %v2869_v12 = vadd.f32 %v2837_v42, %v2767_v50  ;;  %v7344_v10 = vld [vmem:[#allocation2 + $0x38] sm:$0xff]  ;;  %v1775_v24 = vmul.f32 %v7266_v28, %v7292_v56  ;;  %v2597_v63 = vadd.f32 %v2565_v48, %v2465_v47 }
 0x152   : > { %v2838_v6 = vmul.f32 %v7302_v13, %v2802_v38  ;;  %v2768_v54 = vadd.f32 %v2736_v7, %v2698_v41  ;;  %v2466_v59 = vadd.f32 %v2434_v40, %v2366_v33  ;;  %v2566_v0 = vmul.f32 %v7248_v60, %v2530_v36  ;;  %v7367_v40 = vpop.permute.xlu0 %2025 }
 0x153   : > { %v1349_v53 = vpop.f32.mrb[14].mxu0  ;;  %v7335_v57 = vld [vmem:[#allocation2 + $0x3f] sm:$0xff]  ;;  %v2299_v29 = vmul.f32 %v7324_v39, %v7292_v56  ;;  %v2667_v31 = vmul.f32 %v7252_v61, %v2631_v3  ;;  %v2908_v33 = vadd.f32 %v7342_v62, %v2869_v12  ;;  %v2737_v28 = vmul.f32 %v7290_v55, %v7344_v10 }
 0x154   : > { %1487 = vst.msk [vmem:[#allocation2 + $0x50] sm:$0xff] %vm1473_vm0, %v1349_v53  ;;  %v1351_v58 = vpop.f32.mrb[15].mxu0  ;;  %v7346_v18 = vld [vmem:[#allocation2 + $0x39] sm:$0xff]  ;;  %v2870_v22 = vadd.f32 %v2838_v6, %v2768_v54  ;;  %v2632_v30 = vmul.f32 %v7335_v57, %v7173_v4  ;;  %v2598_v41 = vadd.f32 %v2566_v0, %v2466_v59  ;;  %v2031_v59 = vpop.permute.xlu1 %2030 }
 0x155   : > { %v7354_v5 = vld [vmem:[#allocation2 + $0x40] sm:$0xff]  ;;  %v2803_v38 = vmul.f32 %v7346_v18, %v7240_v51  ;;  %v2699_v42 = vadd.f32 %v2667_v31, %v2597_v63  ;;  %v1776_v51 = vmul.f32 %v7283_v52, %v7310_v23  ;;  %v1811_v58 = vmul.f32 %v7193_v14, %v1775_v24 }
 0x156   : > { %v2909_v36 = vadd.f32 %v7342_v62, %v2870_v22  ;;  %v2668_v7 = vmul.f32 %v7252_v61, %v2632_v30  ;;  %v2738_v50 = vmul.f32 %v7290_v55, %v7354_v5  ;;  %v1911_v22 = vmul.f32 %v7279_v45, %v7197_v15  ;;  %v7395_v45 = vpop.permute.xlu0 %2035 }
 0x157   : > { %v1354_v32 = vpop.f32.mrb[16].mxu0  ;;  %v7361_v37 = vld [vmem:[#allocation2 + $0x41] sm:$0xff]  ;;  %v2839_v6 = vmul.f32 %v7302_v13, %v2803_v38  ;;  %v2769_v54 = vadd.f32 %v2737_v28, %v2699_v42  ;;  %v1812_v12 = vmul.f32 %v7193_v14, %v1776_v51  ;;  %v1912_v52 = vmul.f32 %v7305_v19, %v7197_v15 }
 0x158   : > { %1488 = vst.msk [vmem:[#allocation2 + $0x58] sm:$0xff] %vm1473_vm0, %v1354_v32  ;;  %v1356_v4 = vpop.f32.mrb[17].mxu0  ;;  %v2804_v47 = vmul.f32 %v7361_v37, %v7262_v20  ;;  %v2940_v48 = vpack.c.bf16 %v2909_v36, %v2908_v33  ;;  %v2700_v53 = vadd.f32 %v2668_v7, %v2598_v41  ;;  %v2300_v20 = vmul.f32 %v7335_v57, %v7310_v23  ;;  %v7399_v7 = vld [vmem:[#allocation2 + $0x47] sm:$0xff] }
 0x159   : > { %v2871_v24 = vadd.f32 %v2839_v6, %v2769_v54  ;;  %v2167_v31 = vmul.f32 %v7285_v16, %v7367_v40  ;;  %v2168_v32 = vmul.f32 %v7312_v25, %v2031_v59  ;;  %v2531_v33 = vmul.f32 %v7346_v18, %v7367_v40 }
 0x15a   : > { %v2840_v3 = vmul.f32 %v7302_v13, %v2804_v47  ;;  %6183 = vmatprep.mubr.msk.bf16.mxu1 %vm1473_vm0, %v2940_v48  ;;  %v2770_v30 = vadd.f32 %v2738_v50, %v2700_v53  ;;  %v2532_v36 = vmul.f32 %v7361_v37, %v2031_v59  ;;  %v1943_v28 = vadd.f32 %v1911_v22, %v1811_v58  ;;  %v7412_v58 = vld [vmem:[#allocation2 + $0x48] sm:$0xff] }
 0x15b   : > { %v1359_v0 = vpop.f32.mrb[18].mxu0  ;;  %v1944_v19 = vadd.f32 %v1912_v52, %v1812_v12  ;;  %v2203_v4 = vmul.f32 %v7208_v26, %v2167_v31  ;;  %v2204_v41 = vmul.f32 %v7208_v26, %v2168_v32  ;;  %v7401_v42 = vld [vmem:[#allocation2 + $0x4f] sm:$0xff]  ;;  %v2435_v25 = vmul.f32 %v7238_v49, %v7344_v10 }
 0x15c   : > { %1489 = vst.msk [vmem:[#allocation2 + $0x60] sm:$0xff] %vm1473_vm0, %v1359_v0  ;;  %v1361_v63 = vpop.f32.mrb[19].mxu0  ;;  %v2872_v38 = vadd.f32 %v2840_v3, %v2770_v30  ;;  %v2436_v47 = vmul.f32 %v7238_v49, %v7354_v5  ;;  %v2335_v48 = vmul.f32 %v7218_v34, %v2299_v29  ;;  %v2336_v50 = vmul.f32 %v7218_v34, %v2300_v20  ;;  %v7414_v0 = vld [vmem:[#allocation2 + $0x49] sm:$0xff] }
 0x15d   : > { %v2910_v51 = vadd.f32 %v7342_v62, %v2871_v24  ;;  %v2235_v54 = vadd.f32 %v2203_v4, %v1943_v28  ;;  %v2236_v3 = vadd.f32 %v2204_v41, %v1944_v19  ;;  %v2301_v12 = vmul.f32 %v7399_v7, %v7331_v43  ;;  %v7424_v63 = vpop.permute.xlu1 %2040  ;;  %v7426_v32 = vld [vmem:[#allocation2 + $0x50] sm:$0xff]  ;;  %v7438_v41 = vpop.permute.xlu0 %1653 }
 0x15e   : > { %v2911_v53 = vadd.f32 %v7342_v62, %v2872_v38  ;;  %v2302_v29 = vmul.f32 %v7401_v42, %v7348_v21  ;;  %v2567_v22 = vmul.f32 %v7248_v60, %v2531_v33  ;;  %v2568_v52 = vmul.f32 %v7248_v60, %v2532_v36 }
 0x15f   : > { %v1364_v16 = vpop.f32.mrb[20].mxu0  ;;  %v7420_v20 = vld [vmem:[#allocation2 + $0x51] sm:$0xff]  ;;  %v2367_v24 = vadd.f32 %v2335_v48, %v2235_v54  ;;  %v2368_v31 = vadd.f32 %v2336_v50, %v2236_v3  ;;  %v2633_v28 = vmul.f32 %v7399_v7, %v7292_v56  ;;  %v2533_v19 = vmul.f32 %v7414_v0, %v7395_v45 }
 0x160   : > { %1490 = vst.msk [vmem:[#allocation2 + $0x68] sm:$0xff] %vm1473_vm0, %v1364_v16  ;;  %v1366_v6 = vpop.f32.mrb[21].mxu0  ;;  %v2941_v30 = vpack.c.bf16 %v2911_v53, %v2910_v51  ;;  %v2634_v4 = vmul.f32 %v7401_v42, %v7310_v23  ;;  %v2739_v33 = vmul.f32 %v7290_v55, %v7412_v58  ;;  %v2805_v36 = vmul.f32 %v7414_v0, %v7367_v40 }
 0x161   : > { %v2467_v16 = vadd.f32 %v2435_v25, %v2367_v24  ;;  %v2468_v48 = vadd.f32 %v2436_v47, %v2368_v31  ;;  %v2669_v50 = vmul.f32 %v7252_v61, %v2633_v28  ;;  %v2806_v6 = vmul.f32 %v7420_v20, %v2031_v59  ;;  %v7460_v28 = vpop.permute.xlu1 %1658 }
 0x162   : > { %6184 = vmatmul.mubr.msk.bf16.vlgmr.msra.gmra.mrb[0].mxu1 %vm1473_vm0, %v2941_v30  ;;  %v2670_v23 = vmul.f32 %v7252_v61, %v2634_v4  ;;  %v2740_v51 = vmul.f32 %v7290_v55, %v7426_v32  ;;  %v1777_v40 = vmul.f32 %v7324_v39, %v7331_v43  ;;  %v1778_v53 = vmul.f32 %v7335_v57, %v7348_v21 }
 0x163   : > { %v1369_v38 = vpop.f32.mrb[22].mxu0  ;;  %v2599_v54 = vadd.f32 %v2567_v22, %v2467_v16  ;;  %v2600_v3 = vadd.f32 %v2568_v52, %v2468_v48  ;;  %v2841_v25 = vmul.f32 %v7302_v13, %v2805_v36  ;;  %v1913_v47 = vmul.f32 %v7344_v10, %v7197_v15 }
 0x164   : > { %1491 = vst.msk [vmem:[#allocation2 + $0x70] sm:$0xff] %vm1473_vm0, %v1369_v38  ;;  %v1371_v56 = vpop.f32.mrb[23].mxu0  ;;  %v1813_v59 = vmul.f32 %v7193_v14, %v1777_v40  ;;  %v1814_v24 = vmul.f32 %v7193_v14, %v1778_v53  ;;  %v1914_v31 = vmul.f32 %v7354_v5, %v7197_v15  ;;  %v2169_v39 = vmul.f32 %v7346_v18, %v7395_v45  ;;  %v7469_v18 = vpop.permute.xlu0 %1663  ;;  %v7473_v53 = vld [vmem:[#allocation2 + $0x57] sm:$0xff] }
 0x165   : > { %v2701_v22 = vadd.f32 %v2669_v50, %v2599_v54  ;;  %v2702_v52 = vadd.f32 %v2670_v23, %v2600_v3  ;;  %v2842_v10 = vmul.f32 %v7302_v13, %v2806_v6  ;;  %v2170_v38 = vmul.f32 %v7361_v37, %v7424_v63 }
 0x166   : > { %v2534_v4 = vmul.f32 %v7420_v20, %v7424_v63  ;;  %v1945_v36 = vadd.f32 %v1913_v47, %v1813_v59  ;;  %v1946_v5 = vadd.f32 %v1914_v31, %v1814_v24  ;;  %v2205_v56 = vmul.f32 %v7208_v26, %v2169_v39  ;;  %v7483_v24 = vld [vmem:[#allocation2 + $0x59] sm:$0xff]  ;;  %v7487_v39 = vpop.permute.xlu1 %1668 }
 0x167   : > { %v1374_v30 = vpop.f32.mrb[24].mxu0  ;;  %v2771_v16 = vadd.f32 %v2739_v33, %v2701_v22  ;;  %v2772_v48 = vadd.f32 %v2740_v51, %v2702_v52  ;;  %v2206_v40 = vmul.f32 %v7208_v26, %v2170_v38  ;;  %v2337_v50 = vmul.f32 %v7218_v34, %v2301_v12  ;;  %v7479_v51 = vld [vmem:[#allocation2 + $0x5f] sm:$0xff] }
 0x168   : > { %1492 = vst.msk [vmem:[#allocation2 + $0x78] sm:$0xff] %vm1473_vm0, %v1374_v30  ;;  %v1376_v57 = vpop.f32.mrb[25].mxu0  ;;  %v2237_v6 = vadd.f32 %v2205_v56, %v1945_v36  ;;  %v2338_v37 = vmul.f32 %v7218_v34, %v2302_v29  ;;  %v2437_v54 = vmul.f32 %v7238_v49, %v7412_v58  ;;  %v2438_v12 = vmul.f32 %v7238_v49, %v7426_v32  ;;  %v7491_v52 = vld [vmem:[#allocation2 + $0x61] sm:$0xff] }
 0x169   : > { %v2873_v3 = vadd.f32 %v2841_v25, %v2771_v16  ;;  %v2874_v47 = vadd.f32 %v2842_v10, %v2772_v48  ;;  %v2238_v33 = vadd.f32 %v2206_v40, %v1946_v5  ;;  %v2569_v31 = vmul.f32 %v7248_v60, %v2533_v19  ;;  %v7501_v5 = vld [vmem:[#allocation2 + $0x60] sm:$0xff]  ;;  %v7505_v48 = vpop.permute.xlu0 %2045 }
 0x16a   : > { %v2369_v59 = vadd.f32 %v2337_v50, %v2237_v6  ;;  %v2570_v29 = vmul.f32 %v7248_v60, %v2534_v4  ;;  %v2635_v10 = vmul.f32 %v7473_v53, %v7331_v43  ;;  %v2303_v36 = vmul.f32 %v7473_v53, %v7438_v41  ;;  %v7499_v4 = vld [vmem:[#allocation2 + $0x58] sm:$0xff] }
 0x16b   : > { %v1379_v23 = vpop.f32.mrb[26].mxu0  ;;  %v2912_v25 = vadd.f32 %v7342_v62, %v2873_v3  ;;  %v2913_v57 = vadd.f32 %v7342_v62, %v2874_v47  ;;  %v2370_v22 = vadd.f32 %v2338_v37, %v2238_v33  ;;  %v2304_v19 = vmul.f32 %v7479_v51, %v7460_v28 }
 0x16c   : > { %1493 = vst.msk [vmem:[#allocation2 + $0x80] sm:$0xff] %vm1473_vm0, %v1379_v23  ;;  %v1381_v30 = vpop.f32.mrb[27].mxu0  ;;  %v2469_v56 = vadd.f32 %v2437_v54, %v2369_v59  ;;  %v2636_v16 = vmul.f32 %v7479_v51, %v7348_v21  ;;  %v2671_v23 = vmul.f32 %v7252_v61, %v2635_v10  ;;  %v2807_v6 = vmul.f32 %v7483_v24, %v7395_v45 }
 0x16d   : > { %v2942_v40 = vpack.c.bf16 %v2913_v57, %v2912_v25  ;;  %v2470_v50 = vadd.f32 %v2438_v12, %v2370_v22  ;;  %v2808_v54 = vmul.f32 %v7491_v52, %v7424_v63  ;;  %v1779_v21 = vmul.f32 %v7399_v7, %v7438_v41  ;;  %v2051_v25 = vpop.permute.xlu1 %2050 }
 0x16e   : > { %v2601_v37 = vadd.f32 %v2569_v31, %v2469_v56  ;;  %v2672_v3 = vmul.f32 %v7252_v61, %v2636_v16  ;;  %v2741_v30 = vmul.f32 %v7290_v55, %v7499_v4  ;;  %v2742_v33 = vmul.f32 %v7290_v55, %v7501_v5 }
 0x16f   : > { %v1384_v38 = vpop.f32.mrb[28].mxu0  ;;  %6187 = vmatprep.mubr.msk.bf16.mxu1 %vm1473_vm0, %v2942_v40  ;;  %v2602_v47 = vadd.f32 %v2570_v29, %v2470_v50  ;;  %v1780_v45 = vmul.f32 %v7401_v42, %v7460_v28  ;;  %v2843_v59 = vmul.f32 %v7302_v13, %v2807_v6  ;;  %v1815_v63 = vmul.f32 %v7193_v14, %v1779_v21  ;;  %v7537_v40 = vpop.permute.xlu0 %2055 }
 0x170   : > { %1494 = vst.msk [vmem:[#allocation2 + $0x88] sm:$0xff] %vm1473_vm0, %v1384_v38  ;;  %v1386_v43 = vpop.f32.mrb[29].mxu0  ;;  %v2703_v12 = vadd.f32 %v2671_v23, %v2601_v37  ;;  %v1915_v7 = vmul.f32 %v7412_v58, %v7197_v15  ;;  %v2844_v57 = vmul.f32 %v7302_v13, %v2808_v54  ;;  %v2171_v42 = vmul.f32 %v7414_v0, %v7505_v48 }
 0x171   : > { %v2704_v29 = vadd.f32 %v2672_v3, %v2602_v47  ;;  %v1816_v10 = vmul.f32 %v7193_v14, %v1780_v45  ;;  %v2535_v38 = vmul.f32 %v7483_v24, %v7505_v48  ;;  %v1916_v16 = vmul.f32 %v7426_v32, %v7197_v15 }
 0x172   : > { %v2773_v56 = vadd.f32 %v2741_v30, %v2703_v12  ;;  %v2172_v58 = vmul.f32 %v7420_v20, %v2051_v25  ;;  %v2536_v43 = vmul.f32 %v7491_v52, %v2051_v25  ;;  %v1947_v23 = vadd.f32 %v1915_v7, %v1815_v63  ;;  %v7544_v30 = vld [vmem:[#allocation2 + $0x67] sm:$0xff] }
 0x173   : > { %v1389_v31 = vpop.f32.mrb[30].mxu0  ;;  %v2774_v50 = vadd.f32 %v2742_v33, %v2704_v29  ;;  %v2207_v6 = vmul.f32 %v7208_v26, %v2171_v42  ;;  %v1948_v0 = vadd.f32 %v1916_v16, %v1816_v10  ;;  %v2339_v21 = vmul.f32 %v7218_v34, %v2303_v36  ;;  %v7555_v29 = vld [vmem:[#allocation2 + $0x68] sm:$0xff] }
 0x174   : > { %1495 = vst.msk [vmem:[#allocation2 + $0x90] sm:$0xff] %vm1473_vm0, %v1389_v31  ;;  %v1391_v22 = vpop.f32.mrb[31].mxu0  ;;  %v2875_v37 = vadd.f32 %v2843_v59, %v2773_v56  ;;  %v2208_v54 = vmul.f32 %v7208_v26, %v2172_v58  ;;  %v2340_v45 = vmul.f32 %v7218_v34, %v2304_v19  ;;  %v2439_v33 = vmul.f32 %v7238_v49, %v7499_v4  ;;  %v7549_v59 = vld [vmem:[#allocation2 + $0x6f] sm:$0xff] }
 0x175   : > { %v2876_v47 = vadd.f32 %v2844_v57, %v2774_v50  ;;  %v2239_v20 = vadd.f32 %v2207_v6, %v1947_v23  ;;  %v2440_v31 = vmul.f32 %v7238_v49, %v7501_v5  ;;  %v7557_v57 = vld [vmem:[#allocation2 + $0x70] sm:$0xff]  ;;  %v7559_v22 = vpop.permute.xlu1 %2060  ;;  %v2305_v19 = vmul.f32 %v7544_v30, %v7469_v18  ;;  %v7567_v50 = vpop.permute.xlu0 %1673 }
 0x176   : > { %v2240_v12 = vadd.f32 %v2208_v54, %v1948_v0  ;;  %v2914_v36 = vadd.f32 %v7342_v62, %v2875_v37  ;;  %v7563_v42 = vld [vmem:[#allocation2 + $0x69] sm:$0xff]  ;;  %v2571_v56 = vmul.f32 %v7248_v60, %v2535_v38  ;;  %v2572_v16 = vmul.f32 %v7248_v60, %v2536_v43  ;;  %v7569_v37 = vld [vmem:[#allocation2 + $0x71] sm:$0xff] }
 0x177   : > { %v1394_v3 = vpop.f32.mrb[32].mxu0  ;;  %v2915_v63 = vadd.f32 %v7342_v62, %v2876_v47  ;;  %v2371_v7 = vadd.f32 %v2339_v21, %v2239_v20  ;;  %v2638_v0 = vmul.f32 %v7549_v59, %v7460_v28  ;;  %v2306_v38 = vmul.f32 %v7549_v59, %v7487_v39 }
 0x178   : > { %1496 = vst.msk [vmem:[#allocation2 + $0x98] sm:$0xff] %vm1473_vm0, %v1394_v3  ;;  %v1396_v32 = vpop.f32.mrb[33].mxu0  ;;  %v2372_v10 = vadd.f32 %v2340_v45, %v2240_v12  ;;  %v2637_v3 = vmul.f32 %v7544_v30, %v7438_v41  ;;  %v2743_v21 = vmul.f32 %v7290_v55, %v7555_v29  ;;  %v2744_v47 = vmul.f32 %v7290_v55, %v7557_v57 }
 0x179   : > { %v2943_v23 = vpack.c.bf16 %v2915_v63, %v2914_v36  ;;  %v2471_v6 = vadd.f32 %v2439_v33, %v2371_v7  ;;  %v2674_v28 = vmul.f32 %v7252_v61, %v2638_v0  ;;  %v2809_v20 = vmul.f32 %v7563_v42, %v7505_v48 }
 0x17a   : > { %v2472_v43 = vadd.f32 %v2440_v31, %v2372_v10  ;;  %v2673_v41 = vmul.f32 %v7252_v61, %v2637_v3  ;;  %v2810_v33 = vmul.f32 %v7569_v37, %v2051_v25  ;;  %v1781_v31 = vmul.f32 %v7473_v53, %v7469_v18  ;;  %v7598_v25 = vpop.permute.xlu1 %1678 }
 0x17b   : > { %v1399_v58 = vpop.f32.mrb[34].mxu0  ;;  %6188 = vmatmul.mubr.msk.bf16.gmra.mrb[4].mxu1 %vm1473_vm0, %v2943_v23  ;;  %v2603_v32 = vadd.f32 %v2571_v56, %v2471_v6  ;;  %v1782_v36 = vmul.f32 %v7479_v51, %v7487_v39  ;;  %v2845_v7 = vmul.f32 %v7302_v13, %v2809_v20  ;;  %v1917_v56 = vmul.f32 %v7499_v4, %v7197_v15  ;;  %v7603_v23 = vpop.permute.xlu0 %1683 }
 0x17c   : > { %1497 = vst.msk [vmem:[#allocation2 + $0xa0] sm:$0xff] %vm1473_vm0, %v1399_v58  ;;  %v1401_v54 = vpop.f32.mrb[35].mxu0  ;;  %v2604_v45 = vadd.f32 %v2572_v16, %v2472_v43  ;;  %v1918_v48 = vmul.f32 %v7501_v5, %v7197_v15  ;;  %v2846_v53 = vmul.f32 %v7302_v13, %v2810_v33  ;;  %v1817_v58 = vmul.f32 %v7193_v14, %v1781_v31 }
 0x17d   : > { %v2705_v63 = vadd.f32 %v2673_v41, %v2603_v32  ;;  %v1818_v51 = vmul.f32 %v7193_v14, %v1782_v36  ;;  %v2537_v6 = vmul.f32 %v7563_v42, %v7537_v40  ;;  %v2173_v4 = vmul.f32 %v7483_v24, %v7537_v40  ;;  %v7613_v41 = vld [vmem:[#allocation2 + $0x77] sm:$0xff] }
 0x17e   : > { %v2706_v16 = vadd.f32 %v2674_v28, %v2604_v45  ;;  %v2174_v5 = vmul.f32 %v7491_v52, %v7559_v22  ;;  %v2538_v0 = vmul.f32 %v7569_v37, %v7559_v22  ;;  %v1949_v43 = vadd.f32 %v1917_v56, %v1817_v58  ;;  %v7615_v28 = vld [vmem:[#allocation2 + $0x7f] sm:$0xff] }
 0x17f   : > { %v1404_v12 = vpop.f32.mrb[36].mxu0  ;;  %v2775_v3 = vadd.f32 %v2743_v21, %v2705_v63  ;;  %v1950_v32 = vadd.f32 %v1918_v48, %v1818_v51  ;;  %v2209_v21 = vmul.f32 %v7208_v26, %v2173_v4  ;;  %v2341_v24 = vmul.f32 %v7218_v34, %v2305_v19  ;;  %v7632_v56 = vld [vmem:[#allocation2 + $0x78] sm:$0xff]  ;;  %v7642_v4 = vpop.permute.xlu0 %2065 }
 0x180   : > { %1498 = vst.msk [vmem:[#allocation2 + $0xa8] sm:$0xff] %vm1473_vm0, %v1404_v12  ;;  %v1406_v10 = vpop.f32.mrb[37].mxu0  ;;  %v2776_v54 = vadd.f32 %v2744_v47, %v2706_v16  ;;  %v2210_v33 = vmul.f32 %v7208_v26, %v2174_v5  ;;  %v2441_v47 = vmul.f32 %v7238_v49, %v7555_v29  ;;  %v2442_v12 = vmul.f32 %v7238_v49, %v7557_v57  ;;  %v7634_v48 = vld [vmem:[#allocation2 + $0x79] sm:$0xff]  ;;  %v7636_v16 = vpop.permute.xlu1 %1688 }
 0x181   : > { %v2877_v45 = vadd.f32 %v2845_v7, %v2775_v3  ;;  %v2342_v36 = vmul.f32 %v7218_v34, %v2306_v38  ;;  %v2241_v63 = vadd.f32 %v2209_v21, %v1949_v43  ;;  %v2307_v10 = vmul.f32 %v7613_v41, %v7567_v50  ;;  %v7644_v43 = vld [vmem:[#allocation2 + $0x80] sm:$0xff] }
 0x182   : > { %v2878_v31 = vadd.f32 %v2846_v53, %v2776_v54  ;;  %v2242_v7 = vadd.f32 %v2210_v33, %v1950_v32  ;;  %v7630_v19 = vmul.f32 %v7615_v28, %v7598_v25  ;;  %v2573_v38 = vmul.f32 %v7248_v60, %v2537_v6  ;;  %v7646_v32 = vld [vmem:[#allocation2 + $0x81] sm:$0xff] }
 0x183   : > { %v1409_v20 = vpop.f32.mrb[38].mxu0  ;;  %v2916_v58 = vadd.f32 %v7342_v62, %v2877_v45  ;;  %v2574_v51 = vmul.f32 %v7248_v60, %v2538_v0  ;;  %v2373_v5 = vadd.f32 %v2341_v24, %v2241_v63  ;;  %v2640_v45 = vmul.f32 %v7615_v28, %v7487_v39 }
 0x184   : > { %1499 = vst.msk [vmem:[#allocation2 + $0xb0] sm:$0xff] %vm1473_vm0, %v1409_v20  ;;  %v1411_v52 = vpop.f32.mrb[39].mxu0  ;;  %v2917_v53 = vadd.f32 %v7342_v62, %v2878_v31  ;;  %v2374_v54 = vadd.f32 %v2342_v36, %v2242_v7  ;;  %v2639_v20 = vmul.f32 %v7613_v41, %v7469_v18  ;;  %v2539_v0 = vmul.f32 %v7634_v48, %v7642_v4 }
 0x185   : > { %v2745_v33 = vmul.f32 %v7290_v55, %v7632_v56  ;;  %v2811_v24 = vmul.f32 %v7634_v48, %v7537_v40  ;;  %v2473_v52 = vadd.f32 %v2441_v47, %v2373_v5  ;;  %v2676_v36 = vmul.f32 %v7252_v61, %v2640_v45 }
 0x186   : > { %v2944_v21 = vpack.c.bf16 %v2917_v53, %v2916_v58  ;;  %v2474_v31 = vadd.f32 %v2442_v12, %v2374_v54  ;;  %v2675_v18 = vmul.f32 %v7252_v61, %v2639_v20  ;;  %v2746_v39 = vmul.f32 %v7290_v55, %v7644_v43  ;;  %v2071_v54 = vpop.permute.xlu1 %2070 }
 0x187   : > { %v1414_v3 = vpop.f32.mrb[40].mxu0  ;;  %v2812_v63 = vmul.f32 %v7646_v32, %v7559_v22  ;;  %v1783_v7 = vmul.f32 %v7544_v30, %v7567_v50  ;;  %v1784_v40 = vmul.f32 %v7549_v59, %v7598_v25  ;;  %v2605_v12 = vadd.f32 %v2573_v38, %v2473_v52 }
 0x188   : > { %1500 = vst.msk [vmem:[#allocation2 + $0xb8] sm:$0xff] %vm1473_vm0, %v1414_v3  ;;  %v1416_v6 = vpop.f32.mrb[41].mxu0  ;;  %6191 = vmatprep.mubr.msk.bf16.mxu1 %vm1473_vm0, %v2944_v21  ;;  %v2606_v58 = vadd.f32 %v2574_v51, %v2474_v31  ;;  %v2847_v53 = vmul.f32 %v7302_v13, %v2811_v24  ;;  %v1919_v3 = vmul.f32 %v7555_v29, %v7197_v15  ;;  %v7684_v31 = vld [vmem:[#allocation2 + $0x87] sm:$0xff] }
 0x189   : > { %v1819_v22 = vmul.f32 %v7193_v14, %v1783_v7  ;;  %v1820_v20 = vmul.f32 %v7193_v14, %v1784_v40  ;;  %v1920_v30 = vmul.f32 %v7557_v57, %v7197_v15  ;;  %v2175_v59 = vmul.f32 %v7563_v42, %v7642_v4  ;;  %v7686_v40 = vpop.permute.xlu0 %2075 }
 0x18a   : > { %v2707_v38 = vadd.f32 %v2675_v18, %v2605_v12  ;;  %v2708_v51 = vadd.f32 %v2676_v36, %v2606_v58  ;;  %v2848_v45 = vmul.f32 %v7302_v13, %v2812_v63  ;;  %v2176_v29 = vmul.f32 %v7569_v37, %v2071_v54  ;;  %v7689_v18 = vld [vmem:[#allocation2 + $0x8f] sm:$0xff] }
 0x18b   : > { %v1419_v47 = vpop.f32.mrb[42].mxu0  ;;  %v2540_v6 = vmul.f32 %v7646_v32, %v2071_v54  ;;  %v1951_v21 = vadd.f32 %v1919_v3, %v1819_v22  ;;  %v1952_v24 = vadd.f32 %v1920_v30, %v1820_v20  ;;  %v2211_v52 = vmul.f32 %v7208_v26, %v2175_v59  ;;  %v7703_v20 = vld [vmem:[#allocation2 + $0x90] sm:$0xff] }
 0x18c   : > { %1501 = vst.msk [vmem:[#allocation2 + $0xc0] sm:$0xff] %vm1473_vm0, %v1419_v47  ;;  %v1421_v5 = vpop.f32.mrb[43].mxu0  ;;  %v2777_v57 = vadd.f32 %v2745_v33, %v2707_v38  ;;  %v2778_v47 = vadd.f32 %v2746_v39, %v2708_v51  ;;  %v2212_v42 = vmul.f32 %v7208_v26, %v2176_v29  ;;  %v2343_v36 = vmul.f32 %v7218_v34, %v2307_v10  ;;  %v7701_v10 = vld [vmem:[#allocation2 + $0x88] sm:$0xff] }
 0x18d   : > { %v2443_v63 = vmul.f32 %v7238_v49, %v7632_v56  ;;  %v2444_v12 = vmul.f32 %v7238_v49, %v7644_v43  ;;  %v2243_v58 = vadd.f32 %v2211_v52, %v1951_v21  ;;  %v2344_v33 = vmul.f32 %v7218_v34, %v7630_v19  ;;  %v7707_v38 = vld [vmem:[#allocation2 + $0x89] sm:$0xff]  ;;  %v7715_v52 = vld [vmem:[#allocation2 + $0x91] sm:$0xff] }
 0x18e   : > { %v2879_v39 = vadd.f32 %v2847_v53, %v2777_v57  ;;  %v2880_v3 = vadd.f32 %v2848_v45, %v2778_v47  ;;  %v2244_v5 = vadd.f32 %v2212_v42, %v1952_v24  ;;  %v2309_v22 = vmul.f32 %v7684_v31, %v7603_v23  ;;  %v7711_v45 = vpop.permute.xlu1 %2080 }
 0x18f   : > { %v1424_v7 = vpop.f32.mrb[44].mxu0  ;;  %v2310_v30 = vmul.f32 %v7689_v18, %v7636_v16  ;;  %v2375_v59 = vadd.f32 %v2343_v36, %v2243_v58  ;;  %v2575_v51 = vmul.f32 %v7248_v60, %v2539_v0  ;;  %v2576_v19 = vmul.f32 %v7248_v60, %v2540_v6  ;;  %v7726_v36 = vpop.permute.xlu0 %1693 }
 0x190   : > { %1502 = vst.msk [vmem:[#allocation2 + $0xc8] sm:$0xff] %vm1473_vm0, %v1424_v7  ;;  %v1426_v37 = vpop.f32.mrb[45].mxu0  ;;  %v2918_v29 = vadd.f32 %v7342_v62, %v2879_v39  ;;  %v2919_v21 = vadd.f32 %v7342_v62, %v2880_v3  ;;  %v2376_v24 = vadd.f32 %v2344_v33, %v2244_v5  ;;  %v2641_v7 = vmul.f32 %v7684_v31, %v7567_v50 }
 0x191   : > { %v2475_v47 = vadd.f32 %v2443_v63, %v2375_v59  ;;  %v2642_v0 = vmul.f32 %v7689_v18, %v7598_v25  ;;  %v2747_v6 = vmul.f32 %v7290_v55, %v7701_v10  ;;  %v2748_v42 = vmul.f32 %v7290_v55, %v7703_v20 }
 0x192   : > { %v2945_v37 = vpack.c.bf16 %v2919_v21, %v2918_v29  ;;  %v2476_v58 = vadd.f32 %v2444_v12, %v2376_v24  ;;  %v2677_v33 = vmul.f32 %v7252_v61, %v2641_v7  ;;  %v2813_v50 = vmul.f32 %v7707_v38, %v7642_v4 }
 0x193   : > { %v1429_v53 = vpop.f32.mrb[46].mxu0  ;;  %v2607_v39 = vadd.f32 %v2575_v51, %v2475_v47  ;;  %v2678_v63 = vmul.f32 %v7252_v61, %v2642_v0  ;;  %v2814_v25 = vmul.f32 %v7715_v52, %v2071_v54  ;;  %v1785_v3 = vmul.f32 %v7613_v41, %v7603_v23 }
 0x194   : > { %1503 = vst.msk [vmem:[#allocation2 + $0xd0] sm:$0xff] %vm1473_vm0, %v1429_v53  ;;  %v1431_v57 = vpop.f32.mrb[47].mxu0  ;;  %6192 = vmatmul.mubr.msk.bf16.gmra.mrb[8].mxu1 %vm1473_vm0, %v2945_v37  ;;  %v2608_v59 = vadd.f32 %v2576_v19, %v2476_v58  ;;  %v2849_v53 = vmul.f32 %v7302_v13, %v2813_v50  ;;  %v1786_v12 = vmul.f32 %v7615_v28, %v7636_v16  ;;  %v7746_v19 = vpop.permute.xlu1 %1698 }
 0x195   : > { %v1921_v4 = vmul.f32 %v7632_v56, %v7197_v15  ;;  %v2709_v29 = vadd.f32 %v2677_v33, %v2607_v39  ;;  %v2850_v54 = vmul.f32 %v7302_v13, %v2814_v25  ;;  %v1821_v41 = vmul.f32 %v7193_v14, %v1785_v3  ;;  %v7757_v58 = vpop.permute.xlu0 %1703 }
 0x196   : > { %v1922_v21 = vmul.f32 %v7644_v43, %v7197_v15  ;;  %v2710_v24 = vadd.f32 %v2678_v63, %v2608_v59  ;;  %v1822_v7 = vmul.f32 %v7193_v14, %v1786_v12  ;;  %v2177_v28 = vmul.f32 %v7634_v48, %v7686_v40  ;;  %v7764_v12 = vld [vmem:[#allocation2 + $0x97] sm:$0xff] }
 0x197   : > { %v1434_v5 = vpop.f32.mrb[48].mxu0  ;;  %v2178_v56 = vmul.f32 %v7646_v32, %v7711_v45  ;;  %v2541_v57 = vmul.f32 %v7707_v38, %v7686_v40  ;;  %v2542_v47 = vmul.f32 %v7715_v52, %v7711_v45  ;;  %v2779_v0 = vadd.f32 %v2747_v6, %v2709_v29 }
 0x198   : > { %1504 = vst.msk [vmem:[#allocation2 + $0xd8] sm:$0xff] %vm1473_vm0, %v1434_v5  ;;  %v1436_v51 = vpop.f32.mrb[49].mxu0  ;;  %v1953_v37 = vadd.f32 %v1921_v4, %v1821_v41  ;;  %v2780_v33 = vadd.f32 %v2748_v42, %v2710_v24  ;;  %v1954_v50 = vadd.f32 %v1922_v21, %v1822_v7  ;;  %v2213_v39 = vmul.f32 %v7208_v26, %v2177_v28  ;;  %v7766_v4 = vld [vmem:[#allocation2 + $0x9f] sm:$0xff] }
 0x199   : > { %v2214_v48 = vmul.f32 %v7208_v26, %v2178_v56  ;;  %v2881_v63 = vadd.f32 %v2849_v53, %v2779_v0  ;;  %v2345_v25 = vmul.f32 %v7218_v34, %v2309_v22  ;;  %v2346_v3 = vmul.f32 %v7218_v34, %v2310_v30  ;;  %v7773_v53 = vld [vmem:[#allocation2 + $0x99] sm:$0xff]  ;;  %v7779_v7 = vld [vmem:[#allocation2 + $0xa1] sm:$0xff] }
 0x19a   : > { %v2882_v5 = vadd.f32 %v2850_v54, %v2780_v33  ;;  %v2245_v6 = vadd.f32 %v2213_v39, %v1953_v37  ;;  %v2445_v42 = vmul.f32 %v7238_v49, %v7701_v10  ;;  %v2446_v51 = vmul.f32 %v7238_v49, %v7703_v20  ;;  %v7776_v54 = vpop.permute.xlu1 %1708  ;;  %v7787_v37 = vld [vmem:[#allocation2 + $0x98] sm:$0xff]  ;;  %v7795_v39 = vld [vmem:[#allocation2 + $0xa0] sm:$0xff] }
 0x19b   : > { %v1439_v43 = vpop.f32.mrb[50].mxu0  ;;  %v2246_v59 = vadd.f32 %v2214_v48, %v1954_v50  ;;  %v2920_v29 = vadd.f32 %v7342_v62, %v2881_v63  ;;  %v2577_v22 = vmul.f32 %v7248_v60, %v2541_v57  ;;  %v2578_v28 = vmul.f32 %v7248_v60, %v2542_v47  ;;  %v7793_v50 = vpop.permute.xlu0 %2085 }
 0x19c   : > { %1505 = vst.msk [vmem:[#allocation2 + $0xe0] sm:$0xff] %vm1473_vm0, %v1439_v43  ;;  %v1441_v32 = vpop.f32.mrb[51].mxu0  ;;  %v2921_v41 = vadd.f32 %v7342_v62, %v2882_v5  ;;  %v2377_v21 = vadd.f32 %v2345_v25, %v2245_v6  ;;  %v2311_v0 = vmul.f32 %v7764_v12, %v7726_v36  ;;  %v2312_v57 = vmul.f32 %v7766_v4, %v7746_v19 }
 0x19d   : > { %v2378_v24 = vadd.f32 %v2346_v3, %v2246_v59  ;;  %v2643_v43 = vmul.f32 %v7764_v12, %v7603_v23  ;;  %v2644_v33 = vmul.f32 %v7766_v4, %v7636_v16  ;;  %v2815_v63 = vmul.f32 %v7773_v53, %v7686_v40 }
 0x19e   : > { %v2946_v47 = vpack.c.bf16 %v2921_v41, %v2920_v29  ;;  %v2477_v48 = vadd.f32 %v2445_v42, %v2377_v21  ;;  %v2543_v25 = vmul.f32 %v7773_v53, %v7793_v50  ;;  %v2816_v16 = vmul.f32 %v7779_v7, %v7711_v45  ;;  %v2091_v41 = vpop.permute.xlu1 %2090 }
 0x19f   : > { %v1444_v30 = vpop.f32.mrb[52].mxu0  ;;  %v2478_v32 = vadd.f32 %v2446_v51, %v2378_v24  ;;  %v2679_v3 = vmul.f32 %v7252_v61, %v2643_v43  ;;  %v2680_v23 = vmul.f32 %v7252_v61, %v2644_v33  ;;  %v2749_v42 = vmul.f32 %v7290_v55, %v7787_v37 }
 0x1a0   : > { %1506 = vst.msk [vmem:[#allocation2 + $0xe8] sm:$0xff] %vm1473_vm0, %v1444_v30  ;;  %v1446_v56 = vpop.f32.mrb[53].mxu0  ;;  %6195 = vmatprep.mubr.msk.bf16.mxu1 %vm1473_vm0, %v2946_v47  ;;  %v2609_v6 = vadd.f32 %v2577_v22, %v2477_v48  ;;  %v1787_v40 = vmul.f32 %v7684_v31, %v7726_v36  ;;  %v2750_v29 = vmul.f32 %v7290_v55, %v7795_v39 }
 0x1a1   : > { %v2610_v59 = vadd.f32 %v2578_v28, %v2478_v32  ;;  %v2851_v30 = vmul.f32 %v7302_v13, %v2815_v63  ;;  %v2852_v45 = vmul.f32 %v7302_v13, %v2816_v16  ;;  %v1788_v22 = vmul.f32 %v7689_v18, %v7746_v19  ;;  %v7826_v18 = vpop.permute.xlu0 %2095 }
 0x1a2   : > { %v2711_v21 = vadd.f32 %v2679_v3, %v2609_v6  ;;  %v1823_v28 = vmul.f32 %v7193_v14, %v1787_v40  ;;  %v1923_v31 = vmul.f32 %v7701_v10, %v7197_v15  ;;  %v1924_v43 = vmul.f32 %v7703_v20, %v7197_v15 }
 0x1a3   : > { %v1449_v5 = vpop.f32.mrb[54].mxu0  ;;  %v2712_v24 = vadd.f32 %v2680_v23, %v2610_v59  ;;  %v1824_v56 = vmul.f32 %v7193_v14, %v1788_v22  ;;  %v2179_v33 = vmul.f32 %v7707_v38, %v7793_v50  ;;  %v2180_v13 = vmul.f32 %v7715_v52, %v2091_v41  ;;  %v7829_v23 = vld [vmem:[#allocation2 + $0xa7] sm:$0xff] }
 0x1a4   : > { %1507 = vst.msk [vmem:[#allocation2 + $0xf0] sm:$0xff] %vm1473_vm0, %v1449_v5  ;;  %v1451_v51 = vpop.f32.mrb[55].mxu0  ;;  %v2544_v48 = vmul.f32 %v7779_v7, %v2091_v41  ;;  %v2781_v32 = vadd.f32 %v2749_v42, %v2711_v21  ;;  %v1955_v3 = vadd.f32 %v1923_v31, %v1823_v28  ;;  %v7834_v5 = vld [vmem:[#allocation2 + $0xaf] sm:$0xff]  ;;  %v2347_v52 = vmul.f32 %v7218_v34, %v2311_v0 }
 0x1a5   : > { %v2782_v63 = vadd.f32 %v2750_v29, %v2712_v24  ;;  %v1956_v16 = vadd.f32 %v1924_v43, %v1824_v56  ;;  %v2215_v20 = vmul.f32 %v7208_v26, %v2179_v33  ;;  %v2216_v38 = vmul.f32 %v7208_v26, %v2180_v13  ;;  %v7846_v24 = vld [vmem:[#allocation2 + $0xa8] sm:$0xff]  ;;  %v7848_v28 = vld [vmem:[#allocation2 + $0xb0] sm:$0xff]  ;;  %v7858_v33 = vpop.permute.xlu1 %2100 }
 0x1a6   : > { %v2447_v6 = vmul.f32 %v7238_v49, %v7787_v37  ;;  %v2883_v59 = vadd.f32 %v2851_v30, %v2781_v32  ;;  %v2348_v40 = vmul.f32 %v7218_v34, %v2312_v57  ;;  %v2448_v51 = vmul.f32 %v7238_v49, %v7795_v39  ;;  %v7860_v32 = vld [vmem:[#allocation2 + $0xb1] sm:$0xff] }
 0x1a7   : > { %v1454_v47 = vpop.f32.mrb[56].mxu0  ;;  %v2884_v42 = vadd.f32 %v2852_v45, %v2782_v63  ;;  %v2247_v29 = vadd.f32 %v2215_v20, %v1955_v3  ;;  %v2248_v22 = vadd.f32 %v2216_v38, %v1956_v16  ;;  %v7844_v21 = vmul.f32 %v7829_v23, %v7757_v58  ;;  %v7854_v45 = vld [vmem:[#allocation2 + $0xa9] sm:$0xff]  ;;  %v7865_v3 = vpop.permute.xlu0 %1713 }
 0x1a8   : > { %1508 = vst.msk [vmem:[#allocation2 + $0xf8] sm:$0xff] %vm1473_vm0, %v1454_v47  ;;  %v1456_v10 = vpop.f32.mrb[57].mxu0  ;;  %v2922_v31 = vadd.f32 %v7342_v62, %v2883_v59  ;;  %v2314_v57 = vmul.f32 %v7834_v5, %v7776_v54  ;;  %v2579_v56 = vmul.f32 %v7248_v60, %v2543_v25  ;;  %v2580_v63 = vmul.f32 %v7248_v60, %v2544_v48 }
 0x1a9   : > { %v2923_v30 = vadd.f32 %v7342_v62, %v2884_v42  ;;  %v2379_v13 = vadd.f32 %v2347_v52, %v2247_v29  ;;  %v2380_v47 = vadd.f32 %v2348_v40, %v2248_v22  ;;  %v2645_v62 = vmul.f32 %v7829_v23, %v7726_v36 }
 0x1aa   : > { %v2646_v25 = vmul.f32 %v7834_v5, %v7746_v19  ;;  %v2751_v16 = vmul.f32 %v7290_v55, %v7846_v24  ;;  %v2752_v20 = vmul.f32 %v7290_v55, %v7848_v28  ;;  %v2817_v36 = vmul.f32 %v7854_v45, %v7793_v50 }
 0x1ab   : > { %v1459_v0 = vpop.f32.mrb[58].mxu0  ;;  %v2947_v10 = vpack.c.bf16 %v2923_v30, %v2922_v31  ;;  %v2479_v38 = vadd.f32 %v2447_v6, %v2379_v13  ;;  %v2480_v52 = vadd.f32 %v2448_v51, %v2380_v47  ;;  %v2681_v48 = vmul.f32 %v7252_v61, %v2645_v62  ;;  %v7901_v62 = vpop.permute.xlu0 %1723 }
 0x1ac   : > { %1509 = vst.msk [vmem:[#allocation2 + $0x100] sm:$0xff] %vm1473_vm0, %v1459_v0  ;;  %v1461_v43 = vpop.f32.mrb[59].mxu0  ;;  %v2682_v42 = vmul.f32 %v7252_v61, %v2646_v25  ;;  %v2818_v19 = vmul.f32 %v7860_v32, %v2091_v41  ;;  %v1789_v40 = vmul.f32 %v7764_v12, %v7757_v58  ;;  %v1790_v29 = vmul.f32 %v7766_v4, %v7776_v54  ;;  %v7885_v0 = vld [vmem:[%s9160_s9 + $0x8] ss:$0 sm:$0xff] }
 0x1ad   : > { %6196 = vmatmul.mubr.msk.bf16.gmra.mrb[12].mxu1 %vm1473_vm0, %v2947_v10  ;;  %v2611_v51 = vadd.f32 %v2579_v56, %v2479_v38  ;;  %v2612_v22 = vadd.f32 %v2580_v63, %v2480_v52  ;;  %v2853_v50 = vmul.f32 %v7885_v0, %v2817_v36  ;;  %v1925_v31 = vmul.f32 %v7787_v37, %v7197_v15  ;;  %v7895_v43 = vpop.permute.xlu1 %1718 }
 0x1ae   : > { %v2854_v41 = vmul.f32 %v7885_v0, %v2818_v19  ;;  %v1825_v30 = vmul.f32 %v7193_v14, %v1789_v40  ;;  %v1826_v12 = vmul.f32 %v7193_v14, %v1790_v29  ;;  %v1926_v4 = vmul.f32 %v7795_v39, %v7197_v15 }
 0x1af   : > { %v1464_v59 = vpop.f32.mrb[60].mxu0  ;;  %v2713_v56 = vadd.f32 %v2681_v48, %v2611_v51  ;;  %v2714_v13 = vadd.f32 %v2682_v42, %v2612_v22  ;;  %v2181_v47 = vmul.f32 %v7773_v53, %v7826_v18  ;;  %v2182_v63 = vmul.f32 %v7779_v7, %v7858_v33  ;;  %v7912_v42 = vld [vmem:[#allocation2 + $0xbf] sm:$0xff] }
 0x1b0   : > { %1510 = vst.msk [vmem:[#allocation2 + $0x108] sm:$0xff] %vm1473_vm0, %v1464_v59  ;;  %v1466_v6 = vpop.f32.mrb[61].mxu0  ;;  %v2545_v10 = vmul.f32 %v7854_v45, %v7826_v18  ;;  %v2546_v25 = vmul.f32 %v7860_v32, %v7858_v33  ;;  %v1957_v39 = vadd.f32 %v1925_v31, %v1825_v30  ;;  %v1958_v38 = vadd.f32 %v1926_v4, %v1826_v12  ;;  %v7910_v59 = vld [vmem:[#allocation2 + $0xb7] sm:$0xff] }
 0x1b1   : > { %v2783_v48 = vadd.f32 %v2751_v16, %v2713_v56  ;;  %v2784_v36 = vadd.f32 %v2752_v20, %v2714_v13  ;;  %v2217_v53 = vmul.f32 %v7208_v26, %v2181_v47  ;;  %v2218_v7 = vmul.f32 %v7208_v26, %v2182_v63  ;;  %v7921_v31 = vld [vmem:[#allocation2 + $0xb8] sm:$0xff]  ;;  %v7931_v13 = vpop.permute.xlu1 %1728 }
 0x1b2   : > { %v2449_v19 = vmul.f32 %v7238_v49, %v7846_v24  ;;  %v2450_v40 = vmul.f32 %v7238_v49, %v7848_v28  ;;  %v2349_v29 = vmul.f32 %v7218_v34, %v7844_v21  ;;  %v2350_v16 = vmul.f32 %v7218_v34, %v2314_v57  ;;  %v7927_v4 = vld [vmem:[#allocation2 + $0xb9] sm:$0xff] }
 0x1b3   : > { %v1469_v37 = vpop.f32.mrb[62].mxu0  ;;  %v2885_v20 = vadd.f32 %v2853_v50, %v2783_v48  ;;  %v2886_v6 = vadd.f32 %v2854_v41, %v2784_v36  ;;  %v2249_v51 = vadd.f32 %v2217_v53, %v1957_v39  ;;  %v2250_v22 = vadd.f32 %v2218_v7, %v1958_v38  ;;  %v7934_v57 = vld [vmem:[%s9158_s13] ss:$0 sm:$0xff]  ;;  %v7940_v39 = vpop.permute.xlu0 %2105 }
 0x1b4   : > { %1511 = vst.msk [vmem:[#allocation2 + $0x110] sm:$0xff] %vm1473_vm0, %v1469_v37  ;;  %v1471_v52 = vpop.f32.mrb[63].mxu0  ;;  %v2315_v30 = vmul.f32 %v7910_v59, %v7865_v3  ;;  %v2316_v12 = vmul.f32 %v7912_v42, %v7895_v43  ;;  %v2581_v56 = vmul.f32 %v7248_v60, %v2545_v10  ;;  %v2582_v21 = vmul.f32 %v7248_v60, %v2546_v25  ;;  %v7938_v37 = vld [vmem:[#allocation2 + $0xc1] sm:$0xff] }
 0x1b5   : > { %v2924_v50 = vadd.f32 %v7934_v57, %v2885_v20  ;;  %v2925_v41 = vadd.f32 %v7934_v57, %v2886_v6  ;;  %v2381_v47 = vadd.f32 %v2349_v29, %v2249_v51  ;;  %v2382_v63 = vadd.f32 %v2350_v16, %v2250_v22  ;;  %v7942_v38 = vld [vmem:[#allocation2 + $0xc0] sm:$0xff] }
 0x1b6   : > { %v7946_v10 = vmul.f32 %v7238_v49, %v7921_v31  ;;  %v2647_v25 = vmul.f32 %v7910_v59, %v7757_v58  ;;  %v2648_v52 = vmul.f32 %v7912_v42, %v7776_v54  ;;  %v2753_v48 = vmul.f32 %v7290_v55, %v7921_v31 }
 0x1b7   : > { %v2948_v36 = vpack.c.bf16 %v2925_v41, %v2924_v50  ;;  %v2481_v53 = vadd.f32 %v2449_v19, %v2381_v47  ;;  %v2482_v7 = vadd.f32 %v2450_v40, %v2382_v63  ;;  %v2819_v29 = vmul.f32 %v7927_v4, %v7826_v18  ;;  %v7975_v63 = vpop.permute.xlu0 %2115 }
 0x1b8   : > { %v2683_v16 = vmul.f32 %v7252_v61, %v2647_v25  ;;  %v2684_v20 = vmul.f32 %v7252_v61, %v2648_v52  ;;  %v2820_v6 = vmul.f32 %v7938_v37, %v7858_v33  ;;  %v1791_v58 = vmul.f32 %v7829_v23, %v7865_v3  ;;  %v2111_v23 = vpop.permute.xlu1 %2110 }
 0x1b9   : > { %6199 = vmatprep.mubr.msk.bf16.mxu1 %vm1473_vm0, %v2948_v36  ;;  %v2613_v54 = vadd.f32 %v2581_v56, %v2481_v53  ;;  %v2614_v51 = vadd.f32 %v2582_v21, %v2482_v7  ;;  %v2754_v19 = vmul.f32 %v7290_v55, %v7942_v38  ;;  %v1792_v18 = vmul.f32 %v7834_v5, %v7895_v43 }
 0x1ba   : > { %v2855_v40 = vmul.f32 %v7885_v0, %v2819_v29  ;;  %v2856_v22 = vmul.f32 %v7885_v0, %v2820_v6  ;;  %v1827_v50 = vmul.f32 %v7193_v14, %v1791_v58  ;;  %v1927_v33 = vmul.f32 %v7846_v24, %v7197_v15 }
 0x1bb   : > { %v2715_v41 = vadd.f32 %v2683_v16, %v2613_v54  ;;  %v2716_v47 = vadd.f32 %v2684_v20, %v2614_v51  ;;  %v1828_v56 = vmul.f32 %v7193_v14, %v1792_v18  ;;  %v2183_v21 = vmul.f32 %v7854_v45, %v7940_v39  ;;  %v7984_v16 = vld [vmem:[#allocation2 + $0xc7] sm:$0xff]  ;;  %v7986_v45 = vld [vmem:[#allocation2 + $0xcf] sm:$0xff] }
 0x1bc   : > { %v2547_v5 = vmul.f32 %v7927_v4, %v7940_v39  ;;  %v2548_v25 = vmul.f32 %v7938_v37, %v2111_v23  ;;  %v1928_v52 = vmul.f32 %v7848_v28, %v7197_v15  ;;  %v2184_v24 = vmul.f32 %v7860_v32, %v2111_v23  ;;  %v7988_v20 = vld [vmem:[#allocation2 + $0xc9] sm:$0xff] }
 0x1bd   : > { %v2785_v36 = vadd.f32 %v2753_v48, %v2715_v41  ;;  %v2786_v53 = vadd.f32 %v2754_v19, %v2716_v47  ;;  %v1959_v7 = vadd.f32 %v1927_v33, %v1827_v50  ;;  %v2219_v29 = vmul.f32 %v7208_v26, %v2183_v21  ;;  %v7999_v41 = vld [vmem:[#allocation2 + $0xd1] sm:$0xff]  ;;  %v8010_v21 = vpop.permute.xlu0 %1733 }
 0x1be   : > { %v1960_v6 = vadd.f32 %v1928_v52, %v1828_v56  ;;  %v2220_v58 = vmul.f32 %v7208_v26, %v2184_v24  ;;  %v2351_v54 = vmul.f32 %v7218_v34, %v2315_v30  ;;  %v2352_v28 = vmul.f32 %v7218_v34, %v2316_v12  ;;  %v8005_v12 = vpop.permute.xlu1 %2120  ;;  %v8012_v24 = vld [vmem:[#allocation2 + $0xc8] sm:$0xff] }
 0x1bf   : > { %v2452_v32 = vmul.f32 %v7238_v49, %v7942_v38  ;;  %v2887_v48 = vadd.f32 %v2855_v40, %v2785_v36  ;;  %v2888_v51 = vadd.f32 %v2856_v22, %v2786_v53  ;;  %v2251_v19 = vadd.f32 %v2219_v29, %v1959_v7 }
 0x1c0   : > { %v2252_v18 = vadd.f32 %v2220_v58, %v1960_v6  ;;  %v2317_v50 = vmul.f32 %v7984_v16, %v7901_v62  ;;  %v2318_v33 = vmul.f32 %v7986_v45, %v7931_v13  ;;  %v8003_v30 = vmul.f32 %v7988_v20, %v7975_v63 }
 0x1c1   : > { %v2926_v47 = vadd.f32 %v7934_v57, %v2887_v48  ;;  %v2927_v40 = vadd.f32 %v7934_v57, %v2888_v51  ;;  %v2383_v22 = vadd.f32 %v2351_v54, %v2251_v19  ;;  %v2583_v56 = vmul.f32 %v7248_v60, %v2547_v5 }
 0x1c2   : > { %v2384_v52 = vadd.f32 %v2352_v28, %v2252_v18  ;;  %v2584_v36 = vmul.f32 %v7248_v60, %v2548_v25  ;;  %v2649_v53 = vmul.f32 %v7984_v16, %v7865_v3  ;;  %v2650_v7 = vmul.f32 %v7986_v45, %v7895_v43  ;;  %v8028_v3 = vld [vmem:[#allocation2 + $0xd0] sm:$0xff] }
 0x1c3   : > { %v2949_v29 = vpack.c.bf16 %v2927_v40, %v2926_v47  ;;  %v2483_v6 = vadd.f32 %v7946_v10, %v2383_v22  ;;  %v2550_v58 = vmul.f32 %v7999_v41, %v8005_v12  ;;  %v2821_v5 = vmul.f32 %v7988_v20, %v7940_v39  ;;  %v8041_v47 = vpop.permute.xlu1 %1738 }
 0x1c4   : > { %v2484_v54 = vadd.f32 %v2452_v32, %v2384_v52  ;;  %v2685_v28 = vmul.f32 %v7252_v61, %v2649_v53  ;;  %v2686_v25 = vmul.f32 %v7252_v61, %v2650_v7  ;;  %v2822_v48 = vmul.f32 %v7999_v41, %v2111_v23 }
 0x1c5   : > { %6200 = vmatmul.mubr.msk.bf16.gmra.mrb[16].mxu1 %vm1473_vm0, %v2949_v29  ;;  %v2615_v43 = vadd.f32 %v2583_v56, %v2483_v6  ;;  %v2755_v10 = vmul.f32 %v7290_v55, %v8012_v24  ;;  %v1793_v51 = vmul.f32 %v7910_v59, %v7901_v62  ;;  %v1794_v39 = vmul.f32 %v7912_v42, %v7931_v13  ;;  %v8047_v42 = vpop.permute.xlu0 %1743 }
 0x1c6   : > { %v2616_v32 = vadd.f32 %v2584_v36, %v2484_v54  ;;  %v2857_v19 = vmul.f32 %v7885_v0, %v2821_v5  ;;  %v1929_v23 = vmul.f32 %v7921_v31, %v7197_v15  ;;  %v1930_v18 = vmul.f32 %v7942_v38, %v7197_v15  ;;  %v8055_v5 = vld [vmem:[#allocation2 + $0xd7] sm:$0xff]  ;;  %v8057_v54 = vld [vmem:[#allocation2 + $0xdf] sm:$0xff] }
 0x1c7   : > { %v2717_v40 = vadd.f32 %v2685_v28, %v2615_v43  ;;  %v1829_v22 = vmul.f32 %v7193_v14, %v1793_v51  ;;  %v1830_v56 = vmul.f32 %v7193_v14, %v1794_v39  ;;  %v2185_v59 = vmul.f32 %v7927_v4, %v7975_v63 }
 0x1c8   : > { %v2718_v52 = vadd.f32 %v2686_v25, %v2616_v32  ;;  %v2756_v36 = vmul.f32 %v7290_v55, %v8028_v3  ;;  %v2858_v31 = vmul.f32 %v7885_v0, %v2822_v48  ;;  %v2186_v38 = vmul.f32 %v7938_v37, %v8005_v12 }
 0x1c9   : > { %v2787_v53 = vadd.f32 %v2755_v10, %v2717_v40  ;;  %v1961_v7 = vadd.f32 %v1929_v23, %v1829_v22  ;;  %v1962_v29 = vadd.f32 %v1930_v18, %v1830_v56  ;;  %v2221_v6 = vmul.f32 %v7208_v26, %v2185_v59  ;;  %v8070_v40 = vld [vmem:[#allocation2 + $0xd8] sm:$0xff] }
 0x1ca   : > { %v2788_v4 = vadd.f32 %v2756_v36, %v2718_v52  ;;  %v2222_v28 = vmul.f32 %v7208_v26, %v2186_v38  ;;  %v2353_v25 = vmul.f32 %v7218_v34, %v2317_v50  ;;  %v2354_v43 = vmul.f32 %v7218_v34, %v2318_v33  ;;  %v8072_v50 = vld [vmem:[#allocation2 + $0xd9] sm:$0xff]  ;;  %v8074_v33 = vpop.permute.xlu1 %1748  ;;  %v8080_v52 = vpop.permute.xlu0 %2125 }
 0x1cb   : > { %v2453_v48 = vmul.f32 %v7238_v49, %v8012_v24  ;;  %v2454_v37 = vmul.f32 %v7238_v49, %v8028_v3  ;;  %v2889_v10 = vadd.f32 %v2857_v19, %v2787_v53  ;;  %v2253_v51 = vadd.f32 %v2221_v6, %v1961_v7  ;;  %v8083_v38 = vld [vmem:[#allocation2 + $0xe0] sm:$0xff] }
 0x1cc   : > { %v2890_v39 = vadd.f32 %v2858_v31, %v2788_v4  ;;  %v2254_v32 = vadd.f32 %v2222_v28, %v1962_v29  ;;  %v2319_v23 = vmul.f32 %v8055_v5, %v8010_v21  ;;  %v2320_v18 = vmul.f32 %v8057_v54, %v8041_v47  ;;  %v8085_v53 = vld [vmem:[#allocation2 + $0xe1] sm:$0xff] }
 0x1cd   : > { %v2928_v22 = vadd.f32 %v7934_v57, %v2889_v10  ;;  %v2385_v56 = vadd.f32 %v2353_v25, %v2253_v51  ;;  %v2585_v19 = vmul.f32 %v7248_v60, %v8003_v30  ;;  %v2586_v59 = vmul.f32 %v7248_v60, %v2550_v58 }
 0x1ce   : > { %v2929_v36 = vadd.f32 %v7934_v57, %v2890_v39  ;;  %v2386_v31 = vadd.f32 %v2354_v43, %v2254_v32  ;;  %v2651_v7 = vmul.f32 %v8055_v5, %v7901_v62  ;;  %v2652_v29 = vmul.f32 %v8057_v54, %v7931_v13 }
 0x1cf   : > { %v2485_v6 = vadd.f32 %v2453_v48, %v2385_v56  ;;  %v2551_v30 = vmul.f32 %v8072_v50, %v8080_v52  ;;  %v2757_v58 = vmul.f32 %v7290_v55, %v8070_v40  ;;  %v2823_v4 = vmul.f32 %v8072_v50, %v7975_v63 }
 0x1d0   : > { %v2950_v28 = vpack.c.bf16 %v2929_v36, %v2928_v22  ;;  %v2486_v25 = vadd.f32 %v2454_v37, %v2386_v31  ;;  %v2687_v43 = vmul.f32 %v7252_v61, %v2651_v7  ;;  %v2688_v10 = vmul.f32 %v7252_v61, %v2652_v29  ;;  %v2131_v22 = vpop.permute.xlu1 %2130 }
 0x1d1   : > { %v2617_v62 = vadd.f32 %v2585_v19, %v2485_v6  ;;  %v2758_v13 = vmul.f32 %v7290_v55, %v8083_v38  ;;  %v2824_v48 = vmul.f32 %v8085_v53, %v8005_v12  ;;  %v1795_v51 = vmul.f32 %v7984_v16, %v8010_v21 }
 0x1d2   : > { %6203 = vmatprep.mubr.msk.bf16.mxu1 %vm1473_vm0, %v2950_v28  ;;  %v2618_v39 = vadd.f32 %v2586_v59, %v2486_v25  ;;  %v2859_v63 = vmul.f32 %v7885_v0, %v2823_v4  ;;  %v1796_v37 = vmul.f32 %v7986_v45, %v8041_v47  ;;  %v1931_v32 = vmul.f32 %v8012_v24, %v7197_v15  ;;  %v8121_v4 = vld [vmem:[#allocation2 + $0xe7] sm:$0xff] }
 0x1d3   : > { %v2719_v56 = vadd.f32 %v2687_v43, %v2617_v62  ;;  %v1831_v19 = vmul.f32 %v7193_v14, %v1795_v51  ;;  %v1932_v12 = vmul.f32 %v8028_v3, %v7197_v15  ;;  %v2187_v16 = vmul.f32 %v7988_v20, %v8080_v52  ;;  %v8124_v20 = vld [vmem:[#allocation2 + $0xef] sm:$0xff] }
 0x1d4   : > { %v2720_v36 = vadd.f32 %v2688_v10, %v2618_v39  ;;  %v2860_v59 = vmul.f32 %v7885_v0, %v2824_v48  ;;  %v1832_v31 = vmul.f32 %v7193_v14, %v1796_v37  ;;  %v2188_v45 = vmul.f32 %v7999_v41, %v2131_v22  ;;  %v8134_v37 = vld [vmem:[#allocation2 + $0xe8] sm:$0xff] }
 0x1d5   : > { %v2552_v7 = vmul.f32 %v8085_v53, %v2131_v22  ;;  %v2789_v24 = vadd.f32 %v2757_v58, %v2719_v56  ;;  %v1963_v29 = vadd.f32 %v1931_v32, %v1831_v19  ;;  %v2223_v6 = vmul.f32 %v7208_v26, %v2187_v16  ;;  %v8136_v32 = vld [vmem:[#allocation2 + $0xf0] sm:$0xff]  ;;  %v8146_v16 = vpop.permute.xlu1 %2140 }
 0x1d6   : > { %v2790_v28 = vadd.f32 %v2758_v13, %v2720_v36  ;;  %v1964_v3 = vadd.f32 %v1932_v12, %v1832_v31  ;;  %v2224_v25 = vmul.f32 %v7208_v26, %v2188_v45  ;;  %v2355_v43 = vmul.f32 %v7218_v34, %v2319_v23  ;;  %v8138_v23 = vpop.permute.xlu0 %2135  ;;  %v8143_v19 = vld [vmem:[#allocation2 + $0xe9] sm:$0xff]  ;;  %v8149_v31 = vld [vmem:[#allocation2 + $0xf1] sm:$0xff] }
 0x1d7   : > { %v2455_v10 = vmul.f32 %v7238_v49, %v8070_v40  ;;  %v2891_v41 = vadd.f32 %v2859_v63, %v2789_v24  ;;  %v2255_v62 = vadd.f32 %v2223_v6, %v1963_v29  ;;  %v2356_v58 = vmul.f32 %v7218_v34, %v2320_v18 }
 0x1d8   : > { %v2456_v48 = vmul.f32 %v7238_v49, %v8083_v38  ;;  %v2892_v51 = vadd.f32 %v2860_v59, %v2790_v28  ;;  %v2256_v39 = vadd.f32 %v2224_v25, %v1964_v3  ;;  %v2321_v13 = vmul.f32 %v8121_v4, %v8047_v42 }
 0x1d9   : > { %v2930_v56 = vadd.f32 %v7934_v57, %v2891_v41  ;;  %v2322_v63 = vmul.f32 %v8124_v20, %v8074_v33  ;;  %v2387_v18 = vadd.f32 %v2355_v43, %v2255_v62  ;;  %v2587_v12 = vmul.f32 %v7248_v60, %v2551_v30 }
 0x1da   : > { %v2931_v36 = vadd.f32 %v7934_v57, %v2892_v51  ;;  %v2388_v59 = vadd.f32 %v2356_v58, %v2256_v39  ;;  %v2588_v45 = vmul.f32 %v7248_v60, %v2552_v7  ;;  %v2653_v24 = vmul.f32 %v8121_v4, %v8010_v21 }
 0x1db   : > { %v2487_v29 = vadd.f32 %v2455_v10, %v2387_v18  ;;  %v2654_v6 = vmul.f32 %v8124_v20, %v8041_v47  ;;  %v2759_v28 = vmul.f32 %v7290_v55, %v8134_v37  ;;  %v2760_v30 = vmul.f32 %v7290_v55, %v8136_v32  ;;  %v8179_v18 = vpop.permute.xlu1 %1758 }
 0x1dc   : > { %v2951_v3 = vpack.c.bf16 %v2931_v36, %v2930_v56  ;;  %v2488_v25 = vadd.f32 %v2456_v48, %v2388_v59  ;;  %v2689_v43 = vmul.f32 %v7252_v61, %v2653_v24  ;;  %v2825_v7 = vmul.f32 %v8143_v19, %v8080_v52  ;;  %v8173_v52 = vpop.permute.xlu0 %1753 }
 0x1dd   : > { %v2619_v41 = vadd.f32 %v2587_v12, %v2487_v29  ;;  %v2690_v21 = vmul.f32 %v7252_v61, %v2654_v6  ;;  %v2826_v10 = vmul.f32 %v8149_v31, %v2131_v22  ;;  %v1797_v47 = vmul.f32 %v8055_v5, %v8047_v42 }
 0x1de   : > { %6204 = vmatmul.mubr.msk.bf16.gmra.mrb[20].mxu1 %vm1473_vm0, %v2951_v3  ;;  %v2620_v62 = vadd.f32 %v2588_v45, %v2488_v25  ;;  %v2861_v58 = vmul.f32 %v7885_v0, %v2825_v7  ;;  %v1798_v48 = vmul.f32 %v8057_v54, %v8074_v33  ;;  %v1933_v51 = vmul.f32 %v8070_v40, %v7197_v15 }
 0x1df   : > { %v2721_v39 = vadd.f32 %v2689_v43, %v2619_v41  ;;  %v2862_v56 = vmul.f32 %v7885_v0, %v2826_v10  ;;  %v1833_v22 = vmul.f32 %v7193_v14, %v1797_v47  ;;  %v1934_v5 = vmul.f32 %v8083_v38, %v7197_v15  ;;  %v8192_v43 = vld [vmem:[#allocation2 + $0xf7] sm:$0xff]  ;;  %v8198_v47 = vld [vmem:[#allocation2 + $0xff] sm:$0xff] }
 0x1e0   : > { %v2722_v12 = vadd.f32 %v2690_v21, %v2620_v62  ;;  %v1834_v36 = vmul.f32 %v7193_v14, %v1798_v48  ;;  %v2189_v54 = vmul.f32 %v8072_v50, %v8138_v23  ;;  %v2190_v40 = vmul.f32 %v8085_v53, %v8146_v16  ;;  %v8202_v62 = vpop.permute.xlu0 %1763 }
 0x1e1   : > { %v2553_v59 = vmul.f32 %v8143_v19, %v8138_v23  ;;  %v2554_v45 = vmul.f32 %v8149_v31, %v8146_v16  ;;  %v2791_v24 = vadd.f32 %v2759_v28, %v2721_v39  ;;  %v1965_v29 = vadd.f32 %v1933_v51, %v1833_v22  ;;  %v8212_v39 = vpop.permute.xlu1 %1768 }
 0x1e2   : > { %v2792_v38 = vadd.f32 %v2760_v30, %v2722_v12  ;;  %v1966_v6 = vadd.f32 %v1934_v5, %v1834_v36  ;;  %v2225_v3 = vmul.f32 %v7208_v26, %v2189_v54  ;;  %v2226_v25 = vmul.f32 %v7208_v26, %v2190_v40  ;;  %v8200_v30 = vld [vmem:[#allocation2 + $0xf8] sm:$0xff]  ;;  %v8215_v12 = vld [vmem:[#allocation2 + $0x101] sm:$0xff] }
 0x1e3   : > { %v2893_v50 = vadd.f32 %v2861_v58, %v2791_v24  ;;  %v2357_v7 = vmul.f32 %v7218_v34, %v2321_v13  ;;  %v2358_v53 = vmul.f32 %v7218_v34, %v2322_v63  ;;  %v2457_v41 = vmul.f32 %v7238_v49, %v8134_v37  ;;  %v8209_v63 = vld [vmem:[#allocation2 + $0xf9] sm:$0xff] }
 0x1e4   : > { %v2894_v21 = vadd.f32 %v2862_v56, %v2792_v38  ;;  %v2257_v10 = vadd.f32 %v2225_v3, %v1965_v29  ;;  %v2258_v28 = vadd.f32 %v2226_v25, %v1966_v6  ;;  %v2458_v48 = vmul.f32 %v7238_v49, %v8136_v32  ;;  %v8220_v40 = vld [vmem:[#allocation2 + $0x100] sm:$0xff] }
 0x1e5   : > { %v2932_v58 = vadd.f32 %v7934_v57, %v2893_v50  ;;  %v2323_v13 = vmul.f32 %v8192_v43, %v8173_v52  ;;  %v2589_v51 = vmul.f32 %v7248_v60, %v2553_v59  ;;  %v2590_v36 = vmul.f32 %v7248_v60, %v2554_v45 }
 0x1e6   : > { %v2933_v56 = vadd.f32 %v7934_v57, %v2894_v21  ;;  %v2389_v22 = vadd.f32 %v2357_v7, %v2257_v10  ;;  %v2390_v5 = vadd.f32 %v2358_v53, %v2258_v28  ;;  %v2324_v54 = vmul.f32 %v8198_v47, %v8179_v18  ;;  %v2146_v21 = vpop.permute.xlu0 %2145 }
 0x1e7   : > { %v2655_v24 = vmul.f32 %v8192_v43, %v8047_v42  ;;  %v2656_v59 = vmul.f32 %v8198_v47, %v8074_v33  ;;  %v2761_v29 = vmul.f32 %v7290_v55, %v8200_v30  ;;  %v2827_v45 = vmul.f32 %v8209_v63, %v8138_v23 }
 0x1e8   : > { %v2952_v38 = vpack.c.bf16 %v2933_v56, %v2932_v58  ;;  %v2489_v6 = vadd.f32 %v2457_v41, %v2389_v22  ;;  %v2490_v3 = vadd.f32 %v2458_v48, %v2390_v5  ;;  %v2828_v7 = vmul.f32 %v8215_v12, %v8146_v16  ;;  %v2151_v48 = vpop.permute.xlu1 %2150 }
 0x1e9   : > { %v2691_v25 = vmul.f32 %v7252_v61, %v2655_v24  ;;  %v2692_v50 = vmul.f32 %v7252_v61, %v2656_v59  ;;  %v1799_v42 = vmul.f32 %v8121_v4, %v8173_v52  ;;  %v2762_v41 = vmul.f32 %v7290_v55, %v8220_v40 }
 0x1ea   : > { %6207 = vmatprep.mubr.msk.bf16.mxu1 %vm1473_vm0, %v2952_v38  ;;  %v2621_v33 = vadd.f32 %v2589_v51, %v2489_v6  ;;  %v2622_v53 = vadd.f32 %v2590_v36, %v2490_v3  ;;  %v1800_v23 = vmul.f32 %v8124_v20, %v8179_v18  ;;  %v2863_v10 = vmul.f32 %v7885_v0, %v2827_v45  ;;  %v2293_v3 = vld [vmem:[#allocation2 + $0x107] sm:$0xff]  ;;  %v2294_v45 = vld [vmem:[#allocation2 + $0x10f] sm:$0xff] }
 0x1eb   : > { %v2864_v28 = vmul.f32 %v7885_v0, %v2828_v7  ;;  %v1835_v16 = vmul.f32 %v7193_v14, %v1799_v42  ;;  %v1935_v4 = vmul.f32 %v8134_v37, %v7197_v15  ;;  %v2191_v22 = vmul.f32 %v8143_v19, %v2146_v21 }
 0x1ec   : > { %v2723_v58 = vadd.f32 %v2691_v25, %v2621_v33  ;;  %v2724_v51 = vadd.f32 %v2692_v50, %v2622_v53  ;;  %v1836_v56 = vmul.f32 %v7193_v14, %v1800_v23  ;;  %v2555_v5 = vmul.f32 %v8209_v63, %v2146_v21 }
 0x1ed   : > { %v2556_v20 = vmul.f32 %v8215_v12, %v2151_v48  ;;  %v1936_v36 = vmul.f32 %v8136_v32, %v7197_v15  ;;  %v2192_v24 = vmul.f32 %v8149_v31, %v2151_v48  ;;  %v1967_v6 = vadd.f32 %v1935_v4, %v1835_v16  ;;  %v2525_v16 = vld [vmem:[#allocation2 + $0x109] sm:$0xff] }
 0x1ee   : > { %v2793_v59 = vadd.f32 %v2761_v29, %v2723_v58  ;;  %v2794_v38 = vadd.f32 %v2762_v41, %v2724_v51  ;;  %v2227_v37 = vmul.f32 %v7208_v26, %v2191_v22  ;;  %v2359_v19 = vmul.f32 %v7218_v34, %v2323_v13  ;;  %v2526_v58 = vld [vmem:[#allocation2 + $0x111] sm:$0xff] }
 0x1ef   : > { %v1968_v25 = vadd.f32 %v1936_v36, %v1836_v56  ;;  %v2228_v50 = vmul.f32 %v7208_v26, %v2192_v24  ;;  %v2360_v7 = vmul.f32 %v7218_v34, %v2324_v54  ;;  %v2459_v42 = vmul.f32 %v7238_v49, %v8200_v30  ;;  %v2425_v56 = vld [vmem:[#allocation2 + $0x108] sm:$0xff] }
 0x1f0   : > { %v2895_v32 = vadd.f32 %v2863_v10, %v2793_v59  ;;  %v2896_v33 = vadd.f32 %v2864_v28, %v2794_v38  ;;  %v2259_v31 = vadd.f32 %v2227_v37, %v1967_v6  ;;  %v2460_v29 = vmul.f32 %v7238_v49, %v8220_v40  ;;  %v8266_v10 = vpop.permute.xlu0 %2155  ;;  %v2426_v38 = vld [vmem:[#allocation2 + $0x110] sm:$0xff] }
 0x1f1   : > { %v2260_v53 = vadd.f32 %v2228_v50, %v1968_v25  ;;  %v2325_v41 = vmul.f32 %v2293_v3, %v8202_v62  ;;  %v2326_v23 = vmul.f32 %v2294_v45, %v8212_v39  ;;  %v2591_v51 = vmul.f32 %v7248_v60, %v2555_v5 }
 0x1f2   : > { %v2934_v4 = vadd.f32 %v7934_v57, %v2895_v32  ;;  %v2935_v13 = vadd.f32 %v7934_v57, %v2896_v33  ;;  %v2391_v54 = vadd.f32 %v2359_v19, %v2259_v31  ;;  %v2592_v22 = vmul.f32 %v7248_v60, %v2556_v20 }
 0x1f3   : > { %v2392_v28 = vadd.f32 %v2360_v7, %v2260_v53  ;;  %v2657_v36 = vmul.f32 %v2293_v3, %v8173_v52  ;;  %v2658_v24 = vmul.f32 %v2294_v45, %v8179_v18  ;;  %v2557_v37 = vmul.f32 %v2525_v16, %v8266_v10  ;;  %v2628_v53 = vld [vmem:[#allocation2 + $0x11f] sm:$0xff] }
 0x1f4   : > { %v2953_v59 = vpack.c.bf16 %v2935_v13, %v2934_v4  ;;  %v2491_v6 = vadd.f32 %v2459_v42, %v2391_v54  ;;  %v2829_v25 = vmul.f32 %v2525_v16, %v2146_v21  ;;  %v2830_v32 = vmul.f32 %v2526_v58, %v2151_v48  ;;  %v2161_v48 = vpop.permute.xlu1 %2160 }
 0x1f5   : > { %v2492_v50 = vadd.f32 %v2460_v29, %v2392_v28  ;;  %v2693_v19 = vmul.f32 %v7252_v61, %v2657_v36  ;;  %v2694_v5 = vmul.f32 %v7252_v61, %v2658_v24  ;;  %v2763_v20 = vmul.f32 %v7290_v55, %v2425_v56  ;;  %v2627_v24 = vld [vmem:[#allocation2 + $0x117] sm:$0xff] }
 0x1f6   : > { %6208 = vmatmul.mubr.msk.bf16.gmra.mrb[24].mxu1 %vm1473_vm0, %v2953_v59  ;;  %v2623_v7 = vadd.f32 %v2591_v51, %v2491_v6  ;;  %v1801_v52 = vmul.f32 %v8192_v43, %v8202_v62  ;;  %v1802_v18 = vmul.f32 %v8198_v47, %v8212_v39  ;;  %v2764_v21 = vmul.f32 %v7290_v55, %v2426_v38 }
 0x1f7   : > { %v2624_v3 = vadd.f32 %v2592_v22, %v2492_v50  ;;  %v2865_v45 = vmul.f32 %v7885_v0, %v2829_v25  ;;  %v1937_v42 = vmul.f32 %v8200_v30, %v7197_v15  ;;  %v2193_v43 = vmul.f32 %v8209_v63, %v8266_v10 }
 0x1f8   : > { %v2725_v33 = vadd.f32 %v2693_v19, %v2623_v7  ;;  %v1837_v31 = vmul.f32 %v7193_v14, %v1801_v52  ;;  %v1838_v29 = vmul.f32 %v7193_v14, %v1802_v18  ;;  %v2866_v47 = vmul.f32 %v7885_v0, %v2830_v32  ;;  %v2729_v7 = vld [vmem:[#allocation2 + $0x118] sm:$0xff] }
 0x1f9   : > { %v2726_v16 = vadd.f32 %v2694_v5, %v2624_v3  ;;  %v1938_v4 = vmul.f32 %v8220_v40, %v7197_v15  ;;  %v2194_v13 = vmul.f32 %v8215_v12, %v2161_v48  ;;  %v2229_v51 = vmul.f32 %v7208_v26, %v2193_v43 }
 0x1fa   : > { %v2795_v54 = vadd.f32 %v2763_v20, %v2725_v33  ;;  %v1969_v30 = vadd.f32 %v1937_v42, %v1837_v31  ;;  %v2361_v28 = vmul.f32 %v7218_v34, %v2325_v41  ;;  %v2362_v63 = vmul.f32 %v7218_v34, %v2326_v23  ;;  %v2800_v20 = vld [vmem:[#allocation2 + $0x121] sm:$0xff] }
 0x1fb   : > { %v2796_v22 = vadd.f32 %v2764_v21, %v2726_v16  ;;  %v1970_v14 = vadd.f32 %v1938_v4, %v1838_v29  ;;  %v2230_v36 = vmul.f32 %v7208_v26, %v2194_v13  ;;  %v2660_v59 = vmul.f32 %v2628_v53, %v8212_v39  ;;  %v2799_v26 = vld [vmem:[#allocation2 + $0x119] sm:$0xff] }
 0x1fc   : > { %v2897_v6 = vadd.f32 %v2865_v45, %v2795_v54  ;;  %v2261_v25 = vadd.f32 %v2229_v51, %v1969_v30  ;;  %v2558_v15 = vmul.f32 %v2526_v58, %v2161_v48  ;;  %v2461_v50 = vmul.f32 %v7238_v49, %v2425_v56  ;;  %v2730_v56 = vld [vmem:[#allocation2 + $0x120] sm:$0xff] }
 0x1fd   : > { %v2898_v40 = vadd.f32 %v2866_v47, %v2796_v22  ;;  %v2262_v12 = vadd.f32 %v2230_v36, %v1970_v14  ;;  %v2593_v5 = vmul.f32 %v7248_v60, %v2557_v37  ;;  %v2659_v41 = vmul.f32 %v2627_v24, %v8202_v62  ;;  %v8317_v54 = vld [vmem:[%s6726_s21] ss:$0 sm:$0xff] }
 0x1fe   : > { %v2393_v19 = vadd.f32 %v2361_v28, %v2261_v25  ;;  %v6694_v32 = vmov 0.0|0.0   ;;  %v2462_v34 = vmul.f32 %v7238_v49, %v2426_v38  ;;  %v2936_v39 = vadd.f32 %v7934_v57, %v2897_v6 }
 0x1ff   : > { %6333 = vmatprep.subr.bf16.mxu1 %v6694_v32  ;;  %v2937_v23 = vadd.f32 %v7934_v57, %v2898_v40  ;;  %v2394_v58 = vadd.f32 %v2362_v63, %v2262_v12  ;;  %v2594_v37 = vmul.f32 %v7248_v60, %v2558_v15  ;;  %v2831_v62 = vmul.f32 %v2799_v26, %v8266_v10 }
 0x200   : > { %v2493_v52 = vadd.f32 %v2461_v50, %v2393_v19  ;;  %v2695_v45 = vmul.f32 %v7252_v61, %v2659_v41  ;;  %v2765_v49 = vmul.f32 %v7290_v55, %v2729_v7  ;;  %v2696_v38 = vmul.f32 %v7252_v61, %v2660_v59 }
 0x201   : > { %v2954_v18 = vpack.c.bf16 %v2937_v23, %v2936_v39  ;;  %v2494_v3 = vadd.f32 %v2462_v34, %v2394_v58  ;;  %v2832_v42 = vmul.f32 %v2800_v20, %v2161_v48  ;;  %v2766_v31 = vmul.f32 %v7290_v55, %v2730_v56 }
 0x202   : > { %v2625_v21 = vadd.f32 %v2593_v5, %v2493_v52  ;;  %v2867_v60 = vmul.f32 %v7885_v0, %v2831_v62 }
 0x203   : > { %6211 = vmatprep.mubr.msk.bf16.mxu1 %vm1473_vm0, %v2954_v18  ;;  %v2626_v33 = vadd.f32 %v2594_v37, %v2494_v3  ;;  %v2868_v10 = vmul.f32 %v7885_v0, %v2832_v42 }
 0x204   : > { %v2727_v29 = vadd.f32 %v2695_v45, %v2625_v21 }
 0x205   : > { %v2728_v43 = vadd.f32 %v2696_v38, %v2626_v33 }
 0x206   : > { %v2797_v53 = vadd.f32 %v2765_v49, %v2727_v29 }
 0x207   : > { %v2798_v16 = vadd.f32 %v2766_v31, %v2728_v43 }
 0x208   : > { %v2899_v47 = vadd.f32 %v2867_v60, %v2797_v53 }
 0x209   : > { %v2900_v4 = vadd.f32 %v2868_v10, %v2798_v16 }
 0x20a   : > { %v2938_v13 = vadd.f32 %v7934_v57, %v2899_v47 }
 0x20b   : > { %v2939_v61 = vadd.f32 %v7934_v57, %v2900_v4 }
 0x20d   : > { %v2955_v48 = vpack.c.bf16 %v2939_v61, %v2938_v13 }
 0x20f   : > { %6212 = vmatmul.mubr.msk.bf16.gmra.mrb[28].mxu1 %vm1473_vm0, %v2955_v48  ;;  %v3240_v48 = vld [vmem:[%s6826_s27 + $0x8] sm:$0xff]  ;;  %vm3255_vm0 = vcmask 916480  }
 0x210   : > { %5950 = vmatprep.mubr.msk.f32.mxu1 %vm3255_vm0, %v3240_v48 }
 0x235   : > { %v6185_v55 = vpop.f32.mrb[0].mxu1 }
 0x236   : > { %v3059_v30 = vadd.f32 %v6185_v55, %v8317_v54  ;;  %v3050_v51 = vpop.f32.mrb[1].mxu1 }
 0x237   : > { %v3051_v28 = vadd.f32 %v8317_v54, %v3050_v51  ;;  %v6186_v22 = vpop.f32.mrb[2].mxu1 }
 0x238   : > { %v3179_v0 = vmax.f32 %v3059_v30, 0.0  ;;  %v3062_v14 = vadd.f32 %v6186_v22, %v8317_v54  ;;  %v3053_v36 = vpop.f32.mrb[3].mxu1 }
 0x239   : > { %v3177_v63 = vmax.f32 %v3051_v28, 0.0  ;;  %v3054_v24 = vadd.f32 %v8317_v54, %v3053_v36 }
 0x23a   : > { %v3180_v57 = vmax.f32 %v3062_v14, 0.0 }
 0x23b   : > { %v3209_v59 = vmax.f32 %v3177_v63, %v3179_v0  ;;  %v3178_v6 = vmax.f32 %v3054_v24, 0.0 }
 0x23d   : > { %v3210_v25 = vmax.f32 %v3178_v6, %v3180_v57 }
 0x23f   : > { %v8323_v15 = vpack.c.bf16 %v3210_v25, %v3209_v59 }
 0x241   : > { %6335 = vmatpush1.bf16.msra.mxu1 %v8323_v15 }
 0x242   : > { %6336 = vmatprep.subr.bf16.mxu1 %v6694_v32 }
 0x24e   : > { %v6189_v40 = vpop.f32.mrb[4].mxu1 }
 0x24f   : > { %v3075_v12 = vadd.f32 %v6189_v40, %v8317_v54  ;;  %v3066_v50 = vpop.f32.mrb[5].mxu1 }
 0x250   : > { %v3067_v19 = vadd.f32 %v8317_v54, %v3066_v50  ;;  %v6190_v5 = vpop.f32.mrb[6].mxu1 }
 0x251   : > { %v3183_v41 = vmax.f32 %v3075_v12, 0.0  ;;  %v3078_v26 = vadd.f32 %v6190_v5, %v8317_v54  ;;  %v3069_v34 = vpop.f32.mrb[7].mxu1 }
 0x252   : > { %v3181_v39 = vmax.f32 %v3067_v19, 0.0  ;;  %v3070_v23 = vadd.f32 %v8317_v54, %v3069_v34 }
 0x253   : > { %v3184_v58 = vmax.f32 %v3078_v26, 0.0 }
 0x254   : > { %v3211_v7 = vmax.f32 %v3179_v0, %v3181_v39  ;;  %v3213_v20 = vmax.f32 %v3181_v39, %v3183_v41  ;;  %v3182_v52 = vmax.f32 %v3070_v23, 0.0 }
 0x256   : > { %v3212_v56 = vmax.f32 %v3180_v57, %v3182_v52  ;;  %v3214_v18 = vmax.f32 %v3182_v52, %v3184_v58 }
 0x258   : > { %v8331_v3 = vpack.c.bf16 %v3212_v56, %v3211_v7  ;;  %v8333_v37 = vpack.c.bf16 %v3214_v18, %v3213_v20 }
 0x25a   : > { %6338 = vmatpush1.bf16.msra.mxu1 %v8331_v3 }
 0x25b   : > { %6339 = vmatprep.subr.bf16.mxu1 %v6694_v32 }
 0x25e   : > { %6341 = vmatpush1.bf16.msra.mxu1 %v8333_v37 }
 0x25f   : > { %6342 = vmatprep.subr.bf16.mxu1 %v6694_v32 }
 0x267   : > { %v6193_v62 = vpop.f32.mrb[8].mxu1 }
 0x268   : > { %v3091_v21 = vadd.f32 %v6193_v62, %v8317_v54  ;;  %v3082_v45 = vpop.f32.mrb[9].mxu1 }
 0x269   : > { %v3083_v49 = vadd.f32 %v8317_v54, %v3082_v45  ;;  %v6194_v38 = vpop.f32.mrb[10].mxu1 }
 0x26a   : > { %v3187_v42 = vmax.f32 %v3091_v21, 0.0  ;;  %v3094_v33 = vadd.f32 %v6194_v38, %v8317_v54  ;;  %v3085_v31 = vpop.f32.mrb[11].mxu1 }
 0x26b   : > { %v3185_v29 = vmax.f32 %v3083_v49, 0.0  ;;  %v3086_v43 = vadd.f32 %v8317_v54, %v3085_v31 }
 0x26c   : > { %v3188_v60 = vmax.f32 %v3094_v33, 0.0 }
 0x26d   : > { %v3215_v53 = vmax.f32 %v3183_v41, %v3185_v29  ;;  %v3217_v10 = vmax.f32 %v3185_v29, %v3187_v42  ;;  %v3186_v16 = vmax.f32 %v3086_v43, 0.0 }
 0x26f   : > { %v3216_v47 = vmax.f32 %v3184_v58, %v3186_v16  ;;  %v3218_v4 = vmax.f32 %v3186_v16, %v3188_v60 }
 0x271   : > { %v8343_v13 = vpack.c.bf16 %v3216_v47, %v3215_v53  ;;  %v8345_v61 = vpack.c.bf16 %v3218_v4, %v3217_v10 }
 0x273   : > { %6344 = vmatpush1.bf16.msra.mxu1 %v8343_v13 }
 0x274   : > { %6345 = vmatprep.subr.bf16.mxu1 %v6694_v32 }
 0x277   : > { %6347 = vmatpush1.bf16.msra.mxu1 %v8345_v61 }
 0x278   : > { %6348 = vmatprep.subr.bf16.mxu1 %v6694_v32 }
 0x280   : > { %v6197_v55 = vpop.f32.mrb[12].mxu1 }
 0x281   : > { %v3107_v30 = vadd.f32 %v6197_v55, %v8317_v54  ;;  %v3098_v51 = vpop.f32.mrb[13].mxu1 }
 0x282   : > { %v3099_v28 = vadd.f32 %v8317_v54, %v3098_v51  ;;  %v6198_v22 = vpop.f32.mrb[14].mxu1 }
 0x283   : > { %v3191_v0 = vmax.f32 %v3107_v30, 0.0  ;;  %v3110_v14 = vadd.f32 %v6198_v22, %v8317_v54  ;;  %v3101_v36 = vpop.f32.mrb[15].mxu1 }
 0x284   : > { %v3189_v63 = vmax.f32 %v3099_v28, 0.0  ;;  %v3102_v24 = vadd.f32 %v8317_v54, %v3101_v36 }
 0x285   : > { %v3192_v57 = vmax.f32 %v3110_v14, 0.0 }
 0x286   : > { %v3219_v59 = vmax.f32 %v3187_v42, %v3189_v63  ;;  %v3221_v6 = vmax.f32 %v3189_v63, %v3191_v0  ;;  %v3190_v25 = vmax.f32 %v3102_v24, 0.0 }
 0x288   : > { %v3220_v40 = vmax.f32 %v3188_v60, %v3190_v25  ;;  %v3222_v12 = vmax.f32 %v3190_v25, %v3192_v57 }
 0x28a   : > { %v8357_v50 = vpack.c.bf16 %v3220_v40, %v3219_v59  ;;  %v8359_v19 = vpack.c.bf16 %v3222_v12, %v3221_v6 }
 0x28c   : > { %6350 = vmatpush1.bf16.msra.mxu1 %v8357_v50 }
 0x28d   : > { %6351 = vmatprep.subr.bf16.mxu1 %v6694_v32 }
 0x290   : > { %6353 = vmatpush1.bf16.msra.mxu1 %v8359_v19 }
 0x291   : > { %6354 = vmatprep.subr.bf16.mxu1 %v6694_v32 }
 0x298   : > { %v6201_v5 = vpop.f32.mrb[16].mxu1 }
 0x299   : > { %v3123_v41 = vadd.f32 %v6201_v5, %v8317_v54  ;;  %v3114_v26 = vpop.f32.mrb[17].mxu1 }
 0x29a   : > { %v3115_v34 = vadd.f32 %v8317_v54, %v3114_v26  ;;  %v6202_v39 = vpop.f32.mrb[18].mxu1 }
 0x29b   : > { %v3195_v23 = vmax.f32 %v3123_v41, 0.0  ;;  %v3126_v58 = vadd.f32 %v6202_v39, %v8317_v54  ;;  %v3117_v7 = vpop.f32.mrb[19].mxu1  ;;  %v6529_v41 = vld [vmem:[%s9163_s3] sm:$0xff]  }
 0x29c   : > { %v3193_v20 = vmax.f32 %v3115_v34, 0.0  ;;  %v3118_v52 = vadd.f32 %v8317_v54, %v3117_v7  ;;  %6215 = vmatprep.subr.bf16.mxu0 %v6529_v41 }
 0x29d   : > { %v3196_v56 = vmax.f32 %v3126_v58, 0.0  ;;  %6216 = vmatpush3.bf16.msra.mxu0 %v6529_v41  ;;  %v5968_v41 = vld [vmem:[%s6826_s27 + $0xd0] sm:$0xff] }
 0x29e   : > { %v3223_v18 = vmax.f32 %v3191_v0, %v3193_v20  ;;  %v3225_v62 = vmax.f32 %v3193_v20, %v3195_v23  ;;  %v3194_v21 = vmax.f32 %v3118_v52, 0.0 }
 0x2a0   : > { %v3224_v45 = vmax.f32 %v3192_v57, %v3194_v21  ;;  %v3226_v49 = vmax.f32 %v3194_v21, %v3196_v56 }
 0x2a2   : > { %v8369_v38 = vpack.c.bf16 %v3224_v45, %v3223_v18  ;;  %v8371_v42 = vpack.c.bf16 %v3226_v49, %v3225_v62 }
 0x2a4   : > { %6356 = vmatpush1.bf16.msra.mxu1 %v8369_v38 }
 0x2a5   : > { %6357 = vmatprep.subr.bf16.mxu1 %v6694_v32 }
 0x2a8   : > { %6359 = vmatpush1.bf16.msra.mxu1 %v8371_v42 }
 0x2a9   : > { %6360 = vmatprep.subr.bf16.mxu1 %v6694_v32 }
 0x2b1   : > { %v6205_v33 = vpop.f32.mrb[20].mxu1 }
 0x2b2   : > { %v3139_v31 = vadd.f32 %v6205_v33, %v8317_v54  ;;  %v3130_v29 = vpop.f32.mrb[21].mxu1 }
 0x2b3   : > { %v3131_v43 = vadd.f32 %v8317_v54, %v3130_v29  ;;  %v6206_v60 = vpop.f32.mrb[22].mxu1 }
 0x2b4   : > { %v3199_v53 = vmax.f32 %v3139_v31, 0.0  ;;  %v3142_v10 = vadd.f32 %v6206_v60, %v8317_v54  ;;  %v3133_v16 = vpop.f32.mrb[23].mxu1 }
 0x2b5   : > { %v3197_v47 = vmax.f32 %v3131_v43, 0.0  ;;  %v3134_v4 = vadd.f32 %v8317_v54, %v3133_v16 }
 0x2b6   : > { %v3200_v48 = vmax.f32 %v3142_v10, 0.0 }
 0x2b7   : > { %v3227_v55 = vmax.f32 %v3195_v23, %v3197_v47  ;;  %v3229_v30 = vmax.f32 %v3197_v47, %v3199_v53  ;;  %v3198_v51 = vmax.f32 %v3134_v4, 0.0 }
 0x2b9   : > { %v3228_v28 = vmax.f32 %v3196_v56, %v3198_v51  ;;  %v3230_v22 = vmax.f32 %v3198_v51, %v3200_v48  ;;  %v3241_v51 = vld [vmem:[%s6826_s27 + $0x10] sm:$0xff] }
 0x2bb   : > { %v8381_v0 = vpack.c.bf16 %v3228_v28, %v3227_v55  ;;  %v8383_v14 = vpack.c.bf16 %v3230_v22, %v3229_v30  ;;  %v3242_v30 = vld [vmem:[%s6826_s27 + $0x18] sm:$0xff]  ;;  %v3244_v28 = vld [vmem:[%s6826_s27 + $0x28] sm:$0xff]  ;;  %v3243_v22 = vld [vmem:[%s6826_s27 + $0x20] sm:$0xff] }
 0x2bd   : > { %6362 = vmatpush1.bf16.msra.mxu1 %v8381_v0 }
 0x2be   : > { %6363 = vmatprep.subr.bf16.mxu1 %v6694_v32 }
 0x2c1   : > { %6365 = vmatpush1.bf16.msra.mxu1 %v8383_v14 }
 0x2c2   : > { %6366 = vmatprep.subr.bf16.mxu1 %v6694_v32 }
 0x2c9   : > { %v6209_v36 = vpop.f32.mrb[24].mxu1 }
 0x2ca   : > { %v3155_v63 = vadd.f32 %v6209_v36, %v8317_v54  ;;  %v3146_v24 = vpop.f32.mrb[25].mxu1  ;;  %v3246_v36 = vld [vmem:[%s6826_s27 + $0x38] sm:$0xff] }
 0x2cb   : > { %v3147_v57 = vadd.f32 %v8317_v54, %v3146_v24  ;;  %v6210_v59 = vpop.f32.mrb[26].mxu1  ;;  %v3250_v24 = vld [vmem:[%s6826_s27 + $0x58] sm:$0xff] }
 0x2cc   : > { %v3203_v6 = vmax.f32 %v3155_v63, 0.0  ;;  %v3158_v25 = vadd.f32 %v6210_v59, %v8317_v54  ;;  %v3149_v40 = vpop.f32.mrb[27].mxu1  ;;  %v3248_v63 = vld [vmem:[%s6826_s27 + $0x48] sm:$0xff]  ;;  %v3254_v59 = vld [vmem:[%s6826_s27 + $0x78] sm:$0xff] }
 0x2cd   : > { %v3201_v12 = vmax.f32 %v3147_v57, 0.0  ;;  %v3150_v5 = vadd.f32 %v8317_v54, %v3149_v40  ;;  %v3252_v57 = vld [vmem:[%s6826_s27 + $0x68] sm:$0xff] }
 0x2ce   : > { %v3204_v26 = vmax.f32 %v3158_v25, 0.0  ;;  %v5964_v25 = vld [vmem:[%s6826_s27 + $0xb0] sm:$0xff]  ;;  %v5967_v40 = vld [vmem:[%s6826_s27 + $0xc8] sm:$0xff] }
 0x2cf   : > { %v3231_v34 = vmax.f32 %v3199_v53, %v3201_v12  ;;  %v3233_v39 = vmax.f32 %v3201_v12, %v3203_v6  ;;  %v3202_v23 = vmax.f32 %v3150_v5, 0.0  ;;  %v5966_v12 = vld [vmem:[%s6826_s27 + $0xc0] sm:$0xff]  ;;  %v5969_v5 = vld [vmem:[%s6826_s27 + $0xd8] sm:$0xff] }
 0x2d1   : > { %v3232_v58 = vmax.f32 %v3200_v48, %v3202_v23  ;;  %v3234_v7 = vmax.f32 %v3202_v23, %v3204_v26  ;;  %v6530_v23 = vld [vmem:[%s9163_s3 + $0x8] sm:$0xff]  }
 0x2d2   : > { %6217 = vmatprep.subr.bf16.mxu0 %v6530_v23 }
 0x2d3   : > { %v8394_v20 = vpack.c.bf16 %v3232_v58, %v3231_v34  ;;  %v8396_v52 = vpack.c.bf16 %v3234_v7, %v3233_v39  ;;  %v5970_v34 = vld [vmem:[%s6826_s27 + $0xe0] sm:$0xff]  ;;  %v5973_v39 = vld [vmem:[%s6826_s27 + $0xf8] sm:$0xff]  ;;  %v6531_v58 = vld [vmem:[%s9163_s3 + $0x10] sm:$0xff]   ;;  %6218 = vmatpush3.bf16.msra.mxu0 %v6530_v23 }
 0x2d4   : > { %v5972_v7 = vld [vmem:[%s6826_s27 + $0xf0] sm:$0xff]  ;;  %6219 = vmatprep.subr.bf16.mxu0 %v6531_v58 }
 0x2d5   : > { %6368 = vmatpush1.bf16.msra.mxu1 %v8394_v20 }
 0x2d6   : > { %6369 = vmatprep.subr.bf16.mxu1 %v6694_v32 }
 0x2d7   : > { %6220 = vmatpush3.bf16.msra.mxu0 %v6531_v58 }
 0x2d9   : > { %6371 = vmatpush1.bf16.msra.mxu1 %v8396_v52 }
 0x2da   : > { %6372 = vmatprep.subr.bf16.mxu1 %v6694_v32 }
 0x2e2   : > { %v6213_v56 = vpop.f32.mrb[28].mxu1 }
 0x2e3   : > { %v3171_v18 = vadd.f32 %v6213_v56, %v8317_v54  ;;  %v3162_v62 = vpop.f32.mrb[29].mxu1  ;;  %v6534_v56 = vld [vmem:[%s9163_s3 + $0x28] sm:$0xff]  }
 0x2e4   : > { %v3163_v21 = vadd.f32 %v8317_v54, %v3162_v62  ;;  %v6214_v45 = vpop.f32.mrb[30].mxu1  ;;  %v6536_v62 = vld [vmem:[%s9163_s3 + $0x38] sm:$0xff]  }
 0x2e5   : > { %v3207_v49 = vmax.f32 %v3171_v18, 0.0  ;;  %v3174_v33 = vadd.f32 %v6214_v45, %v8317_v54  ;;  %v3165_v31 = vpop.f32.mrb[31].mxu1  ;;  %v6535_v18 = vld [vmem:[%s9163_s3 + $0x30] sm:$0xff]  }
 0x2e6   : > { %v3205_v29 = vmax.f32 %v3163_v21, 0.0  ;;  %v3166_v43 = vadd.f32 %v8317_v54, %v3165_v31  ;;  %v3239_v54 = vld [vmem:[%s6826_s27] sm:$0xff] }
 0x2e7   : > { %v3208_v60 = vmax.f32 %v3174_v33, 0.0 }
 0x2e8   : > { %v3235_v53 = vmax.f32 %v3203_v6, %v3205_v29  ;;  %v3237_v10 = vmax.f32 %v3205_v29, %v3207_v49  ;;  %v3206_v16 = vmax.f32 %v3166_v43, 0.0  ;;  %v5959_v6 = vld [vmem:[%s6826_s27 + $0x88] sm:$0xff] }
 0x2ea   : > { %v3236_v47 = vmax.f32 %v3204_v26, %v3206_v16  ;;  %v3238_v4 = vmax.f32 %v3206_v16, %v3208_v60  ;;  %v5971_v26 = vld [vmem:[%s6826_s27 + $0xe8] sm:$0xff] }
 0x2ec   : > { %v8406_v48 = vpack.c.bf16 %v3236_v47, %v3235_v53  ;;  %v8408_v55 = vpack.c.bf16 %v3238_v4, %v3237_v10 }
 0x2ee   : > { %6374 = vmatpush1.bf16.msra.mxu1 %v8406_v48 }
 0x2ef   : > { %6375 = vmatprep.subr.bf16.mxu1 %v6694_v32 }
 0x2f2   : > { %6377 = vmatpush1.bf16.msra.mxu1 %v8408_v55 }
 0x2f3   : > { %6378 = vmatprep.subr.bf16.mxu1 %v6694_v32 }
 0x2f5   : > { %3345 = vmatmul.mubr.f32.vlgmr.msra.gmra.mrb[32].mxu1 %v3239_v54 }
 0x2f6   : > { %6380 = vmatpush1.bf16.msra.mxu1 %v8323_v15  ;;  %5951 = vmatprep.mubr.msk.f32.mxu1 %vm3255_vm0, %v3242_v30  ;;  %v3245_v15 = vld [vmem:[%s6826_s27 + $0x30] sm:$0xff]  ;;  %v8507_v30 = vpop.permute.xlu1 %3585 }
 0x2f7   : > { %6381 = vmatprep.subr.bf16.mxu1 %v6694_v32 }
 0x2f9   : > { %3350 = vmatmul.mubr.f32.gmra.mrb[34].mxu1 %v3241_v51  ;;  %v3581_v51 = vpop.permute.xlu0 %3580 }
 0x2fa   : > { %6383 = vmatpush1.bf16.msra.mxu1 %v8331_v3  ;;  %5952 = vmatprep.mubr.msk.f32.mxu1 %vm3255_vm0, %v3244_v28  ;;  %v3247_v3 = vld [vmem:[%s6826_s27 + $0x40] sm:$0xff] }
 0x2fb   : > { %6384 = vmatprep.subr.bf16.mxu1 %v6694_v32  ;;  %v3551_v28 = vld [vmem:[%s6731_s25] sm:$0xff] }
 0x2fd   : > { %3355 = vmatmul.mubr.f32.gmra.mrb[36].mxu1 %v3243_v22  ;;  %v3570_v22 = vld [vmem:[#allocation3 + $0x7] sm:$0xff] }
 0x2fe   : > { %6386 = vmatpush1.bf16.msra.mxu1 %v8333_v37  ;;  %5953 = vmatprep.mubr.msk.f32.mxu1 %vm3255_vm0, %v3246_v36  ;;  %v3249_v37 = vld [vmem:[%s6826_s27 + $0x50] sm:$0xff] }
 0x2ff   : > { %6387 = vmatprep.subr.bf16.mxu1 %v6694_v32 }
 0x301   : > { %3360 = vmatmul.mubr.f32.gmra.mrb[38].mxu1 %v3245_v15 }
 0x302   : > { %6389 = vmatpush1.bf16.msra.mxu1 %v8343_v13  ;;  %5954 = vmatprep.mubr.msk.f32.mxu1 %vm3255_vm0, %v3248_v63  ;;  %v3251_v13 = vld [vmem:[%s6826_s27 + $0x60] sm:$0xff] }
 0x303   : > { %6390 = vmatprep.subr.bf16.mxu1 %v6694_v32 }
 0x305   : > { %3365 = vmatmul.mubr.f32.gmra.mrb[40].mxu1 %v3247_v3  ;;  %v3618_v3 = vmul.f32 %v3581_v51, %v3570_v22 }
 0x306   : > { %6392 = vmatpush1.bf16.msra.mxu1 %v8345_v61  ;;  %5955 = vmatprep.mubr.msk.f32.mxu1 %vm3255_vm0, %v3250_v24  ;;  %v3253_v61 = vld [vmem:[%s6826_s27 + $0x70] sm:$0xff]  ;;  %v8511_v24 = vrot.slane %v3551_v28, %v7182_v8 }
 0x307   : > { %6393 = vmatprep.subr.bf16.mxu1 %v6694_v32 }
 0x309   : > { %3370 = vmatmul.mubr.f32.gmra.mrb[42].mxu1 %v3249_v37  ;;  %v8514_v37 = vrot.slane %v3551_v28, %v7185_v9 }
 0x30a   : > { %6395 = vmatpush1.bf16.msra.mxu1 %v8357_v50  ;;  %5956 = vmatprep.mubr.msk.f32.mxu1 %vm3255_vm0, %v3252_v57  ;;  %v5958_v50 = vld [vmem:[%s6826_s27 + $0x80] sm:$0xff]  ;;  %v8516_v57 = vpop.permute.xlu1 %3595 }
 0x30b   : > { %6396 = vmatprep.subr.bf16.mxu1 %v6694_v32 }
 0x30d   : > { %3375 = vmatmul.mubr.f32.gmra.mrb[44].mxu1 %v3251_v13  ;;  %v8518_v13 = vpop.permute.xlu0 %3590 }
 0x30e   : > { %6398 = vmatpush1.bf16.msra.mxu1 %v8359_v19  ;;  %5957 = vmatprep.mubr.msk.f32.mxu1 %vm3255_vm0, %v3254_v59  ;;  %v5961_v19 = vld [vmem:[%s6826_s27 + $0x98] sm:$0xff] }
 0x30f   : > { %6399 = vmatprep.subr.bf16.mxu1 %v6694_v32 }
 0x311   : > { %3380 = vmatmul.mubr.f32.gmra.mrb[46].mxu1 %v3253_v61 }
 0x312   : > { %6401 = vmatpush1.bf16.msra.mxu1 %v8369_v38  ;;  %5974 = vmatprep.mubr.msk.f32.mxu1 %vm3255_vm0, %v5959_v6  ;;  %v8469_v38 = vld [vmem:[#allocation3] sm:$0xff] }
 0x313   : > { %6402 = vmatprep.subr.bf16.mxu1 %v6694_v32 }
 0x316   : > { %6404 = vmatpush1.bf16.msra.mxu1 %v8371_v42  ;;  %v5960_v42 = vld [vmem:[%s6826_s27 + $0x90] sm:$0xff] }
 0x317   : > { %6405 = vmatprep.subr.bf16.mxu1 %v6694_v32 }
 0x31a   : > { %6407 = vmatpush1.bf16.msra.mxu1 %v8381_v0  ;;  %v5963_v0 = vld [vmem:[%s6826_s27 + $0xa8] sm:$0xff] }
 0x31b   : > { %6408 = vmatprep.subr.bf16.mxu1 %v6694_v32 }
 0x31e   : > { %6410 = vmatpush1.bf16.msra.mxu1 %v8383_v14  ;;  %v5965_v14 = vld [vmem:[%s6826_s27 + $0xb8] sm:$0xff] }
 0x31f   : > { %6411 = vmatprep.subr.bf16.mxu1 %v6694_v32 }
 0x322   : > { %6413 = vmatpush1.bf16.msra.mxu1 %v8394_v20  ;;  %v6532_v20 = vld [vmem:[%s9163_s3 + $0x18] sm:$0xff]  }
 0x323   : > { %6414 = vmatprep.subr.bf16.mxu1 %v6694_v32  ;;  %6221 = vmatprep.subr.bf16.mxu0 %v6532_v20 }
 0x324   : > { %6222 = vmatpush3.bf16.msra.mxu0 %v6532_v20 }
 0x326   : > { %6416 = vmatpush1.bf16.msra.mxu1 %v8396_v52  ;;  %v6533_v52 = vld [vmem:[%s9163_s3 + $0x20] sm:$0xff]   ;;  %s9175_s3 = sld [smem:[#allocation26_spill]] }
 0x327   : > { %6417 = vmatprep.subr.bf16.mxu1 %v6694_v32  ;;  %6223 = vmatprep.subr.bf16.mxu0 %v6533_v52 }
 0x328   : > { %6224 = vmatpush3.bf16.msra.mxu0 %v6533_v52 }
 0x329   : > { %6225 = vmatprep.subr.bf16.mxu0 %v6534_v56 }
 0x32a   : > { %6419 = vmatpush1.bf16.msra.mxu1 %v8406_v48 }
 0x32b   : > { %6420 = vmatprep.subr.bf16.mxu1 %v6694_v32  ;;  %v5962_v32 = vld [vmem:[%s6826_s27 + $0xa0] sm:$0xff] }
 0x32c   : > { %6226 = vmatpush3.bf16.msra.mxu0 %v6534_v56 }
 0x32d   : > { %6227 = vmatprep.subr.bf16.mxu0 %v6535_v18 }
 0x32e   : > { %6422 = vmatpush1.bf16.msra.mxu1 %v8408_v55 }
 0x32f   : > { %6293 = vmatprep.subr.bf16.mxu1 %v8469_v38 }
 0x330   : > { %6228 = vmatpush3.bf16.msra.mxu0 %v6535_v18  ;;  %v8541_v18 = vrot.slane %v3551_v28, %v7229_v44 }
 0x331   : > { %3491 = vmatmul.mubr.f32.vlgmr.msra.gmra.mrb[48].mxu1 %v5958_v50  ;;  %6229 = vmatprep.subr.bf16.mxu0 %v6536_v62  ;;  %v3630_v50 = vmul.f32 %v8511_v24, %v3618_v3 }
 0x332   : > { %5975 = vmatprep.mubr.msk.f32.mxu1 %vm3255_vm0, %v5961_v19  ;;  %v3658_v19 = vmul.f32 %v8469_v38, %v8514_v37 }
 0x334   : > { %6230 = vmatpush3.bf16.msra.mxu0 %v6536_v62  ;;  %v8544_v62 = vrot.slane %v3551_v28, %v7232_v46 }
 0x335   : > { %3496 = vmatmul.mubr.f32.gmra.mrb[50].mxu1 %v5960_v42 }
 0x336   : > { %5976 = vmatprep.mubr.msk.f32.mxu1 %vm3255_vm0, %v5963_v0  ;;  %v8524_v0 = vrot.slane %v3551_v28, %v7221_v35 }
 0x339   : > { %3501 = vmatmul.mubr.f32.gmra.mrb[52].mxu1 %v5962_v32  ;;  %v8526_v32 = vpop.permute.xlu1 %3689 }
 0x33a   : > { %5977 = vmatprep.mubr.msk.f32.mxu1 %vm3255_vm0, %v5965_v14 }
 0x33d   : > { %3506 = vmatmul.mubr.f32.gmra.mrb[54].mxu1 %v5964_v25 }
 0x33e   : > { %5978 = vmatprep.mubr.msk.f32.mxu1 %vm3255_vm0, %v5967_v40  ;;  %v8529_v40 = vrot.slane %v3551_v28, %v7200_v17 }
 0x341   : > { %3511 = vmatmul.mubr.f32.gmra.mrb[56].mxu1 %v5966_v12  ;;  %v3666_v12 = vadd.f32 %v3658_v19, %v3630_v50 }
 0x342   : > { %5979 = vmatprep.mubr.msk.f32.mxu1 %vm3255_vm0, %v5969_v5  ;;  %v3685_v5 = vpop.permute.xlu0 %3684 }
 0x345   : > { %3516 = vmatmul.mubr.f32.gmra.mrb[58].mxu1 %v5968_v41 }
 0x346   : > { %5980 = vmatprep.mubr.msk.f32.mxu1 %vm3255_vm0, %v5971_v26 }
 0x349   : > { %3521 = vmatmul.mubr.f32.gmra.mrb[60].mxu1 %v5970_v34  ;;  %v8532_v34 = vrot.slane %v3551_v28, %v7256_v1 }
 0x34a   : > { %5981 = vmatprep.mubr.msk.f32.mxu1 %vm3255_vm0, %v5973_v39 }
 0x34d   : > { %3526 = vmatmul.mubr.f32.gmra.mrb[62].mxu1 %v5972_v7  ;;  %v8536_v7 = vrot.slane %v3551_v28, %v7211_v27 }
 0x3c8   : > { %v3346_v21 = vpop.f32.mrb[32].mxu1 }
 0x3c9   : > { %v3348_v45 = vpop.f32.mrb[33].mxu1 }
 0x3cc   : > { %v3351_v49 = vpop.f32.mrb[34].mxu1 }
 0x3cd   : > { %v3353_v33 = vpop.f32.mrb[35].mxu1 }
 0x3d0   : > { %v3356_v31 = vpop.f32.mrb[36].mxu1 }
 0x3d1   : > { %v3358_v29 = vpop.f32.mrb[37].mxu1 }
 0x3d4   : > { %v3361_v43 = vpop.f32.mrb[38].mxu1 }
 0x3d5   : > { %v3363_v60 = vpop.f32.mrb[39].mxu1 }
 0x3d8   : > { %v8499_v53 = vpop.f32.mrb[40].mxu1 }
 0x3d9   : > { %v3368_v10 = vpop.f32.mrb[41].mxu1 }
 0x3dc   : > { %v8501_v16 = vpop.f32.mrb[42].mxu1 }
 0x3dd   : > { %v3373_v47 = vpop.f32.mrb[43].mxu1 }
 0x3e0   : > { %v8503_v4 = vpop.f32.mrb[44].mxu1 }
 0x3e1   : > { %v3378_v48 = vpop.f32.mrb[45].mxu1 }
 0x3e4   : > { %v8505_v55 = vpop.f32.mrb[46].mxu1 }
 0x3e5   : > { %v3383_v54 = vpop.f32.mrb[47].mxu1 }
 0x3e6   : > { %v8561_v54 = vpop.permute.xlu1 %3699 }
 0x404   : > { %v3492_v36 = vpop.f32.mrb[48].mxu1 }
 0x405   : > { %v3531_v15 = vmax.f32 %v3346_v21, %v3492_v36  ;;  %v3494_v63 = vpop.f32.mrb[49].mxu1 }
 0x406   : > { %v8567_v63 = vpop.permute.xlu0 %3694 }
 0x407   : > { %3543 = vst [vmem:[#allocation3 + $0x10] sm:$0xff] %v3531_v15  ;;  %v3659_v52 = vmul.f32 %v8514_v37, %v3531_v15  ;;  %v3798_v56 = vmul.f32 %v8524_v0, %v3531_v15 }
 0x408   : > { %v3497_v59 = vpop.f32.mrb[50].mxu1 }
 0x409   : > { %v3532_v61 = vmax.f32 %v3351_v49, %v3497_v59  ;;  %v3499_v6 = vpop.f32.mrb[51].mxu1 }
 0x40b   : > { %3544 = vst [vmem:[#allocation3 + $0x18] sm:$0xff] %v3532_v61  ;;  %v3660_v33 = vmul.f32 %v8514_v37, %v3532_v61  ;;  %v3799_v10 = vmul.f32 %v8524_v0, %v3532_v61  ;;  %v8556_v48 = vmul.f32 %v8532_v34, %v3532_v61 }
 0x40c   : > { %v3502_v42 = vpop.f32.mrb[52].mxu1 }
 0x40d   : > { %v3533_v14 = vmax.f32 %v3356_v31, %v3502_v42  ;;  %v3504_v25 = vpop.f32.mrb[53].mxu1 }
 0x40e   : > { %v3571_v41 = vld [vmem:[#allocation3 + $0xf] sm:$0xff] }
 0x40f   : > { %v3674_v26 = vld [vmem:[#allocation3 + $0x9] sm:$0xff]  ;;  %3545 = vst [vmem:[#allocation3 + $0x20] sm:$0xff] %v3533_v14  ;;  %v3619_v39 = vmul.f32 %v8507_v30, %v3571_v41  ;;  %v3758_v58 = vmul.f32 %v3581_v51, %v3571_v41  ;;  %v8553_v47 = vmul.f32 %v8524_v0, %v3533_v14 }
 0x410   : > { %v3722_v23 = vmul.f32 %v3685_v5, %v3674_v26  ;;  %v3507_v20 = vpop.f32.mrb[54].mxu1 }
 0x411   : > { %v8546_v21 = vmax.f32 %v3361_v43, %v3507_v20  ;;  %v3509_v45 = vpop.f32.mrb[55].mxu1  ;;  %v3631_v49 = vmul.f32 %v8511_v24, %v3619_v39  ;;  %v8559_v43 = vmul.f32 %v8532_v34, %v3533_v14  ;;  %v3770_v15 = vmul.f32 %v8536_v7, %v3758_v58 }
 0x412   : > { %v3734_v31 = vmul.f32 %v8529_v40, %v3722_v23  ;;  %v3572_v29 = vld [vmem:[#allocation3 + $0x17] sm:$0xff]  ;;  %v3661_v20 = vmul.f32 %v8514_v37, %v3533_v14 }
 0x413   : > { %v3675_v60 = vld [vmem:[#allocation3 + $0x11] sm:$0xff]  ;;  %3546 = vst [vmem:[#allocation3 + $0x28] sm:$0xff] %v8546_v21  ;;  %v3620_v28 = vmul.f32 %v8518_v13, %v3572_v29  ;;  %v3667_v59 = vadd.f32 %v3659_v52, %v3631_v49  ;;  %v3759_v61 = vmul.f32 %v8507_v30, %v3572_v29  ;;  %v3851_v50 = vmul.f32 %v3581_v51, %v3572_v29 }
 0x414   : > { %v3723_v22 = vmul.f32 %v8526_v32, %v3675_v60  ;;  %v3742_v36 = vadd.f32 %v3734_v31, %v3666_v12  ;;  %v3512_v3 = vpop.f32.mrb[56].mxu1  ;;  %v3822_v6 = vmul.f32 %v3685_v5, %v3675_v60  ;;  %v8580_v51 = vmul.f32 %v8524_v0, %v8546_v21 }
 0x415   : > { %v8571_v19 = vmax.f32 %v8499_v53, %v3512_v3  ;;  %v3514_v42 = vpop.f32.mrb[57].mxu1  ;;  %v3632_v25 = vmul.f32 %v8511_v24, %v3620_v28  ;;  %v3771_v23 = vmul.f32 %v8536_v7, %v3759_v61  ;;  %v3863_v49 = vmul.f32 %v8544_v62, %v3851_v50 }
 0x416   : > { %v3735_v41 = vmul.f32 %v8529_v40, %v3723_v22  ;;  %v3778_v26 = vadd.f32 %v3770_v15, %v3742_v36  ;;  %v3573_v12 = vld [vmem:[#allocation3 + $0x1f] sm:$0xff]  ;;  %v3834_v58 = vmul.f32 %v8541_v18, %v3822_v6  ;;  %v8588_v22 = vpop.permute.xlu1 %3605  ;;  %v8594_v6 = vpop.permute.xlu0 %3600 }
 0x417   : > { %v3676_v39 = vld [vmem:[#allocation3 + $0x19] sm:$0xff]  ;;  %3547 = vst [vmem:[#allocation3 + $0x30] sm:$0xff] %v8571_v19  ;;  %v3760_v45 = vmul.f32 %v8518_v13, %v3573_v12  ;;  %v3852_v14 = vmul.f32 %v8507_v30, %v3573_v12  ;;  %v3668_v3 = vadd.f32 %v3660_v33, %v3632_v25  ;;  %v8600_v30 = vmul.f32 %v8532_v34, %v8546_v21 }
 0x418   : > { %v3724_v53 = vmul.f32 %v8567_v63, %v3676_v39  ;;  %v3743_v52 = vadd.f32 %v3735_v41, %v3667_v59  ;;  %v3517_v31 = vpop.f32.mrb[58].mxu1  ;;  %v3806_v29 = vadd.f32 %v3798_v56, %v3778_v26  ;;  %v3823_v60 = vmul.f32 %v8526_v32, %v3676_v39 }
 0x419   : > { %v3901_v28 = vmul.f32 %v3685_v5, %v3676_v39  ;;  %v8591_v36 = vmax.f32 %v8501_v16, %v3517_v31  ;;  %v3519_v15 = vpop.f32.mrb[59].mxu1  ;;  %v3772_v56 = vmul.f32 %v8536_v7, %v3760_v45  ;;  %v8603_v5 = vld [vmem:[%s6731_s25 + $0x8] ss:$0 sm:$0xff]  ;;  %v3864_v26 = vmul.f32 %v8544_v62, %v3852_v14 }
 0x41a   : > { %v3736_v59 = vmul.f32 %v8529_v40, %v3724_v53  ;;  %v3779_v61 = vadd.f32 %v3771_v23, %v3743_v52  ;;  %v3816_v50 = vld [vmem:[#allocation3 + $0x21] sm:$0xff]  ;;  %v3835_v42 = vmul.f32 %v8541_v18, %v3823_v60  ;;  %v3842_v41 = vadd.f32 %v3834_v58, %v3806_v29 }
 0x41b   : > { %3548 = vst [vmem:[#allocation3 + $0x38] sm:$0xff] %v8591_v36  ;;  %v3824_v25 = vmul.f32 %v3816_v50, %v8567_v63  ;;  %v3753_v39 = vld [vmem:[#allocation3 + $0x27] sm:$0xff]  ;;  %v3913_v52 = vmul.f32 %v8603_v5, %v3901_v28  ;;  %v3621_v58 = vmul.f32 %v8516_v57, %v3573_v12  ;;  %v3725_v45 = vmul.f32 %v3816_v50, %v8561_v54 }
 0x41c   : > { %v3744_v16 = vadd.f32 %v3736_v59, %v3668_v3  ;;  %v3807_v33 = vadd.f32 %v3799_v10, %v3779_v61  ;;  %v3522_v23 = vpop.f32.mrb[60].mxu1  ;;  %v3871_v53 = vadd.f32 %v3863_v49, %v3842_v41  ;;  %v3902_v10 = vmul.f32 %v3816_v50, %v8526_v32  ;;  %v8619_v61 = vpop.permute.xlu1 %3615 }
 0x41d   : > { %v8612_v31 = vmax.f32 %v8503_v4, %v3522_v23  ;;  %v3524_v29 = vpop.f32.mrb[61].mxu1  ;;  %v3633_v3 = vmul.f32 %v8511_v24, %v3621_v58  ;;  %v3737_v49 = vmul.f32 %v8529_v40, %v3725_v45  ;;  %v3761_v12 = vmul.f32 %v3753_v39, %v8516_v57 }
 0x41e   : > { %v3780_v60 = vadd.f32 %v3772_v56, %v3744_v16  ;;  %v3843_v15 = vadd.f32 %v3835_v42, %v3807_v33  ;;  %v3892_v14 = vadd.f32 %v8556_v48, %v3871_v53  ;;  %v3754_v28 = vld [vmem:[#allocation3 + $0x2f] sm:$0xff]  ;;  %v3836_v56 = vmul.f32 %v8541_v18, %v3824_v25  ;;  %v8625_v48 = vpop.permute.xlu0 %3610 }
 0x41f   : > { %v3817_v59 = vld [vmem:[#allocation3 + $0x29] sm:$0xff]  ;;  %3549 = vst [vmem:[#allocation3 + $0x40] sm:$0xff] %v8612_v31  ;;  %v3669_v33 = vadd.f32 %v3661_v20, %v3633_v3  ;;  %v3853_v23 = vmul.f32 %v3753_v39, %v8518_v13  ;;  %v3854_v53 = vmul.f32 %v3754_v28, %v8516_v57 }
 0x420   : > { %v3808_v4 = vadd.f32 %v8553_v47, %v3780_v60  ;;  %v3872_v32 = vadd.f32 %v3864_v26, %v3843_v15  ;;  %v3825_v50 = vmul.f32 %v3817_v59, %v8561_v54  ;;  %v3527_v42 = vpop.f32.mrb[62].mxu1  ;;  %v3921_v41 = vadd.f32 %v3913_v52, %v3892_v14  ;;  %v8628_v16 = vld [vmem:[%s6736_s29] ss:$0 sm:$0xff] }
 0x421   : > { %v8633_v58 = vmax.f32 %v8505_v55, %v3527_v42  ;;  %v3529_v47 = vpop.f32.mrb[63].mxu1  ;;  %v3914_v26 = vmul.f32 %v8603_v5, %v3902_v10  ;;  %v3745_v29 = vadd.f32 %v3737_v49, %v3669_v33  ;;  %v3773_v60 = vmul.f32 %v8536_v7, %v3761_v12 }
 0x422   : > { %v3844_v45 = vadd.f32 %v3836_v56, %v3808_v4  ;;  %v3893_v25 = vadd.f32 %v8559_v43, %v3872_v32  ;;  %v3818_v52 = vld [vmem:[#allocation3 + $0x31] sm:$0xff]  ;;  %v3837_v15 = vmul.f32 %v8541_v18, %v3825_v50  ;;  %v3865_v20 = vmul.f32 %v8544_v62, %v3853_v23  ;;  %v3710_v50 = vpop.permute.xlu1 %3709  ;;  %v3705_v42 = vpop.permute.xlu0 %3704 }
 0x423   : > { %3550 = vst [vmem:[#allocation3 + $0x48] sm:$0xff] %v8633_v58  ;;  %v3936_v55 = vadd.f32 %v8628_v16, %v3921_v41  ;;  %v3866_v13 = vmul.f32 %v8544_v62, %v3854_v53  ;;  %v3903_v14 = vmul.f32 %v3817_v59, %v8567_v63  ;;  %v3781_v43 = vadd.f32 %v3773_v60, %v3745_v29  ;;  %v3755_v23 = vld [vmem:[#allocation3 + $0x37] sm:$0xff] }
 0x424   : > { %v3922_v57 = vadd.f32 %v3914_v26, %v3893_v25  ;;  %v3873_v3 = vadd.f32 %v3865_v20, %v3844_v45  ;;  %v3622_v10 = vmul.f32 %v3753_v39, %v8594_v6  ;;  %v3623_v49 = vmul.f32 %v3754_v28, %v8588_v22 }
 0x425   : > { %v3904_v4 = vmul.f32 %v3818_v52, %v8561_v54  ;;  %v3915_v56 = vmul.f32 %v8603_v5, %v3903_v14  ;;  %v3662_v32 = vmul.f32 %v8514_v37, %v8546_v21  ;;  %v3809_v41 = vadd.f32 %v8580_v51, %v3781_v43 }
 0x426   : > { %v3937_v12 = vadd.f32 %v8628_v16, %v3922_v57  ;;  %v3894_v63 = vadd.f32 %v8600_v30, %v3873_v3  ;;  %v3634_v33 = vmul.f32 %v8511_v24, %v3622_v10  ;;  %v3635_v39 = vmul.f32 %v8511_v24, %v3623_v49  ;;  %v3756_v20 = vld [vmem:[#allocation3 + $0x3f] sm:$0xff] }
 0x427   : > { %v3663_v54 = vmul.f32 %v8514_v37, %v8571_v19  ;;  %v3726_v47 = vmul.f32 %v3817_v59, %v3705_v42  ;;  %v3727_v45 = vmul.f32 %v3818_v52, %v3710_v50  ;;  %v3845_v25 = vadd.f32 %v3837_v15, %v3809_v41  ;;  %v3819_v43 = vld [vmem:[#allocation3 + $0x39] sm:$0xff] }
 0x428   : > { %v3944_v53 = vpack.c.bf16 %v3937_v12, %v3936_v55  ;;  %v3923_v26 = vadd.f32 %v3915_v56, %v3894_v63  ;;  %v3670_v21 = vadd.f32 %v3662_v32, %v3634_v33  ;;  %v3762_v29 = vmul.f32 %v3754_v28, %v8594_v6 }
 0x429   : > { %v3671_v51 = vadd.f32 %v3663_v54, %v3635_v39  ;;  %v3738_v30 = vmul.f32 %v8529_v40, %v3726_v47  ;;  %v3739_v60 = vmul.f32 %v8529_v40, %v3727_v45  ;;  %v3763_v57 = vmul.f32 %v3755_v23, %v8588_v22 }
 0x42a   : > { %6231 = vmatprep.mubr.bf16.mxu0 %v3944_v53  ;;  %v3874_v55 = vadd.f32 %v3866_v13, %v3845_v25  ;;  %v3887_v14 = vmul.f32 %v8532_v34, %v8571_v19  ;;  %v3916_v59 = vmul.f32 %v8603_v5, %v3904_v4  ;;  %v3938_v15 = vadd.f32 %v8628_v16, %v3923_v26  ;;  %v3820_v53 = vld [vmem:[#allocation3 + $0x41] sm:$0xff] }
 0x42b   : > { %v3746_v3 = vadd.f32 %v3738_v30, %v3670_v21  ;;  %v3747_v28 = vadd.f32 %v3739_v60, %v3671_v51  ;;  %v3774_v10 = vmul.f32 %v8536_v7, %v3762_v29  ;;  %v3775_v49 = vmul.f32 %v8536_v7, %v3763_v57 }
 0x42c   : > { %v3895_v12 = vadd.f32 %v3887_v14, %v3874_v55  ;;  %v3764_v56 = vmul.f32 %v3756_v20, %v8625_v48  ;;  %v3802_v13 = vmul.f32 %v8524_v0, %v8571_v19  ;;  %v3826_v32 = vmul.f32 %v3818_v52, %v3705_v42 }
 0x42d   : > { %v3782_v41 = vadd.f32 %v3774_v10, %v3746_v3  ;;  %v3783_v63 = vadd.f32 %v3775_v49, %v3747_v28  ;;  %v3803_v4 = vmul.f32 %v8524_v0, %v8591_v36  ;;  %v3827_v33 = vmul.f32 %v3819_v43, %v3710_v50  ;;  %v3757_v28 = vld [vmem:[#allocation3 + $0x47] sm:$0xff]  ;;  %v3715_v10 = vpop.permute.xlu0 %3714 }
 0x42e   : > { %v3924_v39 = vadd.f32 %v3916_v59, %v3895_v12  ;;  %v3838_v54 = vmul.f32 %v8541_v18, %v3826_v32  ;;  %v3855_v47 = vmul.f32 %v3755_v23, %v8594_v6  ;;  %v3856_v45 = vmul.f32 %v3756_v20, %v8588_v22 }
 0x42f   : > { %v3810_v25 = vadd.f32 %v3802_v13, %v3782_v41  ;;  %v3811_v26 = vadd.f32 %v3803_v4, %v3783_v63  ;;  %v3839_v21 = vmul.f32 %v8541_v18, %v3827_v33  ;;  %v3888_v19 = vmul.f32 %v8532_v34, %v8591_v36  ;;  %v3720_v41 = vpop.permute.xlu1 %3719 }
 0x430   : > { %v3939_v52 = vadd.f32 %v8628_v16, %v3924_v39  ;;  %v3867_v29 = vmul.f32 %v8544_v62, %v3855_v47  ;;  %v3868_v51 = vmul.f32 %v8544_v62, %v3856_v45  ;;  %v3889_v30 = vmul.f32 %v8532_v34, %v8612_v31 }
 0x431   : > { %v3846_v60 = vadd.f32 %v3838_v54, %v3810_v25  ;;  %v3847_v6 = vadd.f32 %v3839_v21, %v3811_v26  ;;  %v3905_v57 = vmul.f32 %v3819_v43, %v3705_v42  ;;  %v3906_v22 = vmul.f32 %v3820_v53, %v3710_v50  ;;  %v3821_v54 = vld [vmem:[#allocation3 + $0x49] sm:$0xff] }
 0x432   : > { %v3945_v55 = vpack.c.bf16 %v3939_v52, %v3938_v15  ;;  %v3624_v14 = vmul.f32 %v3755_v23, %v8625_v48  ;;  %v3625_v59 = vmul.f32 %v3756_v20, %v8619_v61  ;;  %v3664_v3 = vmul.f32 %v8514_v37, %v8591_v36 }
 0x433   : > { %v3875_v49 = vadd.f32 %v3867_v29, %v3846_v60  ;;  %v3876_v12 = vadd.f32 %v3868_v51, %v3847_v6  ;;  %v3917_v13 = vmul.f32 %v8603_v5, %v3905_v57  ;;  %v3918_v32 = vmul.f32 %v8603_v5, %v3906_v22  ;;  %v3900_v22 = vld [vmem:[#allocation3 + $0x51] sm:$0xff] }
 0x434   : > { %6232 = vmatmul.mubr.bf16.vlgmr.msra.gmra.mrb[64].mxu0 %v3945_v55  ;;  %v3636_v50 = vmul.f32 %v8511_v24, %v3624_v14  ;;  %v3637_v42 = vmul.f32 %v8511_v24, %v3625_v59  ;;  %v3665_v23 = vmul.f32 %v8514_v37, %v8612_v31  ;;  %v3728_v20 = vmul.f32 %v3819_v43, %v3715_v10  ;;  %v3850_v43 = vld [vmem:[#allocation3 + $0x4f] sm:$0xff] }
 0x435   : > { %v3896_v15 = vadd.f32 %v3888_v19, %v3875_v49  ;;  %v3897_v36 = vadd.f32 %v3889_v30, %v3876_v12  ;;  %v3729_v63 = vmul.f32 %v3820_v53, %v3720_v41  ;;  %v3765_v4 = vmul.f32 %v3757_v28, %v8619_v61 }
 0x436   : > { %v3672_v33 = vadd.f32 %v3664_v3, %v3636_v50  ;;  %v3740_v39 = vmul.f32 %v8529_v40, %v3728_v20  ;;  %v3673_v25 = vadd.f32 %v3665_v23, %v3637_v42  ;;  %v3828_v21 = vmul.f32 %v3820_v53, %v3715_v10 }
 0x437   : > { %v3925_v47 = vadd.f32 %v3917_v13, %v3896_v15  ;;  %v3926_v45 = vadd.f32 %v3918_v32, %v3897_v36  ;;  %v3741_v26 = vmul.f32 %v8529_v40, %v3729_v63  ;;  %v3776_v52 = vmul.f32 %v8536_v7, %v3764_v56  ;;  %v6539_v36 = vld [vmem:[%s6761_s24 + $0x10] sm:$0xff]   ;;  %v6541_v63 = vld [vmem:[%s6761_s24 + $0x20] sm:$0xff]  }
 0x438   : > { %v3748_v24 = vadd.f32 %v3740_v39, %v3672_v33  ;;  %v3777_v37 = vmul.f32 %v8536_v7, %v3765_v4  ;;  %v3829_v30 = vmul.f32 %v3821_v54, %v3720_v41  ;;  %v3804_v60 = vmul.f32 %v8524_v0, %v8612_v31  ;;  %v8724_v4 = vpop.permute.xlu1 %4138  ;;  %v8726_v33 = vpop.permute.xlu0 %4133  ;;  %v8729_v39 = vld [vmem:[%s9167_s8] ss:$0 sm:$0xff]  ;;  %s9172_s8 = sld [smem:[#allocation22_spill]] }
 0x439   : > { %v3940_v19 = vadd.f32 %v8628_v16, %v3925_v47  ;;  %v3941_v29 = vadd.f32 %v8628_v16, %v3926_v45  ;;  %v3749_v51 = vadd.f32 %v3741_v26, %v3673_v25  ;;  %v3857_v57 = vmul.f32 %v3757_v28, %v8625_v48  ;;  %v4123_v45 = vld [vmem:[#allocation4 + $0x7] sm:$0xff] }
 0x43a   : > { %v3784_v6 = vadd.f32 %v3776_v52, %v3748_v24  ;;  %v3805_v56 = vmul.f32 %v8524_v0, %v8633_v58  ;;  %v3858_v7 = vmul.f32 %v3850_v43, %v8619_v61  ;;  %v3840_v14 = vmul.f32 %v8541_v18, %v3828_v21 }
 0x43b   : > { %v3946_v40 = vpack.c.bf16 %v3941_v29, %v3940_v19  ;;  %v3785_v53 = vadd.f32 %v3777_v37, %v3749_v51  ;;  %v3841_v3 = vmul.f32 %v8541_v18, %v3829_v30  ;;  %v3869_v31 = vmul.f32 %v8544_v62, %v3857_v57 }
 0x43c   : > { %v3812_v55 = vadd.f32 %v3804_v60, %v3784_v6  ;;  %v3907_v12 = vmul.f32 %v3821_v54, %v3715_v10  ;;  %v3908_v48 = vmul.f32 %v3900_v22, %v3720_v41  ;;  %v3870_v13 = vmul.f32 %v8544_v62, %v3858_v7  ;;  %v4105_v54 = vld [vmem:[%s9168_s19] sm:$0xff]  ;;  %v8733_v21 = vpop.permute.xlu1 %4148  ;;  %v8739_v43 = vpop.permute.xlu0 %4143 }
 0x43d   : > { %6235 = vmatprep.mubr.bf16.mxu0 %v3946_v40  ;;  %v3813_v59 = vadd.f32 %v3805_v56, %v3785_v53  ;;  %v3891_v0 = vmul.f32 %v8469_v38, %v8532_v34  ;;  %v3890_v32 = vmul.f32 %v8532_v34, %v8633_v58  ;;  %v6537_v34 = vld [vmem:[%s6761_s24] sm:$0xff]   ;;  %v6538_v58 = vld [vmem:[%s6761_s24 + $0x8] sm:$0xff]   ;;  %v8737_v37 = vrot.slane %v4105_v54, %v7182_v8  ;;  %v4199_v40 = vld [vmem:[#allocation4 + $0x8] sm:$0xff] }
 0x43e   : > { %v3848_v49 = vadd.f32 %v3840_v14, %v3812_v55  ;;  %v3919_v42 = vmul.f32 %v8603_v5, %v3907_v12  ;;  %v3920_v10 = vmul.f32 %v8603_v5, %v3908_v48  ;;  %6239 = vmatprep.subr.bf16.mxu0 %v6537_v34  ;;  %v6540_v5 = vld [vmem:[%s6761_s24 + $0x18] sm:$0xff]   ;;  %v4171_v30 = vmul.f32 %v8726_v33, %v4123_v45 }
 0x43f   : > { %v3849_v28 = vadd.f32 %v3841_v3, %v3813_v59  ;;  %6240 = vmatpush3.bf16.msra.mxu0 %v6537_v34  ;;  %v8744_v60 = vrot.slane %v4105_v54, %v7185_v9  ;;  %v8758_v59 = vrot.slane %v4105_v54, %v7221_v35  ;;  %v8761_v3 = vrot.slane %v4105_v54, %v7256_v1 }
 0x440   : > { %v3877_v61 = vadd.f32 %v3869_v31, %v3848_v49  ;;  %6241 = vmatprep.subr.bf16.mxu0 %v6538_v58  ;;  %v4183_v7 = vmul.f32 %v8737_v37, %v4171_v30  ;;  %v8752_v55 = vpop.permute.xlu1 %4242  ;;  %v8755_v14 = vpop.permute.xlu0 %4237  ;;  %v8764_v12 = vrot.slane %v4105_v54, %v7200_v17 }
 0x441   : > { %v3878_v50 = vadd.f32 %v3870_v13, %v3849_v28  ;;  %v4211_v22 = vmul.f32 %v8744_v60, %v4199_v40 }
 0x442   : > { %v3898_v18 = vadd.f32 %v3890_v32, %v3877_v61  ;;  %v8770_v61 = vrot.slane %v4105_v54, %v7211_v27  ;;  %v8773_v32 = vrot.slane %v4105_v54, %v7229_v44 }
 0x443   : > { %v3899_v41 = vadd.f32 %v3891_v0, %v3878_v50  ;;  %6242 = vmatpush3.bf16.msra.mxu0 %v6538_v58  ;;  %v4219_v49 = vadd.f32 %v4211_v22, %v4183_v7  ;;  %v8776_v50 = vrot.slane %v4105_v54, %v7232_v46 }
 0x444   : > { %v3927_v23 = vadd.f32 %v3919_v42, %v3898_v18  ;;  %6243 = vmatprep.subr.bf16.mxu0 %v6539_v36  ;;  %v8778_v18 = vpop.permute.xlu1 %4252 }
 0x445   : > { %v3928_v20 = vadd.f32 %v3920_v10, %v3899_v41 }
 0x446   : > { %v3942_v62 = vadd.f32 %v8628_v16, %v3927_v23 }
 0x447   : > { %v3943_v38 = vadd.f32 %v8628_v16, %v3928_v20  ;;  %6244 = vmatpush3.bf16.msra.mxu0 %v6539_v36  ;;  %v6542_v16 = vld [vmem:[%s6761_s24 + $0x28] sm:$0xff]  }
 0x448   : > { %6245 = vmatprep.subr.bf16.mxu0 %v6540_v5 }
 0x449   : > { %v3947_v15 = vpack.c.bf16 %v3943_v38, %v3942_v62  ;;  %v8790_v38 = vpop.permute.xlu0 %4247 }
 0x44b   : > { %6236 = vmatmul.mubr.bf16.gmra.mrb[68].mxu0 %v3947_v15 }
 0x44c   : > { %6246 = vmatpush3.bf16.msra.mxu0 %v6540_v5 }
 0x44d   : > { %6247 = vmatprep.subr.bf16.mxu0 %v6541_v63 }
 0x450   : > { %6248 = vmatpush3.bf16.msra.mxu0 %v6541_v63 }
 0x451   : > { %6249 = vmatprep.subr.bf16.mxu0 %v6542_v16 }
 0x454   : > { %6250 = vmatpush3.bf16.msra.mxu0 %v6542_v16 }
 0x507   : > { %v6233_v47 = vpop.f32.mrb[64].mxu0 }
 0x508   : > { %v4062_v25 = vadd.f32 %v6233_v47, %v8729_v39  ;;  %v4053_v26 = vpop.f32.mrb[65].mxu0 }
 0x509   : > { %v4054_v24 = vadd.f32 %v8729_v39, %v4053_v26  ;;  %v6234_v52 = vpop.f32.mrb[66].mxu0 }
 0x50a   : > { %v4086_v19 = vmax.f32 %v4062_v25, 0.0  ;;  %v4065_v29 = vadd.f32 %v6234_v52, %v8729_v39  ;;  %v4056_v51 = vpop.f32.mrb[67].mxu0 }
 0x50b   : > { %v4084_v6 = vmax.f32 %v4054_v24, 0.0  ;;  %v4057_v57 = vadd.f32 %v8729_v39, %v4056_v51 }
 0x50c   : > { %4099 = vst.msk [vmem:[#allocation4 + $0x20] sm:$0xff] %vm4092_vm4, %v4086_v19  ;;  %v4087_v53 = vmax.f32 %v4065_v29, 0.0 }
 0x50d   : > { %4097 = vst.msk [vmem:[#allocation4 + $0x10] sm:$0xff] %vm4092_vm4, %v4084_v6  ;;  %v4085_v56 = vmax.f32 %v4057_v57, 0.0 }
 0x50e   : > { %4100 = vst.msk [vmem:[#allocation4 + $0x28] sm:$0xff] %vm4092_vm4, %v4087_v53 }
 0x50f   : > { %4098 = vst.msk [vmem:[#allocation4 + $0x18] sm:$0xff] %vm4092_vm4, %v4085_v56 }
 0x513   : > { %v4202_v31 = vld [vmem:[#allocation4 + $0x20] sm:$0xff] }
 0x514   : > { %v8767_v48 = vmul.f32 %v8744_v60, %v4202_v31  ;;  %v4124_v28 = vld [vmem:[#allocation4 + $0xf] sm:$0xff]  ;;  %v4353_v20 = vmul.f32 %v8758_v59, %v4202_v31  ;;  %v8788_v62 = vmul.f32 %v8761_v3, %v4202_v31 }
 0x515   : > { %v4200_v13 = vld [vmem:[#allocation4 + $0x10] sm:$0xff]  ;;  %v8780_v42 = vld [vmem:[#allocation4 + $0x21] sm:$0xff]  ;;  %v4172_v10 = vmul.f32 %v8724_v4, %v4124_v28  ;;  %v4311_v63 = vmul.f32 %v8726_v33, %v4124_v28 }
 0x516   : > { %v4227_v0 = vld [vmem:[#allocation4 + $0x9] sm:$0xff]  ;;  %v8794_v15 = vmul.f32 %v8778_v18, %v8780_v42  ;;  %v4126_v34 = vld [vmem:[#allocation4 + $0x1f] sm:$0xff]  ;;  %v4125_v58 = vld [vmem:[#allocation4 + $0x17] sm:$0xff]  ;;  %v4212_v5 = vmul.f32 %v8744_v60, %v4200_v13  ;;  %v4351_v26 = vmul.f32 %v8758_v59, %v4200_v13  ;;  %v4377_v24 = vmul.f32 %v8790_v38, %v8780_v42 }
 0x517   : > { %v4275_v41 = vmul.f32 %v8755_v14, %v4227_v0  ;;  %v8784_v23 = vld [vmem:[#allocation4 + $0x27] sm:$0xff]  ;;  %v8796_v36 = vld [vmem:[#allocation4 + $0x18] sm:$0xff]  ;;  %v4173_v54 = vmul.f32 %v8739_v43, %v4125_v58  ;;  %v4184_v47 = vmul.f32 %v8737_v37, %v4172_v10  ;;  %v4312_v51 = vmul.f32 %v8724_v4, %v4125_v58 }
 0x518   : > { %v8802_v16 = vmul.f32 %v8784_v23, %v8733_v21  ;;  %v4228_v45 = vld [vmem:[#allocation4 + $0x11] sm:$0xff]  ;;  %v4229_v25 = vld [vmem:[#allocation4 + $0x19] sm:$0xff]  ;;  %v4213_v6 = vmul.f32 %v8744_v60, %v8796_v36  ;;  %v4313_v40 = vmul.f32 %v8739_v43, %v4126_v34  ;;  %v4174_v53 = vmul.f32 %v8733_v21, %v4126_v34 }
 0x519   : > { %v4276_v52 = vmul.f32 %v8752_v55, %v4228_v45  ;;  %v4277_v19 = vmul.f32 %v8790_v38, %v4229_v25  ;;  %v4287_v29 = vmul.f32 %v8764_v12, %v4275_v41  ;;  %v4185_v30 = vmul.f32 %v8737_v37, %v4173_v54 }
 0x51a   : > { %v4220_v57 = vadd.f32 %v4212_v5, %v4184_v47  ;;  %v4323_v22 = vmul.f32 %v8770_v61, %v4311_v63  ;;  %v4324_v13 = vmul.f32 %v8770_v61, %v4312_v51  ;;  %v4325_v0 = vmul.f32 %v8770_v61, %v4313_v40 }
 0x51b   : > { %v4288_v56 = vmul.f32 %v8764_v12, %v4276_v52  ;;  %v4295_v7 = vadd.f32 %v4287_v29, %v4219_v49  ;;  %v4221_v31 = vadd.f32 %v4213_v6, %v4185_v30  ;;  %v4289_v28 = vmul.f32 %v8764_v12, %v4277_v19 }
 0x51c   : > { %v4375_v5 = vmul.f32 %v8755_v14, %v4228_v45  ;;  %v4376_v54 = vmul.f32 %v8752_v55, %v4229_v25  ;;  %v4352_v52 = vmul.f32 %v8758_v59, %v8796_v36  ;;  %v4404_v49 = vmul.f32 %v8726_v33, %v4125_v58 }
 0x51d   : > { %v4296_v10 = vadd.f32 %v4288_v56, %v4220_v57  ;;  %v4331_v41 = vadd.f32 %v4323_v22, %v4295_v7  ;;  %v4297_v47 = vadd.f32 %v4289_v28, %v4221_v31  ;;  %v4405_v63 = vmul.f32 %v8724_v4, %v4126_v34  ;;  %v8837_v22 = vpop.permute.xlu0 %4153 }
 0x51e   : > { %v6237_v29 = vpop.f32.mrb[68].mxu0  ;;  %v4387_v51 = vmul.f32 %v8773_v32, %v4375_v5  ;;  %v4389_v6 = vmul.f32 %v8773_v32, %v4377_v24  ;;  %v4388_v56 = vmul.f32 %v8773_v32, %v4376_v54  ;;  %v4406_v7 = vmul.f32 %v8784_v23, %v8739_v43 }
 0x51f   : > { %v4332_v19 = vadd.f32 %v4324_v13, %v4296_v10  ;;  %v4359_v30 = vadd.f32 %v4351_v26, %v4331_v41  ;;  %v4078_v57 = vadd.f32 %v6237_v29, %v8729_v39  ;;  %v4069_v45 = vpop.f32.mrb[69].mxu0  ;;  %v4333_v40 = vadd.f32 %v4325_v0, %v4297_v47  ;;  %v8841_v10 = vpop.permute.xlu1 %4158 }
 0x520   : > { %v4070_v33 = vadd.f32 %v8729_v39, %v4069_v45  ;;  %v6238_v58 = vpop.f32.mrb[70].mxu0  ;;  %v4416_v26 = vmul.f32 %v8776_v50, %v4404_v49  ;;  %v4417_v0 = vmul.f32 %v8776_v50, %v4405_v63  ;;  %v4437_v49 = vmul.f32 %v8761_v3, %v8796_v36 }
 0x521   : > { %v4360_v4 = vadd.f32 %v4352_v52, %v4332_v19  ;;  %v4395_v34 = vadd.f32 %v4387_v51, %v4359_v30  ;;  %v4090_v24 = vmax.f32 %v4078_v57, 0.0  ;;  %v4081_v31 = vadd.f32 %v6238_v58, %v8729_v39  ;;  %v4072_v28 = vpop.f32.mrb[71].mxu0  ;;  %v8849_v19 = vld [vmem:[%s9168_s19 + $0x8] ss:$0 sm:$0xff] }
 0x522   : > { %v4361_v13 = vadd.f32 %v4353_v20, %v4333_v40  ;;  %v4088_v43 = vmax.f32 %v4070_v33, 0.0  ;;  %v4073_v41 = vadd.f32 %v8729_v39, %v4072_v28  ;;  %v4454_v29 = vmul.f32 %v8755_v14, %v4229_v25 }
 0x523   : > { %v4396_v5 = vadd.f32 %v4388_v56, %v4360_v4  ;;  %v4424_v54 = vadd.f32 %v4416_v26, %v4395_v34  ;;  %4103 = vst.msk [vmem:[#allocation4 + $0x40] sm:$0xff] %vm4092_vm4, %v4090_v24  ;;  %v4091_v47 = vmax.f32 %v4081_v31, 0.0  ;;  %v4455_v39 = vmul.f32 %v8752_v55, %v8780_v42  ;;  %v4342_v42 = vld [vmem:[#allocation4 + $0x28] sm:$0xff]  ;;  %v8867_v56 = vld [vmem:[%s9169_s16] ss:$0 sm:$0xff]  ;;  %v8871_v33 = vpop.permute.xlu1 %4168  ;;  %s9173_s16 = sld [smem:[#allocation20_spill]] }
 0x524   : > { %v4397_v52 = vadd.f32 %v4389_v6, %v4361_v13  ;;  %4101 = vst.msk [vmem:[#allocation4 + $0x30] sm:$0xff] %vm4092_vm4, %v4088_v43  ;;  %v4089_v20 = vmax.f32 %v4073_v41, 0.0  ;;  %v4186_v30 = vmul.f32 %v8737_v37, %v4174_v53  ;;  %v4418_v51 = vmul.f32 %v8776_v50, %v4406_v7  ;;  %v8864_v53 = vpop.permute.xlu0 %4163 }
 0x525   : > { %v4425_v63 = vadd.f32 %v4417_v0, %v4396_v5  ;;  %4104 = vst.msk [vmem:[#allocation4 + $0x48] sm:$0xff] %vm4092_vm4, %v4091_v47  ;;  %v4445_v6 = vadd.f32 %v4437_v49, %v4424_v54  ;;  %v4466_v36 = vmul.f32 %v8849_v19, %v4454_v29  ;;  %v4467_v25 = vmul.f32 %v8849_v19, %v4455_v39 }
 0x526   : > { %4102 = vst.msk [vmem:[#allocation4 + $0x38] sm:$0xff] %vm4092_vm4, %v4089_v20  ;;  %v4222_v57 = vadd.f32 %v8767_v48, %v4186_v30  ;;  %v4290_v55 = vmul.f32 %v8764_v12, %v8794_v15  ;;  %v4426_v45 = vadd.f32 %v4418_v51, %v4397_v52  ;;  %v4175_v7 = vmul.f32 %v8784_v23, %v8837_v22 }
 0x527   : > { %v4446_v14 = vadd.f32 %v8788_v62, %v4425_v63  ;;  %v4474_v40 = vadd.f32 %v4466_v36, %v4445_v6  ;;  %v4326_v62 = vmul.f32 %v8770_v61, %v8802_v16  ;;  %v4439_v4 = vmul.f32 %v8761_v3, %v4342_v42  ;;  %v4263_v6 = vpop.permute.xlu1 %4262 }
 0x528   : > { %v4298_v48 = vadd.f32 %v4290_v55, %v4222_v57  ;;  %v4187_v15 = vmul.f32 %v8737_v37, %v4175_v7  ;;  %v4215_v34 = vmul.f32 %v4342_v42, %v8744_v60  ;;  %v4354_v0 = vmul.f32 %v8758_v59, %v4342_v42  ;;  %v4258_v49 = vpop.permute.xlu0 %4257 }
 0x529   : > { %v4475_v58 = vadd.f32 %v4467_v25, %v4446_v14  ;;  %v4489_v26 = vadd.f32 %v8867_v56, %v4474_v40  ;;  %v4447_v43 = vadd.f32 %v4439_v4, %v4426_v45 }
 0x52a   : > { %v4334_v31 = vadd.f32 %v4326_v62, %v4298_v48  ;;  %v8880_v28 = vld [vmem:[#allocation4 + $0x40] sm:$0xff]  ;;  %v4223_v41 = vadd.f32 %v4215_v34, %v4187_v15 }
 0x52b   : > { %v4490_v24 = vadd.f32 %v8867_v56, %v4475_v58  ;;  %v4307_v23 = vld [vmem:[#allocation4 + $0x2f] sm:$0xff]  ;;  %v8887_v52 = vmul.f32 %v8761_v3, %v8880_v28  ;;  %v8893_v51 = vmul.f32 %v8880_v28, %v8744_v60 }
 0x52c   : > { %v4343_v13 = vld [vmem:[#allocation4 + $0x30] sm:$0xff]  ;;  %v4407_v47 = vmul.f32 %v4307_v23, %v8733_v21  ;;  %v4362_v29 = vadd.f32 %v4354_v0, %v4334_v31  ;;  %v4176_v39 = vmul.f32 %v4307_v23, %v8841_v10  ;;  %v4315_v42 = vmul.f32 %v4307_v23, %v8837_v22 }
 0x52d   : > { %v4370_v16 = vld [vmem:[#allocation4 + $0x29] sm:$0xff]  ;;  %v4497_v5 = vpack.c.bf16 %v4490_v24, %v4489_v26  ;;  %v4371_v20 = vld [vmem:[#allocation4 + $0x31] sm:$0xff]  ;;  %v4216_v14 = vmul.f32 %v4343_v13, %v8744_v60  ;;  %v4309_v62 = vld [vmem:[#allocation4 + $0x3f] sm:$0xff] }
 0x52e   : > { %v4378_v54 = vmul.f32 %v4370_v16, %v8778_v18  ;;  %v4456_v63 = vmul.f32 %v4370_v16, %v8790_v38  ;;  %v4308_v30 = vld [vmem:[#allocation4 + $0x37] sm:$0xff]  ;;  %v4457_v36 = vmul.f32 %v4371_v20, %v8778_v18  ;;  %v4279_v25 = vmul.f32 %v4370_v16, %v4258_v49 }
 0x52f   : > { %6251 = vmatprep.mubr.msk.bf16.mxu0 %vm4092_vm4, %v4497_v5  ;;  %v4188_v38 = vmul.f32 %v8737_v37, %v4176_v39  ;;  %v4280_v55 = vmul.f32 %v4371_v20, %v4263_v6  ;;  %v4419_v40 = vmul.f32 %v8776_v50, %v4407_v47  ;;  %v4316_v58 = vmul.f32 %v4308_v30, %v8841_v10  ;;  %v4372_v34 = vld [vmem:[#allocation4 + $0x39] sm:$0xff] }
 0x530   : > { %v4390_v21 = vmul.f32 %v8773_v32, %v4378_v54  ;;  %v4468_v57 = vmul.f32 %v8849_v19, %v4456_v63  ;;  %v4291_v7 = vmul.f32 %v8764_v12, %v4279_v25  ;;  %v4440_v18 = vmul.f32 %v8761_v3, %v4343_v13  ;;  %v4344_v0 = vld [vmem:[#allocation4 + $0x38] sm:$0xff]  ;;  %v4373_v25 = vld [vmem:[#allocation4 + $0x41] sm:$0xff] }
 0x531   : > { %v4469_v48 = vmul.f32 %v8849_v19, %v4457_v36  ;;  %v4224_v4 = vadd.f32 %v4216_v14, %v4188_v38  ;;  %v4292_v15 = vmul.f32 %v8764_v12, %v4280_v55  ;;  %v4327_v23 = vmul.f32 %v8770_v61, %v4315_v42 }
 0x532   : > { %v4398_v45 = vadd.f32 %v4390_v21, %v4362_v29  ;;  %v4476_v24 = vadd.f32 %v4468_v57, %v4447_v43  ;;  %v4299_v31 = vadd.f32 %v4291_v7, %v4223_v41  ;;  %v4317_v5 = vmul.f32 %v4309_v62, %v8864_v53 }
 0x533   : > { %v4300_v16 = vadd.f32 %v4292_v15, %v4224_v4  ;;  %v4328_v54 = vmul.f32 %v8770_v61, %v4316_v58  ;;  %v4355_v47 = vmul.f32 %v8758_v59, %v4343_v13  ;;  %v4379_v39 = vmul.f32 %v4371_v20, %v4258_v49 }
 0x534   : > { %v4427_v26 = vadd.f32 %v4419_v40, %v4398_v45  ;;  %v4335_v63 = vadd.f32 %v4327_v23, %v4299_v31  ;;  %v4380_v21 = vmul.f32 %v4372_v34, %v4263_v6  ;;  %v4356_v14 = vmul.f32 %v8758_v59, %v4344_v0 }
 0x535   : > { %v4336_v36 = vadd.f32 %v4328_v54, %v4300_v16  ;;  %v4408_v43 = vmul.f32 %v4308_v30, %v8837_v22  ;;  %v4409_v41 = vmul.f32 %v4309_v62, %v8841_v10  ;;  %v4491_v38 = vadd.f32 %v8867_v56, %v4476_v24  ;;  %v4268_v24 = vpop.permute.xlu0 %4267 }
 0x536   : > { %v4448_v29 = vadd.f32 %v4440_v18, %v4427_v26  ;;  %v4363_v55 = vadd.f32 %v4355_v47, %v4335_v63  ;;  %v4391_v42 = vmul.f32 %v8773_v32, %v4379_v39  ;;  %v4392_v13 = vmul.f32 %v8773_v32, %v4380_v21  ;;  %v4310_v26 = vld [vmem:[#allocation4 + $0x47] sm:$0xff]  ;;  %v4273_v47 = vpop.permute.xlu1 %4272 }
 0x537   : > { %v4364_v45 = vadd.f32 %v4356_v14, %v4336_v36  ;;  %v4420_v20 = vmul.f32 %v8776_v50, %v4408_v43  ;;  %v4421_v40 = vmul.f32 %v8776_v50, %v4409_v41  ;;  %v4458_v18 = vmul.f32 %v4372_v34, %v4258_v49  ;;  %v4374_v43 = vld [vmem:[#allocation4 + $0x49] sm:$0xff] }
 0x538   : > { %v4477_v57 = vadd.f32 %v4469_v48, %v4448_v29  ;;  %v4399_v58 = vadd.f32 %v4391_v42, %v4363_v55  ;;  %v4459_v22 = vmul.f32 %v4373_v25, %v4263_v6  ;;  %v4441_v10 = vmul.f32 %v8761_v3, %v4344_v0  ;;  %v4346_v42 = vld [vmem:[#allocation4 + $0x48] sm:$0xff] }
 0x539   : > { %v4400_v4 = vadd.f32 %v4392_v13, %v4364_v45  ;;  %v4177_v48 = vmul.f32 %v4308_v30, %v8864_v53  ;;  %v4178_v15 = vmul.f32 %v4309_v62, %v8871_v33  ;;  %v4470_v16 = vmul.f32 %v8849_v19, %v4458_v18  ;;  %v4403_v45 = vld [vmem:[#allocation4 + $0x4f] sm:$0xff] }
 0x53a   : > { %v4492_v7 = vadd.f32 %v8867_v56, %v4477_v57  ;;  %v4428_v23 = vadd.f32 %v4420_v20, %v4399_v58  ;;  %v4217_v54 = vmul.f32 %v4344_v0, %v8744_v60  ;;  %v4281_v63 = vmul.f32 %v4372_v34, %v4268_v24 }
 0x53b   : > { %v4429_v29 = vadd.f32 %v4421_v40, %v4400_v4  ;;  %v4189_v49 = vmul.f32 %v8737_v37, %v4177_v48  ;;  %v4190_v6 = vmul.f32 %v8737_v37, %v4178_v15  ;;  %v4471_v62 = vmul.f32 %v8849_v19, %v4459_v22  ;;  %v4453_v22 = vld [vmem:[#allocation4 + $0x51] sm:$0xff] }
 0x53c   : > { %v4498_v31 = vpack.c.bf16 %v4492_v7, %v4491_v38  ;;  %v4449_v30 = vadd.f32 %v4441_v10, %v4428_v23  ;;  %v4282_v39 = vmul.f32 %v4373_v25, %v4273_v47  ;;  %v4318_v21 = vmul.f32 %v4310_v26, %v8871_v33  ;;  %v4432_v48 = vld [vmem:[#allocation4 + $0x50] sm:$0xff] }
 0x53d   : > { %v4450_v36 = vadd.f32 %v8887_v52, %v4429_v29  ;;  %v4225_v14 = vadd.f32 %v4217_v54, %v4189_v49  ;;  %v4226_v60 = vadd.f32 %v8893_v51, %v4190_v6  ;;  %v4293_v0 = vmul.f32 %v8764_v12, %v4281_v63 }
 0x53e   : > { %6252 = vmatmul.mubr.msk.bf16.vlgmr.msra.gmra.mrb[72].mxu0 %vm4092_vm4, %v4498_v31  ;;  %v4478_v41 = vadd.f32 %v4470_v16, %v4449_v30  ;;  %v4294_v37 = vmul.f32 %v8764_v12, %v4282_v39  ;;  %v4381_v34 = vmul.f32 %v4373_v25, %v4268_v24  ;;  %v4329_v55 = vmul.f32 %v8770_v61, %v4317_v5 }
 0x53f   : > { %v4479_v57 = vadd.f32 %v4471_v62, %v4450_v36  ;;  %v4301_v38 = vadd.f32 %v4293_v0, %v4225_v14  ;;  %v4357_v13 = vmul.f32 %v8758_v59, %v8880_v28  ;;  %v4330_v20 = vmul.f32 %v8770_v61, %v4318_v21  ;;  %v4648_v21 = vld [vmem:[%s9170_s26] sm:$0xff] }
 0x540   : > { %v4302_v52 = vadd.f32 %v4294_v37, %v4226_v60  ;;  %v4382_v51 = vmul.f32 %v4374_v43, %v4273_v47  ;;  %v4493_v40 = vadd.f32 %v8867_v56, %v4478_v41  ;;  %v4410_v12 = vmul.f32 %v4310_v26, %v8864_v53 }
 0x541   : > { %v4494_v7 = vadd.f32 %v8867_v56, %v4479_v57  ;;  %v4337_v58 = vadd.f32 %v4329_v55, %v4301_v38  ;;  %v4358_v18 = vmul.f32 %v8758_v59, %v4346_v42  ;;  %v4411_v5 = vmul.f32 %v4403_v45, %v8871_v33 }
 0x542   : > { %v4338_v25 = vadd.f32 %v4330_v20, %v4302_v52  ;;  %v4393_v28 = vmul.f32 %v8773_v32, %v4381_v34  ;;  %v4394_v15 = vmul.f32 %v8773_v32, %v4382_v51  ;;  %v4422_v23 = vmul.f32 %v8776_v50, %v4410_v12 }
 0x543   : > { %v4499_v4 = vpack.c.bf16 %v4494_v7, %v4493_v40  ;;  %v4365_v10 = vadd.f32 %v4357_v13, %v4337_v58  ;;  %v4460_v53 = vmul.f32 %v4374_v43, %v4268_v24  ;;  %v4461_v26 = vmul.f32 %v4453_v22, %v4273_v47 }
 0x544   : > { %v4366_v61 = vadd.f32 %v4358_v18, %v4338_v25  ;;  %v4423_v59 = vmul.f32 %v8776_v50, %v4411_v5  ;;  %v4444_v33 = vmul.f32 %v8761_v3, %v4432_v48  ;;  %v4443_v29 = vmul.f32 %v8761_v3, %v4346_v42  ;;  %v6011_v3 = vld [vmem:[%s9171_s1] ss:$0 sm:$0xff]  ;;  %s9174_s1 = sld [smem:[#allocation21_spill]] }
 0x545   : > { %6255 = vmatprep.mubr.msk.bf16.mxu0 %vm4092_vm4, %v4499_v4  ;;  %v4401_v31 = vadd.f32 %v4393_v28, %v4365_v10  ;;  %v4472_v32 = vmul.f32 %v8849_v19, %v4460_v53  ;;  %v4473_v63 = vmul.f32 %v8849_v19, %v4461_v26  ;;  %v6024_v53 = vld [vmem:[%s9170_s26 + $0x10] sm:$0xff]  ;;  %v6025_v26 = vld [vmem:[%s9170_s26 + $0x18] sm:$0xff] }
 0x546   : > { %v4402_v16 = vadd.f32 %v4394_v15, %v4366_v61 }
 0x547   : > { %v4430_v54 = vadd.f32 %v4422_v23, %v4401_v31  ;;  %v4649_v23 = vld [vmem:[%s9170_s26 + $0x8] sm:$0xff] }
 0x548   : > { %v4431_v49 = vadd.f32 %v4423_v59, %v4402_v16  ;;  %v8965_v16 = vld [vmem:[#allocation3] sm:$0xff]  ;;  %v6543_v59 = vld [vmem:[%s9172_s8] sm:$0xff]  }
 0x549   : > { %v4451_v6 = vadd.f32 %v4443_v29, %v4430_v54  ;;  %4819 = vst.msk [vmem:[#allocation5] sm:$0xff] %vm4818_vm6, %v8965_v16  ;;  %4820 = vst.msk [vmem:[#allocation5 + $0x18] sm:$0xff] %vm4818_vm6, %v8965_v16  ;;  %6301 = vmatprep.mubr.msk.bf16.mxu1 %vm6695_vm7, %v8965_v16  ;;  %6294 = vmatpush3.bf16.msra.mxu1 %v6543_v59  ;;  %v6545_v54 = vld [vmem:[%s9172_s8 + $0x10] sm:$0xff]   ;;  %v6546_v29 = vld [vmem:[%s9172_s8 + $0x18] sm:$0xff]  }
 0x54a   : > { %v4452_v30 = vadd.f32 %v4444_v33, %v4431_v49  ;;  %v6544_v33 = vld [vmem:[%s9172_s8 + $0x8] sm:$0xff]   ;;  %6295 = vmatprep.subr.bf16.mxu1 %v8965_v16  ;;  %5048 = vst.msk [vmem:[#allocation6] sm:$0xff] %vm5047_vm8, %v8965_v16  ;;  %5049 = vst.msk [vmem:[#allocation6 + $0x18] sm:$0xff] %vm5047_vm8, %v8965_v16 }
 0x54b   : > { %v4480_v62 = vadd.f32 %v4472_v32, %v4451_v6 }
 0x54c   : > { %v4481_v24 = vadd.f32 %v4473_v63, %v4452_v30 }
 0x54d   : > { %v4495_v47 = vadd.f32 %v8867_v56, %v4480_v62  ;;  %6296 = vmatpush3.bf16.msra.mxu1 %v6544_v33 }
 0x54e   : > { %v4496_v39 = vadd.f32 %v8867_v56, %v4481_v24  ;;  %6297 = vmatprep.subr.bf16.mxu1 %v8965_v16  ;;  %v4840_v24 = vpop.permute.xlu1 %4839 }
 0x550   : > { %v4500_v50 = vpack.c.bf16 %v4496_v39, %v4495_v47  ;;  %v4835_v47 = vpop.permute.xlu0 %4834  ;;  %v4823_v39 = vld [vmem:[%s9173_s16] sm:$0xff] }
 0x551   : > { %6298 = vmatpush3.bf16.msra.mxu1 %v6545_v54 }
 0x552   : > { %6256 = vmatmul.mubr.msk.bf16.gmra.mrb[76].mxu0 %vm4092_vm4, %v4500_v50  ;;  %6299 = vmatprep.subr.bf16.mxu1 %v8965_v16  ;;  %v4857_v50 = vrot.slane %v4823_v39, %v7185_v9 }
 0x553   : > { %6273 = vmatprep.mubr.msk.f32.mxu0 %vm4650_vm5, %v4648_v21  ;;  %v4847_v21 = vrot.slane %v4823_v39, %v7182_v8 }
 0x555   : > { %6300 = vmatpush3.bf16.msra.mxu1 %v6546_v29  ;;  %v4925_v29 = vrot.slane %v4823_v39, %v7232_v46 }
 0x611   : > { %v6253_v36 = vpop.f32.mrb[72].mxu0 }
 0x612   : > { %v4611_v14 = vadd.f32 %v6253_v36, %v6011_v3  ;;  %v4602_v60 = vpop.f32.mrb[73].mxu0 }
 0x613   : > { %v4603_v0 = vadd.f32 %v6011_v3, %v4602_v60  ;;  %v6254_v19 = vpop.f32.mrb[74].mxu0  ;;  %v4872_v60 = vpop.permute.xlu1 %4871 }
 0x614   : > { %v4614_v43 = vadd.f32 %v6254_v19, %v6011_v3  ;;  %v4605_v41 = vpop.f32.mrb[75].mxu0  ;;  %v4635_v34 = vmax.f32 %v4611_v14, 0.0 }
 0x615   : > { %v4606_v37 = vadd.f32 %v6011_v3, %v4605_v41  ;;  %v4633_v38 = vmax.f32 %v4603_v0, 0.0  ;;  %v4867_v0 = vpop.permute.xlu0 %4866 }
 0x616   : > { %v4636_v57 = vmax.f32 %v4614_v43, 0.0 }
 0x617   : > { %v4634_v56 = vmax.f32 %v4606_v37, 0.0 }
 0x618   : > { %v4643_v55 = vmax.f32 %v4635_v34, %v4636_v57 }
 0x619   : > { %v4641_v42 = vmax.f32 %v4633_v38, %v4634_v56  ;;  %v4642_v45 = vmax.f32 %v4634_v56, %v4635_v34  ;;  %v4891_v38 = vrot.slane %v4823_v39, %v7211_v27 }
 0x61b   : > { %v6423_v13 = vpack.c.bf16 %v4642_v45, %v4641_v42 }
 0x61d   : > { %6424 = vmatprep.subr.bf16.mxu0 %v6423_v13 }
 0x61e   : > { %6426 = vmatpush3.bf16.msra.mxu0 %v6423_v13 }
 0x625   : > { %v6257_v52 = vpop.f32.mrb[76].mxu0 }
 0x626   : > { %v4627_v20 = vadd.f32 %v6257_v52, %v6011_v3  ;;  %v4618_v51 = vpop.f32.mrb[77].mxu0 }
 0x627   : > { %v4619_v40 = vadd.f32 %v6011_v3, %v4618_v51  ;;  %v6258_v7 = vpop.f32.mrb[78].mxu0 }
 0x628   : > { %v4630_v58 = vadd.f32 %v6258_v7, %v6011_v3  ;;  %v4621_v12 = vpop.f32.mrb[79].mxu0  ;;  %v4639_v5 = vmax.f32 %v4627_v20, 0.0 }
 0x629   : > { %v4637_v25 = vmax.f32 %v4619_v40, 0.0  ;;  %v4622_v18 = vadd.f32 %v6011_v3, %v4621_v12 }
 0x62a   : > { %v4640_v22 = vmax.f32 %v4630_v58, 0.0 }
 0x62b   : > { %v4644_v4 = vmax.f32 %v4636_v57, %v4637_v25  ;;  %v4638_v10 = vmax.f32 %v4622_v18, 0.0  ;;  %v4879_v57 = vrot.slane %v4823_v39, %v7200_v17 }
 0x62c   : > { %v4647_v28 = vmax.f32 %v4639_v5, %v4640_v22 }
 0x62d   : > { %v6427_v48 = vpack.c.bf16 %v4644_v4, %v4643_v55  ;;  %v4645_v61 = vmax.f32 %v4637_v25, %v4638_v10  ;;  %v4646_v15 = vmax.f32 %v4638_v10, %v4639_v5  ;;  %v4901_v25 = vrot.slane %v4823_v39, %v7221_v35 }
 0x62f   : > { %v6431_v31 = vpack.c.bf16 %v4646_v15, %v4645_v61  ;;  %6428 = vmatprep.subr.bf16.mxu0 %v6427_v48 }
 0x630   : > { %6430 = vmatpush3.bf16.msra.mxu0 %v6427_v48 }
 0x631   : > { %6432 = vmatprep.subr.bf16.mxu0 %v6431_v31 }
 0x634   : > { %6434 = vmatpush3.bf16.msra.mxu0 %v6431_v31 }
 0x635   : > { %6271 = vmatprep.subr.mxu0 %v4647_v28 }
 0x638   : > { %6272 = vmatpush3.msra.mxu0 %v4647_v28 }
 0x639   : > { %6436 = vmatprep.subr.bf16.mxu0 %v6423_v13  ;;  %6274 = vmatmul.mubr.msk.f32.vlgmr.msra.gmra.mrb[80].mxu0 %vm4650_vm5, %v4649_v23 }
 0x63a   : > { %6438 = vmatpush3.bf16.msra.mxu0 %v6423_v13  ;;  %6290 = vmatprep.mubr.msk.f32.mxu0 %vm4650_vm5, %v6024_v53 }
 0x63b   : > { %6440 = vmatprep.subr.bf16.mxu0 %v6427_v48 }
 0x63e   : > { %6442 = vmatpush3.bf16.msra.mxu0 %v6427_v48 }
 0x63f   : > { %6444 = vmatprep.subr.bf16.mxu0 %v6431_v31 }
 0x642   : > { %6446 = vmatpush3.bf16.msra.mxu0 %v6431_v31  ;;  %v4913_v31 = vrot.slane %v4823_v39, %v7229_v44 }
 0x643   : > { %6288 = vmatprep.subr.mxu0 %v4647_v28 }
 0x646   : > { %6289 = vmatpush3.msra.mxu0 %v4647_v28 }
 0x647   : > { %6291 = vmatmul.mubr.msk.f32.vlgmr.msra.gmra.mrb[82].mxu0 %vm4650_vm5, %v6025_v26  ;;  %6305 = vmatprep.subr.bf16.mxu0 %v8965_v16 }
 0x648   : > { %6311 = vmatprep.mubr.msk.bf16.mxu0 %vm6695_vm7, %v8965_v16 }
 0x70c   : > { %v6275_v49 = vpop.f32.mrb[80].mxu0 }
 0x70d   : > { %v4723_v6 = vpop.f32.mrb[81].mxu0 }
 0x71a   : > { %v6292_v32 = vpop.f32.mrb[82].mxu0 }
 0x71b   : > { %v4817_v63 = vmax.f32 %v6275_v49, %v6292_v32  ;;  %v4807_v30 = vpop.f32.mrb[83].mxu0 }
 0x71c   : > { %v4816_v62 = vmax.f32 %v4723_v6, %v4807_v30  ;;  %v4935_v30 = vrot.slane %v4823_v39, %v7256_v1 }
 0x71d   : > { %4822 = vst.msk [vmem:[#allocation5 + $0x10] sm:$0xff] %vm4818_vm6, %v4817_v63 }
 0x71e   : > { %4821 = vst.msk [vmem:[#allocation5 + $0x8] sm:$0xff] %vm4818_vm6, %v4816_v62 }
 0x724   : > { %v4907_v12 = vld [vmem:[#allocation5 + $0x11] sm:$0xff] }
 0x725   : > { %v4830_v3 = vld [vmem:[#allocation5 + $0x3] sm:$0xff]  ;;  %v4831_v36 = vld [vmem:[#allocation5 + $0xb] sm:$0xff]  ;;  %v4919_v10 = vld [vmem:[#allocation5 + $0x13] sm:$0xff]  ;;  %v4909_v15 = vmul.f32 %v4907_v12, %v4872_v60 }
 0x726   : > { %v4852_v14 = vld [vmem:[#allocation5 + $0x4] sm:$0xff]  ;;  %v4842_v19 = vmul.f32 %v4835_v47, %v4830_v3  ;;  %v4843_v43 = vmul.f32 %v4840_v24, %v4831_v36  ;;  %v4853_v41 = vld [vmem:[#allocation5 + $0xc] sm:$0xff]  ;;  %v4920_v33 = vmul.f32 %v4835_v47, %v4831_v36  ;;  %v4921_v54 = vmul.f32 %v4919_v10, %v4840_v24  ;;  %v4941_v62 = vld [vmem:[#allocation5 + $0x15] sm:$0xff] }
 0x727   : > { %v4862_v37 = vld [vmem:[#allocation5 + $0x5] sm:$0xff]  ;;  %v4863_v34 = vld [vmem:[#allocation5 + $0xd] sm:$0xff]  ;;  %v4858_v56 = vmul.f32 %v4857_v50, %v4852_v14  ;;  %v4859_v55 = vmul.f32 %v4857_v50, %v4853_v41  ;;  %v4915_v14 = vmul.f32 %v4913_v31, %v4909_v15  ;;  %v5068_v15 = vpop.permute.xlu1 %5067 }
 0x728   : > { %v4874_v42 = vmul.f32 %v4867_v0, %v4862_v37  ;;  %v4875_v45 = vmul.f32 %v4872_v60, %v4863_v34  ;;  %v4884_v13 = vld [vmem:[#allocation5 + $0x7] sm:$0xff]  ;;  %v4885_v52 = vld [vmem:[#allocation5 + $0xf] sm:$0xff]  ;;  %v4848_v20 = vmul.f32 %v4847_v21, %v4842_v19  ;;  %v4849_v51 = vmul.f32 %v4847_v21, %v4843_v43 }
 0x729   : > { %v4886_v40 = vmul.f32 %v4884_v13, %v4835_v47  ;;  %v4887_v7 = vmul.f32 %v4885_v52, %v4840_v24  ;;  %v4906_v58 = vld [vmem:[#allocation5 + $0x9] sm:$0xff]  ;;  %v4926_v19 = vmul.f32 %v4925_v29, %v4920_v33  ;;  %v4927_v43 = vmul.f32 %v4925_v29, %v4921_v54  ;;  %v4931_v37 = vld [vmem:[#allocation5 + $0x14] sm:$0xff] }
 0x72a   : > { %v4860_v18 = vadd.f32 %v4858_v56, %v4848_v20  ;;  %v4861_v5 = vadd.f32 %v4859_v55, %v4849_v51  ;;  %v4880_v22 = vmul.f32 %v4879_v57, %v4874_v42  ;;  %v4881_v4 = vmul.f32 %v4879_v57, %v4875_v45  ;;  %v4896_v28 = vld [vmem:[#allocation5 + $0x8] sm:$0xff]  ;;  %v4897_v48 = vld [vmem:[#allocation5 + $0x10] sm:$0xff] }
 0x72b   : > { %v4908_v61 = vmul.f32 %v4906_v58, %v4867_v0  ;;  %v4892_v26 = vmul.f32 %v4891_v38, %v4886_v40  ;;  %v4893_v59 = vmul.f32 %v4891_v38, %v4887_v7  ;;  %v4902_v32 = vmul.f32 %v4901_v25, %v4896_v28  ;;  %v6030_v38 = vld [vmem:[%s9173_s16 + $0x8] ss:$0 sm:$0xff]  ;;  %v6031_v51 = vld [vmem:[%s9174_s1] ss:$0 sm:$0xff]  ;;  %s9177_s1 = sld [smem:[#allocation24_spill]] }
 0x72c   : > { %v4882_v23 = vadd.f32 %v4880_v22, %v4860_v18  ;;  %v4883_v53 = vadd.f32 %v4881_v4, %v4861_v5  ;;  %v4903_v63 = vmul.f32 %v4901_v25, %v4897_v48  ;;  %v4942_v36 = vmul.f32 %v4867_v0, %v4863_v34  ;;  %v6549_v34 = vld [vmem:[%s9175_s3 + $0x10] sm:$0xff]  }
 0x72d   : > { %v4914_v3 = vmul.f32 %v4913_v31, %v4908_v61  ;;  %v4943_v57 = vmul.f32 %v4941_v62, %v4872_v60  ;;  %v4936_v42 = vmul.f32 %v4935_v30, %v4853_v41  ;;  %v4937_v45 = vmul.f32 %v4935_v30, %v4931_v37  ;;  %v6547_v60 = vld [vmem:[%s9175_s3] sm:$0xff]   ;;  %v6548_v41 = vld [vmem:[%s9175_s3 + $0x8] sm:$0xff]   ;;  %v5063_v61 = vpop.permute.xlu0 %5062  ;;  %s9179_s3 = sld [smem:[#allocation32_spill]] }
 0x72e   : > { %v4894_v49 = vadd.f32 %v4892_v26, %v4882_v23  ;;  %v4895_v6 = vadd.f32 %v4893_v59, %v4883_v53  ;;  %v4948_v52 = vmul.f32 %v6030_v38, %v4942_v36  ;;  %6306 = vmatpush3.bf16.msra.mxu0 %v6547_v60 }
 0x72f   : > { %v4949_v20 = vmul.f32 %v6030_v38, %v4943_v57  ;;  %6307 = vmatprep.subr.bf16.mxu0 %v8965_v16 }
 0x730   : > { %v4904_v50 = vadd.f32 %v4902_v32, %v4894_v49  ;;  %v4905_v21 = vadd.f32 %v4903_v63, %v4895_v6  ;;  %v5100_v63 = vpop.permute.xlu1 %5099 }
 0x731   : > { %v5052_v31 = vld [vmem:[%s9177_s1] sm:$0xff]  ;;  %v5095_v26 = vpop.permute.xlu0 %5094 }
 0x732   : > { %v4916_v47 = vadd.f32 %v4914_v3, %v4904_v50  ;;  %v4917_v24 = vadd.f32 %v4915_v14, %v4905_v21  ;;  %6308 = vmatpush3.bf16.msra.mxu0 %v6548_v41  ;;  %v5075_v23 = vrot.slane %v5052_v31, %v7182_v8  ;;  %v5085_v53 = vrot.slane %v5052_v31, %v7185_v9 }
 0x733   : > { %6309 = vmatprep.subr.bf16.mxu0 %v8965_v16  ;;  %v5107_v6 = vrot.slane %v5052_v31, %v7200_v17  ;;  %v5119_v3 = vrot.slane %v5052_v31, %v7211_v27  ;;  %v5129_v36 = vrot.slane %v5052_v31, %v7221_v35  ;;  %v5153_v35 = vrot.slane %v5052_v31, %v7232_v46  ;;  %v6040_v46 = vld [vmem:[%s9177_s1 + $0x8] ss:$0 sm:$0xff]  ;;  %s9181_s1 = sld [smem:[#allocation27_spill]] }
 0x734   : > { %v4928_v56 = vadd.f32 %v4926_v19, %v4916_v47  ;;  %v4929_v55 = vadd.f32 %v4927_v43, %v4917_v24 }
 0x736   : > { %v4938_v39 = vadd.f32 %v4936_v42, %v4928_v56  ;;  %v4939_v13 = vadd.f32 %v4937_v45, %v4929_v55  ;;  %6310 = vmatpush3.bf16.msra.mxu0 %v6549_v34 }
 0x737   : > { %6315 = vmatprep.subr.bf16.mxu0 %v8965_v16 }
 0x738   : > { %v4950_v40 = vadd.f32 %v4948_v52, %v4938_v39  ;;  %v4951_v7 = vadd.f32 %v4949_v20, %v4939_v13  ;;  %v5141_v52 = vrot.slane %v5052_v31, %v7229_v44 }
 0x73a   : > { %v4959_v58 = vadd.f32 %v6031_v51, %v4950_v40  ;;  %v4960_v12 = vadd.f32 %v6031_v51, %v4951_v7 }
 0x73c   : > { %v4961_v0 = vpack.c.bf16 %v4960_v12, %v4959_v58 }
 0x73e   : > { %6302 = vmatmul.mubr.msk.bf16.vlgmr.msra.gmra.mrb[64].mxu1 %vm4818_vm6, %v4961_v0 }
 0x73f   : > { %5410 = vmatprep.mubr.bf16.mxu1 %v6691_v2  ;;  %v6032_v2 = vld [vmem:[%s9176_s4] ss:$0 sm:$0xff]  ;;  %s9178_s4 = sld [smem:[#allocation25_spill]] }
 0x811   : > { %v5038_v25 = vpop.f32.mrb[64].mxu1 }
 0x812   : > { %v5039_v18 = vadd.f32 %v6032_v2, %v5038_v25  ;;  %v6303_v5 = vpop.f32.mrb[65].mxu1 }
 0x813   : > { %v5041_v22 = vpop.f32.mrb[66].mxu1 }
 0x814   : > { %v5045_v4 = vmax.f32 %v5039_v18, 0.0  ;;  %v5042_v10 = vadd.f32 %v6032_v2, %v5041_v22  ;;  %v6304_v28 = vpop.f32.mrb[67].mxu1  ;;  %v5163_v18 = vrot.slane %v5052_v31, %v7256_v1 }
 0x816   : > { %5050 = vst.msk [vmem:[#allocation6 + $0x8] sm:$0xff] %vm5047_vm8, %v5045_v4  ;;  %v5046_v48 = vmax.f32 %v5042_v10, 0.0 }
 0x818   : > { %5051 = vst.msk [vmem:[#allocation6 + $0x10] sm:$0xff] %vm5047_vm8, %v5046_v48 }
 0x81d   : > { %v5058_v59 = vld [vmem:[#allocation6 + $0x3] sm:$0xff] }
 0x81e   : > { %v5080_v33 = vld [vmem:[#allocation6 + $0x4] sm:$0xff]  ;;  %v5070_v29 = vmul.f32 %v5063_v61, %v5058_v59 }
 0x81f   : > { %v5090_v54 = vld [vmem:[#allocation6 + $0x5] sm:$0xff]  ;;  %v5091_v50 = vld [vmem:[#allocation6 + $0xd] sm:$0xff]  ;;  %v5086_v43 = vmul.f32 %v5085_v53, %v5080_v33  ;;  %v5169_v28 = vld [vmem:[#allocation6 + $0x15] sm:$0xff] }
 0x820   : > { %v5102_v49 = vmul.f32 %v5095_v26, %v5090_v54  ;;  %v5112_v32 = vld [vmem:[#allocation6 + $0x7] sm:$0xff]  ;;  %v5076_v19 = vmul.f32 %v5075_v23, %v5070_v29  ;;  %v5103_v37 = vmul.f32 %v5100_v63, %v5091_v50  ;;  %v5113_v47 = vld [vmem:[#allocation6 + $0xf] sm:$0xff]  ;;  %v5170_v59 = vmul.f32 %v5095_v26, %v5091_v50 }
 0x821   : > { %v5059_v30 = vld [vmem:[#allocation6 + $0xb] sm:$0xff]  ;;  %v5114_v21 = vmul.f32 %v5112_v32, %v5063_v61  ;;  %v5115_v42 = vmul.f32 %v5113_v47, %v5068_v15  ;;  %v5147_v0 = vld [vmem:[#allocation6 + $0x13] sm:$0xff] }
 0x822   : > { %v5081_v62 = vld [vmem:[#allocation6 + $0xc] sm:$0xff]  ;;  %v5071_v14 = vmul.f32 %v5068_v15, %v5059_v30  ;;  %v5088_v56 = vadd.f32 %v5086_v43, %v5076_v19  ;;  %v5108_v55 = vmul.f32 %v5107_v6, %v5102_v49  ;;  %v5109_v27 = vmul.f32 %v5107_v6, %v5103_v37  ;;  %v5159_v33 = vld [vmem:[#allocation6 + $0x14] sm:$0xff] }
 0x823   : > { %v5087_v24 = vmul.f32 %v5085_v53, %v5081_v62  ;;  %v5134_v57 = vld [vmem:[#allocation6 + $0x9] sm:$0xff]  ;;  %v5135_v39 = vld [vmem:[#allocation6 + $0x11] sm:$0xff]  ;;  %v5120_v13 = vmul.f32 %v5119_v3, %v5114_v21  ;;  %v5121_v41 = vmul.f32 %v5119_v3, %v5115_v42  ;;  %v5148_v2 = vmul.f32 %v5063_v61, %v5059_v30 }
 0x824   : > { %v5077_v38 = vmul.f32 %v5075_v23, %v5071_v14  ;;  %v5124_v45 = vld [vmem:[#allocation6 + $0x8] sm:$0xff]  ;;  %v5110_v51 = vadd.f32 %v5108_v55, %v5088_v56  ;;  %v5125_v40 = vld [vmem:[#allocation6 + $0x10] sm:$0xff]  ;;  %v5136_v7 = vmul.f32 %v5134_v57, %v5095_v26  ;;  %v5137_v12 = vmul.f32 %v5135_v39, %v5100_v63  ;;  %v6553_v37 = vld [vmem:[%s9179_s3 + $0x8] ss:$12 sps:$4 sm:$0xff]  }
 0x825   : > { %v5130_v58 = vmul.f32 %v5129_v36, %v5124_v45  ;;  %v5131_v25 = vmul.f32 %v5129_v36, %v5125_v40  ;;  %v5149_v4 = vmul.f32 %v5147_v0, %v5068_v15  ;;  %v5154_v53 = vmul.f32 %v5153_v35, %v5148_v2  ;;  %v6041_v26 = vld [vmem:[%s9178_s4] ss:$0 sm:$0xff]  ;;  %v6556_v47 = vld [vmem:[%s9179_s3 + $0x1c] ss:$12 sps:$4 sm:$0xff]   ;;  %s9180_s4 = sld [smem:[#allocation34_spill]] }
 0x826   : > { %v5089_v20 = vadd.f32 %v5087_v24, %v5077_v38  ;;  %v5122_v34 = vadd.f32 %v5120_v13, %v5110_v51  ;;  %v5142_v22 = vmul.f32 %v5141_v52, %v5136_v7  ;;  %v5143_v10 = vmul.f32 %v5141_v52, %v5137_v12  ;;  %v6550_v43 = vld [vmem:[%s9179_s3] ss:$12 sps:$4 sm:$0xff]   ;;  %v6554_v24 = vld [vmem:[%s9179_s3 + $0x18] ss:$12 sps:$4 sm:$0xff]   ;;  %v6558_v57 = vld [vmem:[%s9179_s3 + $0x30] ss:$12 sps:$4 sm:$0xff]  }
 0x827   : > { %v5164_v54 = vmul.f32 %v5163_v18, %v5081_v62  ;;  %v5155_v49 = vmul.f32 %v5153_v35, %v5149_v4  ;;  %v5171_v6 = vmul.f32 %v5169_v28, %v5100_v63  ;;  %v5165_v31 = vmul.f32 %v5163_v18, %v5159_v33  ;;  %v6552_v63 = vld [vmem:[%s9179_s3 + $0x4] ss:$12 sps:$4 sm:$0xff]   ;;  %v6557_v36 = vld [vmem:[%s9179_s3 + $0x20] ss:$12 sps:$4 sm:$0xff]   ;;  %v6562_v42 = vld [vmem:[%s9179_s3 + $0x48] ss:$12 sps:$4 sm:$0xff]  }
 0x828   : > { %v5111_v60 = vadd.f32 %v5109_v27, %v5089_v20  ;;  %v5132_v44 = vadd.f32 %v5130_v58, %v5122_v34  ;;  %v5176_v32 = vmul.f32 %v6040_v46, %v5170_v59  ;;  %5378 = vmatprep.subr.bf16.mxu1 %v6552_v63  ;;  %v6560_v38 = vld [vmem:[%s9179_s3 + $0x34] ss:$12 sps:$4 sm:$0xff]   ;;  %v6561_v56 = vld [vmem:[%s9179_s3 + $0x38] ss:$12 sps:$4 sm:$0xff]   ;;  %v6565_v45 = vld [vmem:[%s9179_s3 + $0x50] ss:$12 sps:$4 sm:$0xff]  }
 0x829   : > { %v5177_v21 = vmul.f32 %v6040_v46, %v5171_v6  ;;  %5379 = vmatpush1.bf16.msra.mxu1 %v6550_v43  ;;  %v6564_v55 = vld [vmem:[%s9179_s3 + $0x4c] ss:$12 sps:$4 sm:$0xff]   ;;  %v6042_v13 = vld [vmem:[%s9181_s1] ss:$0 sm:$0xff]  ;;  %s9182_s1 = sld [smem:[#allocation33_spill]]  ;;  %s1007_s3 = sand.u32 1, %s6648_s10  }
 0x82a   : > { %v5123_v5 = vadd.f32 %v5121_v41, %v5111_v60  ;;  %v5144_v23 = vadd.f32 %v5142_v22, %v5132_v44  ;;  %5380 = vmatprep.subr.bf16.mxu1 %v6556_v47  ;;  %s5722_s9 = scalar_lea.sflag [#allocation10], %s1007_s3 }
 0x82b   : > { %v6566_v39 = vld [vmem:[%s9180_s4 + $0x40] sm:$0xff]   ;;  %v6569_v28 = vld [vmem:[%s9180_s4 + $0x8] sm:$0xff]   ;;  %v6573_v59 = vld [vmem:[%s9180_s4 + $0x18] sm:$0xff]  }
 0x82c   : > { %v5133_v48 = vadd.f32 %v5131_v25, %v5123_v5  ;;  %v5156_v61 = vadd.f32 %v5154_v53, %v5144_v23  ;;  %v6567_v22 = vld [vmem:[%s9180_s4] sm:$0xff]   ;;  %v6571_v23 = vld [vmem:[%s9180_s4 + $0x10] sm:$0xff]   ;;  %v6572_v53 = vld [vmem:[%s9180_s4 + $0x58] sm:$0xff]  }
 0x82d   : > { %5381 = vmatpush1.bf16.msra.mxu1 %v6554_v24  ;;  %v6574_v46 = vld [vmem:[%s9180_s4 + $0x60] sm:$0xff]   ;;  %v6580_v6 = vld [vmem:[%s9180_s4 + $0x78] sm:$0xff]  }
 0x82e   : > { %v5145_v29 = vadd.f32 %v5143_v10, %v5133_v48  ;;  %v5166_v15 = vadd.f32 %v5164_v54, %v5156_v61  ;;  %5382 = vmatprep.subr.bf16.mxu1 %v6560_v38  ;;  %v6568_v10 = vld [vmem:[%s9180_s4 + $0x48] sm:$0xff]   ;;  %v6570_v48 = vld [vmem:[%s9180_s4 + $0x50] sm:$0xff]   ;;  %v6575_v33 = vld [vmem:[%s9180_s4 + $0x20] sm:$0xff]  }
 0x82f   : > { %v6576_v54 = vld [vmem:[%s9180_s4 + $0x68] sm:$0xff]   ;;  %v6579_v61 = vld [vmem:[%s9180_s4 + $0x30] sm:$0xff]   ;;  %v6582_v24 = vld [vmem:[%s9180_s4 + $0x80] ss:$0 sps:$4 sm:$0xff]  }
 0x830   : > { %v5157_v1 = vadd.f32 %v5155_v49, %v5145_v29  ;;  %v5178_v3 = vadd.f32 %v5176_v32, %v5166_v15  ;;  %v6577_v29 = vld [vmem:[%s9180_s4 + $0x28] sm:$0xff]   ;;  %v6578_v49 = vld [vmem:[%s9180_s4 + $0x70] sm:$0xff]  }
 0x831   : > { %5383 = vmatpush1.bf16.msra.mxu1 %v6558_v57 }
 0x832   : > { %v5167_v30 = vadd.f32 %v5165_v31, %v5157_v1  ;;  %v5187_v62 = vadd.f32 %v6041_v26, %v5178_v3  ;;  %5384 = vmatprep.subr.bf16.mxu1 %v6564_v55  ;;  %v6581_v1 = vld [vmem:[%s9180_s4 + $0x38] sm:$0xff]   ;;  %v5294_v31 = vld [vmem:[%s9182_s1] sm:$0x7]  ;;  %s5686_s1 = sld [smem:[#allocation7]]  ;;  %s5832_s4 = sshll.u32 %s1007_s3, 3 }
 0x833   : > { %v5363_v15 = vrot.slane %v5294_v31, %v7182_v8  ;;  %v5367_v32 = vrot.slane %v5294_v31, %v7185_v9  ;;  %v5371_v43 = vrot.slane %v5294_v31, %v7200_v17  ;;  %v5604_v9 = vsel %vm5602_vm9, %v6582_v24, 0  ;;  %s1009_s5 = scalar_lea.vmem [#allocation9], %s5832_s4 }
 0x834   : > { %v5179_v50 = vadd.f32 %v5177_v21, %v5167_v30  ;;  %s5736_s6 = sshll.u32 %s1009_s5, 4  ;;  %s9079_s6 = int_to_ptr.vmem [resolvable:$true] %s5736_s6 }
 0x835   : > { %5385 = vmatpush1.bf16.msra.mxu1 %v6562_v42  ;;  %s6594_s12 = scalar_lea.vmem %s9079_s6, 128 }
 0x836   : > { %v5188_v14 = vadd.f32 %v6041_v26, %v5179_v50  ;;  %6157 = vmatprep.subr.bf16.mxu1 %v6566_v39  ;;  %p6595_p11 = scmp.ne.s32.totalorder %s9079_s6, %s6594_s12 }
 0x838   : > { %v5189_v19 = vpack.c.bf16 %v5188_v14, %v5187_v62  ;;  %v5688_v17 = vstv %s5686_s1  ;;  %s5687_s1 = sld [smem:[#allocation8]]  ;;  %p6596_p12 = pnand %p6595_p11, %p6907_p5 }
 0x839   : > { %6583 = vrcp.f32 %v5688_v17 }
 0x83a   : > { %6312 = vmatmul.mubr.msk.bf16.vlgmr.msra.gmra.mrb[84].mxu0 %vm5047_vm8, %v5189_v19  ;;  %p6597_p13 = pneg %p6596_p12 }
 0x83b   : > { %6323 = vmatprep.mubr.msk.bf16.mxu0 %vm6695_vm7, %v8965_v16  ;;  %6316 = vmatpush3.bf16.msra.mxu0 %v6553_v37 }
 0x83c   : > { %6317 = vmatprep.subr.bf16.mxu0 %v8965_v16 }
 0x83f   : > { %6318 = vmatpush3.bf16.msra.mxu0 %v6557_v36 }
 0x840   : > { %6319 = vmatprep.subr.bf16.mxu0 %v8965_v16 }
 0x843   : > { %6320 = vmatpush3.bf16.msra.mxu0 %v6561_v56 }
 0x844   : > { %6321 = vmatprep.subr.bf16.mxu0 %v8965_v16 }
 0x847   : > { %6322 = vmatpush3.bf16.msra.mxu0 %v6565_v45 }
 0x90d   : > { %v5258_v52 = vpop.f32.mrb[84].mxu0 }
 0x90e   : > { %v5259_v20 = vadd.f32 %v6042_v13, %v5258_v52  ;;  %v6313_v27 = vpop.f32.mrb[85].mxu0 }
 0x90f   : > { %v5261_v51 = vpop.f32.mrb[86].mxu0  ;;  %v5498_v27 = vld [vmem:[%s6851_s20] sm:$0x1] }
 0x910   : > { %v5265_v40 = vmax.f32 %v5259_v20, 0.0  ;;  %v5262_v7 = vadd.f32 %v6042_v13, %v5261_v51  ;;  %v6314_v58 = vpop.f32.mrb[87].mxu0 }
 0x912   : > { %v5266_v12 = vmax.f32 %v5262_v7, 0.0  ;;  %v5267_v0 = vsel %vm4818_vm6, %v5265_v40, 0.0  ;;  %v6584_v40 = vpop.eup %6583 }
 0x914   : > { %v5268_v35 = vsel %vm4818_vm6, %v5266_v12, 0.0 }
 0x915   : > { %v5269_v60 = vadd.f32 %v5268_v35, %v5267_v0 }
 0x917   : > { %v5270_v41 = vrot.slane %v5269_v60, 4 }
 0x919   : > { %v5271_v34 = vadd.f32 %v5270_v41, %v5269_v60 }
 0x91b   : > { %v5272_v2 = vrot.slane %v5271_v34, 2 }
 0x91d   : > { %v5273_v25 = vadd.f32 %v5272_v2, %v5271_v34 }
 0x91f   : > { %v5274_v18 = vrot.slane %v5273_v25, 1 }
 0x921   : > { %v5275_v5 = vadd.f32 %v5274_v18, %v5273_v25  ;;  %v5697_v25 = vstv %s5687_s1  ;;  %s6085_s1 = sshll.u32 %s6890_s0, 7  ;;  %s6697_s0 = smov [#allocation9]  }
 0x922   : > { %s9077_s8 = scalar_lea.hbm %s6867_s2, %s6085_s1  ;;  %s6598_s4 = sshll.u32 %s6697_s0, 4  ;;  %s6599_s4 = int_to_ptr.vmem [resolvable:$false] %s6598_s4 }
 0x923   : > { %v5276_v44 = vmul.f32 0.0625, %v5275_v5  ;;  %s6600_s13 = scalar_lea.vmem %s6599_s4, 256  ;;  %p6601_p0 = scmp.lt.s32.totalorder %s9079_s6, %s6599_s4 }
 0x924   : > { %p6602_p1 = scmp.lt.s32.totalorder %s6600_s13, %s6594_s12 }
 0x925   : > { %v5277_v4 = vpack.c.bf16 %v5276_v44, %v5276_v44  ;;  %v5700_v44 = vld [vmem:[%s6856_s30] sm:$0xf] }
 0x926   : > { %p6603_p2 = por %p6602_p1, %p6601_p0 }
 0x927   : > { %6059 = vmatmul.mubr.msk.bf16.vlgmr.msra.gmra.mrb[68].mxu1 %vm4818_vm6, %v5277_v4  ;;  %6324 = vmatmul.mubr.msk.bf16.vlgmr.msra.gmra.mrb[88].mxu0 %vm4818_vm6, %v5277_v4 }
 0x928   : > { %6158 = vmatpush3.bf16.msra.mxu1 %v6567_v22  ;;  %p6604_p3 = pnand %p6603_p2, %p6597_p13 }
 0x929   : > { %6159 = vmatprep.subr.bf16.mxu1 %v6568_v10 }
 0x92c   : > { %6160 = vmatpush3.bf16.msra.mxu1 %v6569_v28  ;;  %v6696_v28 = vmov 839922192  }
 0x92d   : > { %6161 = vmatprep.subr.bf16.mxu1 %v6570_v48  ;;  %v5712_v48 = vunpack.c.l.s4 %v6696_v28 }
 0x930   : > { %6162 = vmatpush3.bf16.msra.mxu1 %v6571_v23  ;;  %v5713_v23 = vunpack.c.0.s8 %v5712_v48 }
 0x931   : > { %6163 = vmatprep.subr.bf16.mxu1 %v6572_v53 }
 0x932   : > { %v5716_v53 = vsub.s32 %v5713_v23, %v6948_v11 }
 0x934   : > { %6164 = vmatpush3.bf16.msra.mxu1 %v6573_v59 }
 0x935   : > { %6165 = vmatprep.subr.bf16.mxu1 %v6574_v46 }
 0x938   : > { %6166 = vmatpush3.bf16.msra.mxu1 %v6575_v33 }
 0x939   : > { %6167 = vmatprep.subr.bf16.mxu1 %v6576_v54 }
 0x93c   : > { %6168 = vmatpush3.bf16.msra.mxu1 %v6577_v29 }
 0x93d   : > { %6169 = vmatprep.subr.bf16.mxu1 %v6578_v49 }
 0x940   : > { %6170 = vmatpush3.bf16.msra.mxu1 %v6579_v61 }
 0x941   : > { %6171 = vmatprep.subr.bf16.mxu1 %v6580_v6 }
 0x944   : > { %6172 = vmatpush3.bf16.msra.mxu1 %v6581_v1 }
 0x945   : > { %6327 = vmatprep.subr.bf16.mxu1 %v8965_v16 }
 0x9fa   : > { %v5412_v30 = vpop.f32.mrb[68].mxu1  ;;  %v5453_v21 = vpop.f32.mrb[88].mxu0 }
 0x9fb   : > { %v5413_v3 = vadd.f32 %v5412_v30, %v5363_v15  ;;  %v5414_v26 = vpop.f32.mrb[69].mxu1  ;;  %v6325_v50 = vpop.f32.mrb[89].mxu0  ;;  %v5454_v56 = vadd.f32 %v5453_v21, %v5371_v43 }
 0x9fc   : > { %v5415_v62 = vadd.f32 %v5414_v26, %v5367_v32  ;;  %v5416_v14 = vpop.f32.mrb[70].mxu1  ;;  %v5456_v19 = vpop.f32.mrb[90].mxu0 }
 0x9fd   : > { %v5459_v63 = vmax.f32 %v5413_v3, 0.0  ;;  %v5417_v37 = vpop.f32.mrb[71].mxu1  ;;  %v6326_v47 = vpop.f32.mrb[91].mxu0  ;;  %v5461_v55 = vmax.f32 %v5454_v56, 0.0 }
 0x9fe   : > { %v5460_v36 = vmax.f32 %v5415_v62, 0.0 }
 0x9ff   : > { %v5462_v38 = vpack.c.bf16 %v5459_v63, %v5459_v63  ;;  %v5464_v42 = vpack.c.bf16 %v5461_v55, %v5461_v55 }
 0xa00   : > { %v5463_v57 = vpack.c.bf16 %v5460_v36, %v5460_v36 }
 0xa02   : > { %5638 = vmatprep.mubr.bf16.mxu1 %v5463_v57 }
 0xa03   : > { %5639 = vmatmul.mubr.bf16.vlgmr.msra.gmra.mrb[72].mxu1 %v5462_v38 }
 0xa04   : > { %6328 = vmatpush3.bf16.msra.mxu1 %v5604_v9  ;;  %6329 = vmatprep.mubr.msk.bf16.mxu1 %vm6695_vm7, %v8965_v16 }
 0xa0b   : > { %6330 = vmatmul.mubr.msk.bf16.vlgmr.msra.gmra.mrb[76].mxu1 %vm5598_vm10, %v5464_v42 }
 0xad6   : > { %v6173_v45 = vpop.f32.mrb[72].mxu1 }
 0xad7   : > { %v6174_v39 = vpop.f32.mrb[73].mxu1 }
 0xad8   : > { %v6175_v13 = vadd.f32 %v6174_v39, %v6173_v45  ;;  %v6176_v52 = vpop.f32.mrb[74].mxu1 }
 0xad9   : > { %v6177_v20 = vpop.f32.mrb[75].mxu1 }
 0xada   : > { %v5641_v51 = vadd.f32 %v6175_v13, %v5498_v27 }
 0xade   : > { %v5680_v7 = vpop.f32.mrb[76].mxu1 }
 0xadf   : > { %v5681_v58 = vadd.f32 %v5680_v7, %v5641_v51  ;;  %v6331_v12 = vpop.f32.mrb[77].mxu1 }
 0xae0   : > { %v5683_v16 = vpop.f32.mrb[78].mxu1 }
 0xae1   : > { %v5690_v0 = vmul.f32 %v6584_v40, %v5681_v58  ;;  %v6332_v35 = vpop.f32.mrb[79].mxu1 }
 0xae3   : > { %v5691_v60 = vsub.f32 0.0, %v5690_v0  ;;  %vm5698_vm11 = vcmp.ge.f32.partialorder %v5690_v0, %v5697_v25 }
 0xae5   : > { %v5692_v41 = vmul.f32 1.442695, %v5691_v60 }
 0xae7   : > { %6585 = vpow2.f32 %v5692_v41 }
 0xaf1   : > { %v6586_v34 = vpop.eup %6585 }
 0xaf2   : > { %v5694_v2 = vadd.f32 1.0, %v6586_v34 }
 0xaf4   : > { %6587 = vrcp.f32 %v5694_v2 }
 0xafe   : > { %v6588_v18 = vpop.eup %6587 }
 0xaff   : > { %v5699_v5 = vsel %vm5698_vm11, %v6588_v18, 0.0 }
 0xb00   : > { %v5704_v22 = vrot.slane %v5699_v5, %v7182_v8  ;;  %v6593_v8 = vld [vmem:[%s6943_s28] sm:$0xff] }
 0xb02   : > { %v5705_v4 = vmul.f32 %v5704_v22, %v5700_v44 }
 0xb04   : > { %v5707_v10 = vsel %vm5706_vm12, %v5705_v4, 0.0 }
 0xb05   : > { %5708 = vadd.xlane.f32.xlu0 %v5707_v10 }
 0xb92   : > { %v5709_v59 = vpop.xlane.xlu0 %5708 }
 0xb93   : > { %v5717_v46 = vrot.slane %v5709_v59, %v5716_v53 }
 0xb95   : > { %v5719_v33 = vmul.f32 %v6593_v8, %v5717_v46 }
 0xb97   : > { %5720 = vst [vmem:[%s1009_s5] sm:$0xff] %v5719_v33 }
 0xb98   : > { %6607 = shalt.err (!%p6604_p3)
}
 0xb99   : > { %s6608_s5 = scalar_lea.hbm %s9077_s8, 128  ;;  %s6612_s3 = scalar_lea.hbm %s6867_s2, 256 }
 0xb9a   : > { %p6609_p4 = scmp.ne.s32.totalorder %s9077_s8, %s6608_s5  ;;  %p6613_p9 = scmp.lt.u32.totalorder %s9077_s8, %s6867_s2 }
 0xb9b   : > { %p6614_p10 = scmp.lt.u32.totalorder %s6612_s3, %s6608_s5  ;;  %p6616_p12 = scmp.lt.u32.totalorder %s6608_s5, %s9077_s8 }
 0xb9c   : > { %p6610_p7 = pnand %p6609_p4, %p6907_p5 }
 0xb9d   : > { %p6615_p11 = por %p6614_p10, %p6613_p9 }
 0xb9e   : > { %p6611_p8 = pneg %p6610_p7 }
 0xb9f   : > { %p6617_p0 = por %p6616_p12, %p6615_p11 }
 0xba1   : > { %p6618_p13 = pnand %p6617_p0, %p6611_p8 }
 0xba3   : > { %6621 = shalt.err (!%p6618_p13)
}
 0xba4   : > { %6448 = dma.vmem_to_hbm [thread:$0]  (%p6907_p5), %s9079_s6, 128, %s9077_s8, %s5722_s9  }
 0xba5 PF: > { %p6454_p1 = scmp.ge.s32.totalorder %s6656_s15, 2  ;;  %s5748_s13 = sand.u32 1, %s6644_s7  }
 0xba6   : > { %s5749_s12 = scalar_lea.sflag [#allocation10], %s5748_s13 }
 0xba7   : > { %p6451_p2 = pnand %p6454_p1, %p6911_p6 }
 0xba9   : > { %6639 = dma.done.wait (!%p6451_p2), %s5749_s12, 128  }
 0xbaa   : > { %6641 = vsyncadd (!%p6451_p2), %s5749_s12, 4294967168  ;;  %p79_p3 = scmp.ge.s32.totalorder %s6894_s14, 4   ;;  %s9183_s7 = smov %s6648_s10 }
 0xbab   : > { %s9184_s10 = smov %s6652_s11  ;;  %s9185_s11 = smov %s6905_s18 }
 0xbac   : > { %s9186_s15 = smov %s6894_s14  ;;  %81 = sbr.rel (!%p79_p3) target bundleno = 68 (0x44), region = 225 }
 0xbb3   :  { %5754 = vsyncpa [#allocation10], 1 }
 0xbb4   :  { %5756 = vsyncpa [#allocation10 + $0x1], 1 }

</bundles_post_ra>
